<compile_context>
chip_gen: v5e
topology: v5e:2x2
jax: 0.10.0
libtpu: 0.0.40
codegen_flags: <defaults>
</compile_context>

<pallas_src>
import functools

import jax
import jax.numpy as jnp
from jax import lax
from jax.experimental import pallas as pl
from jax.experimental.pallas import tpu as pltpu


def _round_up(x, m):
    return (x + m - 1) // m * m


def _vmem_limit_bytes():
    """Generation-aware scoped-VMEM limit: ~48 MiB on v7x (64 MiB/TC), 64 MiB else."""
    try:
        cap = int(pltpu.get_tpu_info().vmem_capacity_bytes)
    except Exception:
        cap = 128 * 1024 * 1024
    if cap <= 64 * 1024 * 1024:           # v7x-class TensorCore
        return 48 * 1024 * 1024
    return 64 * 1024 * 1024               # v5e / v6e (128 MiB physical)


def _pick_band_rows(H, W, Cin, Cout_p, itemsize, vmem_limit_bytes):
    """Largest even divisor of H whose per-step working set fits ~half the VMEM budget."""
    budget = vmem_limit_bytes // 2
    fixed = (9 * Cin * Cout_p * itemsize          # resident weights
             + 4 * Cout_p                          # bias
             + 2 * (W + 2) * Cin * itemsize        # scratch halo rows
             + (1 << 20))                          # slack for Mosaic internals
    per_row = (3 * W * Cin * itemsize              # band double-buffer (2x) + scratch interior
               + 4 * W * Cout_p                    # f32 accumulator
               + (W // 2) * Cout_p * itemsize)     # pooled output (double-buffered)
    max_rows = max(2, (budget - fixed) // per_row)
    best = 2
    cand = 2
    while cand <= H:
        if H % cand == 0 and cand <= max_rows:
            best = cand
        cand += 2
    return best


def _down_conv_band_kernel(xb_ref, xt_ref, xbot_ref, w_ref, b_ref, o_ref, xp_ref,
                           *, Hb, W, Cin, Cout_p):
    """One (batch, H-band) grid step: 3x3 conv (pad=1) + bias + ReLU + 2x2/2 max pool.

    xb_ref  : (1, Hb, W, Cin)       input rows [j*Hb, (j+1)*Hb)
    xt_ref  : (1, 1, W, Cin)        input row j*Hb - 1 (clamped; zero-masked for band 0)
    xbot_ref: (1, 1, W, Cin)        input row (j+1)*Hb (clamped; zero-masked for last band)
    w_ref   : (9*Cin, Cout_p)       im2col weights, rows ordered (kh, kw, ci)
    b_ref   : (1, Cout_p)           bias, f32 (zero-padded to Cout_p)
    o_ref   : (1, Hb//2, W//2, Cout_p)
    xp_ref  : (Hb+2, W+2, Cin)      padded band scratch, activation dtype
    """
    j = pl.program_id(1)
    last = pl.num_programs(1) - 1
    dt = xp_ref.dtype

    # ---- build the zero-padded band: write only the halo + interior -------------
    xp_ref[:, 0:1, :] = jnp.zeros((Hb + 2, 1, Cin), dt)          # left pad column
    xp_ref[:, W + 1:W + 2, :] = jnp.zeros((Hb + 2, 1, Cin), dt)  # right pad column

    @pl.when(j == 0)
    def _():
        xp_ref[0:1, 1:W + 1, :] = jnp.zeros((1, W, Cin), dt)     # top zero pad

    @pl.when(j > 0)
    def _():
        xp_ref[0:1, 1:W + 1, :] = xt_ref[0]                      # last row of prev band

    @pl.when(j == last)
    def _():
        xp_ref[Hb + 1:Hb + 2, 1:W + 1, :] = jnp.zeros((1, W, Cin), dt)  # bottom zero pad

    @pl.when(j < last)
    def _():
        xp_ref[Hb + 1:Hb + 2, 1:W + 1, :] = xbot_ref[0]          # first row of next band

    xp_ref[1:Hb + 1, 1:W + 1, :] = xb_ref[0]                     # interior (overwrites rest)
    xp = xp_ref[...]                                             # (Hb+2, W+2, Cin)

    # ---- 3x3 conv as 9 accumulating (Hb*W, Cin) x (Cin, Cout_p) MXU matmuls ------
    # f32 accumulation; no im2col tensor is ever materialized.
    acc = None
    for kh in range(3):
        for kw in range(3):
            t = kh * 3 + kw
            tap = xp[kh:kh + Hb, kw:kw + W, :].reshape(Hb * W, Cin)
            part = jnp.dot(tap, w_ref[t * Cin:(t + 1) * Cin, :],
                           preferred_element_type=jnp.float32)
            acc = part if acc is None else acc + part
    acc = acc + b_ref[...]                                       # (1, Cout_p) broadcast
    y = jnp.maximum(acc, 0.0)                                    # ReLU in f32

    # ---- 2x2 max pool, stride 2 (Hb even; bands start on even rows) -------------
    y = y.reshape(Hb // 2, 2, W // 2, 2, Cout_p)
    y = jnp.maximum(jnp.maximum(y[:, 0, :, 0], y[:, 0, :, 1]),
                    jnp.maximum(y[:, 1, :, 0], y[:, 1, :, 1]))
    o_ref[0] = y.astype(o_ref.dtype)


def down_conv_block_nhwc(x_nhwc, w_oihw, b, *, band_rows=None):
    """DownConvBlock forward on NHWC activations (no layout round trips).

    Pass x / w as bf16 in production: half the HBM traffic and native MXU inputs;
    accumulation is f32 regardless.
    """
    B, H, W, Cin = x_nhwc.shape
    Cout = w_oihw.shape[0]
    assert w_oihw.shape == (Cout, Cin, 3, 3), w_oihw.shape
    assert H % 2 == 0 and W % 2 == 0

    Cout_p = _round_up(Cout, 128)                     # lane-dense output stores
    itemsize = jnp.dtype(x_nhwc.dtype).itemsize
    vmem_limit = _vmem_limit_bytes()
    if band_rows is None:
        band_rows = _pick_band_rows(H, W, Cin, Cout_p, itemsize, vmem_limit)
    assert band_rows % 2 == 0 and H % band_rows == 0, (band_rows, H)
    Hb = band_rows
    n_bands = H // Hb

    # OIHW -> rows ordered (kh, kw, ci), columns co; zero-pad co to Cout_p; take the
    # activation dtype so the MXU sees matching (e.g. bf16 x bf16) inputs.
    w_im2col = jnp.transpose(w_oihw, (2, 3, 1, 0)).reshape(9 * Cin, Cout)
    w_im2col = jnp.pad(w_im2col, ((0, 0), (0, Cout_p - Cout))).astype(x_nhwc.dtype)
    b2 = jnp.pad(b, (0, Cout_p - Cout)).reshape(1, Cout_p).astype(jnp.float32)

    kernel = functools.partial(_down_conv_band_kernel,
                               Hb=Hb, W=W, Cin=Cin, Cout_p=Cout_p)

    flops = 2 * B * H * W * 9 * Cin * Cout_p
    bytes_accessed = (x_nhwc.size * itemsize
                      + w_im2col.size * itemsize
                      + b2.size * 4
                      + B * (H // 2) * (W // 2) * Cout_p * itemsize)

    out_full = pl.pallas_call(
        kernel,
        out_shape=jax.ShapeDtypeStruct((B, H // 2, W // 2, Cout_p), x_nhwc.dtype),
        grid_spec=pltpu.PrefetchScalarGridSpec(
            num_scalar_prefetch=0,
            grid=(B, n_bands),
            in_specs=[
                # band of input rows [j*Hb, (j+1)*Hb)
                pl.BlockSpec((1, Hb, W, Cin), lambda i, j: (i, j, 0, 0)),
                # top halo row j*Hb - 1 (clamped in range; zero-masked in-kernel for band 0)
                pl.BlockSpec((1, 1, W, Cin),
                             lambda i, j: (i, jnp.maximum(j * Hb - 1, 0), 0, 0)),
                # bottom halo row (j+1)*Hb (clamped in range; zero-masked for the last band)
                pl.BlockSpec((1, 1, W, Cin),
                             lambda i, j: (i, jnp.minimum(j * Hb + Hb, H - 1), 0, 0)),
                pl.BlockSpec((9 * Cin, Cout_p), lambda i, j: (0, 0)),   # weights resident
                pl.BlockSpec((1, Cout_p), lambda i, j: (0, 0)),         # bias resident
            ],
            out_specs=pl.BlockSpec((1, Hb // 2, W // 2, Cout_p),
                                   lambda i, j: (i, j, 0, 0)),
            scratch_shapes=[pltpu.VMEM((Hb + 2, W + 2, Cin), x_nhwc.dtype)],
        ),
        compiler_params=pltpu.CompilerParams(
            dimension_semantics=("parallel", "parallel"),   # batch and band independent
            vmem_limit_bytes=vmem_limit,
        ),
        cost_estimate=pl.CostEstimate(flops=flops, transcendentals=0,
                                      bytes_accessed=bytes_accessed),
    )(x_nhwc, x_nhwc, x_nhwc, w_im2col, b2)

    return out_full[..., :Cout] if Cout_p != Cout else out_full


def down_conv_block(x_nchw, w_oihw, b, *, band_rows=None):
    """PyTorch-parity NCHW interface.

    NOTE: the two transposes are HBM round trips; in a real model keep activations
    NHWC end-to-end and call down_conv_block_nhwc directly.
    """
    x_nhwc = jnp.transpose(x_nchw, (0, 2, 3, 1))
    out_nhwc = down_conv_block_nhwc(x_nhwc, w_oihw, b, band_rows=band_rows)
    return jnp.transpose(out_nhwc, (0, 3, 1, 2))


def _reference(x_nchw, w_oihw, b):
    """Pure-JAX reference matching PyTorch semantics (f32, highest precision)."""
    y = lax.conv_general_dilated(
        x_nchw, w_oihw, window_strides=(1, 1), padding=((1, 1), (1, 1)),
        dimension_numbers=("NCHW", "OIHW", "NCHW"),
        precision=lax.Precision.HIGHEST)
    y = y + b.reshape(1, -1, 1, 1)
    y = jnp.maximum(y, 0.0)
    y = lax.reduce_window(y, -jnp.inf, lax.max,
                          window_dimensions=(1, 1, 2, 2),
                          window_strides=(1, 1, 2, 2),
                          padding="VALID")
    return y


if __name__ == "__main__":
    B, Cin, Cout, H, W = 2, 4, 8, 16, 16

    key = jax.random.PRNGKey(0)
    kx, kw, kb = jax.random.split(key, 3)

    x = jax.random.normal(kx, (B, Cin, H, W), dtype=jnp.float32)

    # Deterministic init matching nn.Conv2d parameter shapes.
    fan_in = Cin * 3 * 3
    bound = 1.0 / jnp.sqrt(float(fan_in))
    w = jax.random.uniform(kw, (Cout, Cin, 3, 3), jnp.float32, -bound, bound)
    b = jax.random.uniform(kb, (Cout,), jnp.float32, -bound, bound)

    ref = _reference(x, w, b)

    # --- f32, auto band size (single band at this tiny H) ----------------------
    out = jax.block_until_ready(down_conv_block(x, w, b))
    assert out.shape == (B, Cout, H // 2, W // 2), out.shape
    assert jnp.allclose(out, ref, atol=2e-5, rtol=1e-5), \
        float(jnp.max(jnp.abs(out - ref)))

    # --- f32, forced multi-band (exercises the 2-row halo / band boundary path) -
    out4 = jax.block_until_ready(down_conv_block(x, w, b, band_rows=4))
    assert jnp.allclose(out4, ref, atol=2e-5, rtol=1e-5), \
        float(jnp.max(jnp.abs(out4 - ref)))

    # --- bf16 activations/weights, two bands (half HBM traffic, f32 accumulate) -
    xb = x.astype(jnp.bfloat16)
    wb = w.astype(jnp.bfloat16)
    out_bf = jax.block_until_ready(down_conv_block(xb, wb, b, band_rows=8))
    ref_bf = _reference(xb.astype(jnp.float32), wb.astype(jnp.float32), b)
    assert out_bf.dtype == jnp.bfloat16
    assert jnp.allclose(out_bf.astype(jnp.float32), ref_bf, atol=5e-2, rtol=5e-2), \
        float(jnp.max(jnp.abs(out_bf.astype(jnp.float32) - ref_bf)))

    print("KERNEL_OK")
</pallas_src>

<mosaic_0001>
module attributes {stable_mosaic.version = 11 : i64} {
  func.func @_down_conv_band_kernel(%arg0: i32, %arg1: i32, %arg2: memref<1x16x16x4xf32, #tpu.memory_space<vmem>>, %arg3: memref<1x1x16x4xf32, #tpu.memory_space<vmem>>, %arg4: memref<1x1x16x4xf32, #tpu.memory_space<vmem>>, %arg5: memref<36x128xf32, #tpu.memory_space<vmem>>, %arg6: memref<1x128xf32, #tpu.memory_space<vmem>>, %arg7: memref<1x8x8x128xf32, #tpu.memory_space<vmem>>, %arg8: memref<18x18x4xf32, #tpu.memory_space<vmem>>) attributes {dimension_semantics = [#tpu.dimension_semantics<parallel>, #tpu.dimension_semantics<parallel>], iteration_bounds = array<i64: 2, 1>, scalar_prefetch = 0 : i64, scratch_operands = 1 : i64, tpu.core_type = #tpu.core_type<tc>, window_params = [{transform_indices = @transform_0, window_bounds = array<i64: 1, 16, 16, 4>}, {transform_indices = @transform_1, window_bounds = array<i64: 1, 1, 16, 4>}, {transform_indices = @transform_2, window_bounds = array<i64: 1, 1, 16, 4>}, {pipeline_mode = #tpu.pipeline_mode<synchronous>, transform_indices = @transform_3, window_bounds = array<i64: 36, 128>}, {pipeline_mode = #tpu.pipeline_mode<synchronous>, transform_indices = @transform_4, window_bounds = array<i64: 1, 128>}, {transform_indices = @transform_5, window_bounds = array<i64: 1, 8, 8, 128>}]} {
    %cst = arith.constant 0.000000e+00 : f32
    %0 = vector.broadcast %cst : f32 to vector<18x1x4xf32>
    %c0 = arith.constant 0 : index
    %c0_0 = arith.constant 0 : index
    %c0_1 = arith.constant 0 : index
    %1 = vector.load %arg8[%c0, %c0_0, %c0_1] : memref<18x18x4xf32, #tpu.memory_space<vmem>>, vector<18x1x4xf32>
    tpu.vector_store %arg8[%c0, %c0_0, %c0_1], %0 {strides = array<i32>} : memref<18x18x4xf32, #tpu.memory_space<vmem>>, vector<18x1x4xf32>,
    %cst_2 = arith.constant 0.000000e+00 : f32
    %2 = vector.broadcast %cst_2 : f32 to vector<18x1x4xf32>
    %c0_3 = arith.constant 0 : index
    %c17 = arith.constant 17 : index
    %c0_4 = arith.constant 0 : index
    %3 = vector.load %arg8[%c0_3, %c17, %c0_4] : memref<18x18x4xf32, #tpu.memory_space<vmem>>, vector<18x1x4xf32>
    tpu.vector_store %arg8[%c0_3, %c17, %c0_4], %2 {strides = array<i32>} : memref<18x18x4xf32, #tpu.memory_space<vmem>>, vector<18x1x4xf32>,
    %c0_i32 = arith.constant 0 : i32
    %4 = arith.cmpi eq, %arg1, %c0_i32 : i32
    %5 = arith.extui %4 : i1 to i32
    %c0_i32_5 = arith.constant 0 : i32
    %6 = arith.cmpi ne, %5, %c0_i32_5 : i32
    scf.if %6 {
      %cst_47 = arith.constant 0.000000e+00 : f32
      %84 = vector.broadcast %cst_47 : f32 to vector<1x16x4xf32>
      %c0_48 = arith.constant 0 : index
      %c1_49 = arith.constant 1 : index
      %c0_50 = arith.constant 0 : index
      %85 = vector.load %arg8[%c0_48, %c1_49, %c0_50] : memref<18x18x4xf32, #tpu.memory_space<vmem>>, vector<1x16x4xf32>
      tpu.vector_store %arg8[%c0_48, %c1_49, %c0_50], %84 {strides = array<i32>} : memref<18x18x4xf32, #tpu.memory_space<vmem>>, vector<1x16x4xf32>,
    } else {
    }
    %c0_i32_6 = arith.constant 0 : i32
    %7 = arith.cmpi sgt, %arg1, %c0_i32_6 : i32
    %8 = arith.extui %7 : i1 to i32
    %c0_i32_7 = arith.constant 0 : i32
    %9 = arith.cmpi ne, %8, %c0_i32_7 : i32
    scf.if %9 {
      %c0_47 = arith.constant 0 : index
      %c0_48 = arith.constant 0 : index
      %c0_49 = arith.constant 0 : index
      %c0_50 = arith.constant 0 : index
      %84 = vector.load %arg3[%c0_47, %c0_48, %c0_49, %c0_50] : memref<1x1x16x4xf32, #tpu.memory_space<vmem>>, vector<1x1x16x4xf32>
      %85 = vector.shape_cast %84 : vector<1x1x16x4xf32> to vector<1x16x4xf32>
      %c0_51 = arith.constant 0 : index
      %c1_52 = arith.constant 1 : index
      %c0_53 = arith.constant 0 : index
      %86 = vector.load %arg8[%c0_51, %c1_52, %c0_53] : memref<18x18x4xf32, #tpu.memory_space<vmem>>, vector<1x16x4xf32>
      tpu.vector_store %arg8[%c0_51, %c1_52, %c0_53], %85 {strides = array<i32>} : memref<18x18x4xf32, #tpu.memory_space<vmem>>, vector<1x16x4xf32>,
    } else {
    }
    %c0_i32_8 = arith.constant 0 : i32
    %10 = arith.cmpi eq, %arg1, %c0_i32_8 : i32
    %11 = arith.extui %10 : i1 to i32
    %c0_i32_9 = arith.constant 0 : i32
    %12 = arith.cmpi ne, %11, %c0_i32_9 : i32
    scf.if %12 {
      %cst_47 = arith.constant 0.000000e+00 : f32
      %84 = vector.broadcast %cst_47 : f32 to vector<1x16x4xf32>
      %c17_48 = arith.constant 17 : index
      %c1_49 = arith.constant 1 : index
      %c0_50 = arith.constant 0 : index
      %85 = vector.load %arg8[%c17_48, %c1_49, %c0_50] : memref<18x18x4xf32, #tpu.memory_space<vmem>>, vector<1x16x4xf32>
      tpu.vector_store %arg8[%c17_48, %c1_49, %c0_50], %84 {strides = array<i32>} : memref<18x18x4xf32, #tpu.memory_space<vmem>>, vector<1x16x4xf32>,
    } else {
    }
    %c0_i32_10 = arith.constant 0 : i32
    %13 = arith.cmpi slt, %arg1, %c0_i32_10 : i32
    %14 = arith.extui %13 : i1 to i32
    %c0_i32_11 = arith.constant 0 : i32
    %15 = arith.cmpi ne, %14, %c0_i32_11 : i32
    scf.if %15 {
      %c0_47 = arith.constant 0 : index
      %c0_48 = arith.constant 0 : index
      %c0_49 = arith.constant 0 : index
      %c0_50 = arith.constant 0 : index
      %84 = vector.load %arg4[%c0_47, %c0_48, %c0_49, %c0_50] : memref<1x1x16x4xf32, #tpu.memory_space<vmem>>, vector<1x1x16x4xf32>
      %85 = vector.shape_cast %84 : vector<1x1x16x4xf32> to vector<1x16x4xf32>
      %c17_51 = arith.constant 17 : index
      %c1_52 = arith.constant 1 : index
      %c0_53 = arith.constant 0 : index
      %86 = vector.load %arg8[%c17_51, %c1_52, %c0_53] : memref<18x18x4xf32, #tpu.memory_space<vmem>>, vector<1x16x4xf32>
      tpu.vector_store %arg8[%c17_51, %c1_52, %c0_53], %85 {strides = array<i32>} : memref<18x18x4xf32, #tpu.memory_space<vmem>>, vector<1x16x4xf32>,
    } else {
    }
    %c0_12 = arith.constant 0 : index
    %c0_13 = arith.constant 0 : index
    %c0_14 = arith.constant 0 : index
    %c0_15 = arith.constant 0 : index
    %16 = vector.load %arg2[%c0_12, %c0_13, %c0_14, %c0_15] : memref<1x16x16x4xf32, #tpu.memory_space<vmem>>, vector<1x16x16x4xf32>
    %17 = vector.shape_cast %16 : vector<1x16x16x4xf32> to vector<16x16x4xf32>
    %c1 = arith.constant 1 : index
    %c1_16 = arith.constant 1 : index
    %c0_17 = arith.constant 0 : index
    %18 = vector.load %arg8[%c1, %c1_16, %c0_17] : memref<18x18x4xf32, #tpu.memory_space<vmem>>, vector<16x16x4xf32>
    tpu.vector_store %arg8[%c1, %c1_16, %c0_17], %17 {strides = array<i32>} : memref<18x18x4xf32, #tpu.memory_space<vmem>>, vector<16x16x4xf32>,
    %c0_18 = arith.constant 0 : index
    %c0_19 = arith.constant 0 : index
    %c0_20 = arith.constant 0 : index
    %19 = vector.load %arg8[%c0_18, %c0_19, %c0_20] : memref<18x18x4xf32, #tpu.memory_space<vmem>>, vector<18x18x4xf32>
    %20 = vector.extract_strided_slice %19 {offsets = [0, 0, 0], sizes = [16, 16, 4], strides = [1, 1, 1]} : vector<18x18x4xf32> to vector<16x16x4xf32>
    %21 = vector.shape_cast %20 : vector<16x16x4xf32> to vector<256x4xf32>
    %c0_21 = arith.constant 0 : index
    %c0_22 = arith.constant 0 : index
    %22 = vector.load %arg5[%c0_21, %c0_22] : memref<36x128xf32, #tpu.memory_space<vmem>>, vector<4x128xf32>
    %cst_23 = arith.constant dense<0.000000e+00> : vector<256x128xf32>
    %23 = tpu.matmul %21, %22, %cst_23 {dimension_numbers = #tpu.dot_dimension_numbers<[1], [0], [0], [1], [0, 0, 1, 1], [], []>} : vector<256x4xf32>, vector<4x128xf32>, vector<256x128xf32> -> vector<256x128xf32>
    %24 = vector.extract_strided_slice %19 {offsets = [0, 1, 0], sizes = [16, 16, 4], strides = [1, 1, 1]} : vector<18x18x4xf32> to vector<16x16x4xf32>
    %25 = vector.shape_cast %24 : vector<16x16x4xf32> to vector<256x4xf32>
    %c4 = arith.constant 4 : index
    %c0_24 = arith.constant 0 : index
    %26 = vector.load %arg5[%c4, %c0_24] : memref<36x128xf32, #tpu.memory_space<vmem>>, vector<4x128xf32>
    %cst_25 = arith.constant dense<0.000000e+00> : vector<256x128xf32>
    %27 = tpu.matmul %25, %26, %cst_25 {dimension_numbers = #tpu.dot_dimension_numbers<[1], [0], [0], [1], [0, 0, 1, 1], [], []>} : vector<256x4xf32>, vector<4x128xf32>, vector<256x128xf32> -> vector<256x128xf32>
    %28 = arith.addf %23, %27 : vector<256x128xf32>
    %29 = vector.extract_strided_slice %19 {offsets = [0, 2, 0], sizes = [16, 16, 4], strides = [1, 1, 1]} : vector<18x18x4xf32> to vector<16x16x4xf32>
    %30 = vector.shape_cast %29 : vector<16x16x4xf32> to vector<256x4xf32>
    %c8 = arith.constant 8 : index
    %c0_26 = arith.constant 0 : index
    %31 = vector.load %arg5[%c8, %c0_26] : memref<36x128xf32, #tpu.memory_space<vmem>>, vector<4x128xf32>
    %cst_27 = arith.constant dense<0.000000e+00> : vector<256x128xf32>
    %32 = tpu.matmul %30, %31, %cst_27 {dimension_numbers = #tpu.dot_dimension_numbers<[1], [0], [0], [1], [0, 0, 1, 1], [], []>} : vector<256x4xf32>, vector<4x128xf32>, vector<256x128xf32> -> vector<256x128xf32>
    %33 = arith.addf %28, %32 : vector<256x128xf32>
    %34 = vector.extract_strided_slice %19 {offsets = [1, 0, 0], sizes = [16, 16, 4], strides = [1, 1, 1]} : vector<18x18x4xf32> to vector<16x16x4xf32>
    %35 = vector.shape_cast %34 : vector<16x16x4xf32> to vector<256x4xf32>
    %c12 = arith.constant 12 : index
    %c0_28 = arith.constant 0 : index
    %36 = vector.load %arg5[%c12, %c0_28] : memref<36x128xf32, #tpu.memory_space<vmem>>, vector<4x128xf32>
    %cst_29 = arith.constant dense<0.000000e+00> : vector<256x128xf32>
    %37 = tpu.matmul %35, %36, %cst_29 {dimension_numbers = #tpu.dot_dimension_numbers<[1], [0], [0], [1], [0, 0, 1, 1], [], []>} : vector<256x4xf32>, vector<4x128xf32>, vector<256x128xf32> -> vector<256x128xf32>
    %38 = arith.addf %33, %37 : vector<256x128xf32>
    %39 = vector.extract_strided_slice %19 {offsets = [1, 1, 0], sizes = [16, 16, 4], strides = [1, 1, 1]} : vector<18x18x4xf32> to vector<16x16x4xf32>
    %40 = vector.shape_cast %39 : vector<16x16x4xf32> to vector<256x4xf32>
    %c16 = arith.constant 16 : index
    %c0_30 = arith.constant 0 : index
    %41 = vector.load %arg5[%c16, %c0_30] : memref<36x128xf32, #tpu.memory_space<vmem>>, vector<4x128xf32>
    %cst_31 = arith.constant dense<0.000000e+00> : vector<256x128xf32>
    %42 = tpu.matmul %40, %41, %cst_31 {dimension_numbers = #tpu.dot_dimension_numbers<[1], [0], [0], [1], [0, 0, 1, 1], [], []>} : vector<256x4xf32>, vector<4x128xf32>, vector<256x128xf32> -> vector<256x128xf32>
    %43 = arith.addf %38, %42 : vector<256x128xf32>
    %44 = vector.extract_strided_slice %19 {offsets = [1, 2, 0], sizes = [16, 16, 4], strides = [1, 1, 1]} : vector<18x18x4xf32> to vector<16x16x4xf32>
    %45 = vector.shape_cast %44 : vector<16x16x4xf32> to vector<256x4xf32>
    %c20 = arith.constant 20 : index
    %c0_32 = arith.constant 0 : index
    %46 = vector.load %arg5[%c20, %c0_32] : memref<36x128xf32, #tpu.memory_space<vmem>>, vector<4x128xf32>
    %cst_33 = arith.constant dense<0.000000e+00> : vector<256x128xf32>
    %47 = tpu.matmul %45, %46, %cst_33 {dimension_numbers = #tpu.dot_dimension_numbers<[1], [0], [0], [1], [0, 0, 1, 1], [], []>} : vector<256x4xf32>, vector<4x128xf32>, vector<256x128xf32> -> vector<256x128xf32>
    %48 = arith.addf %43, %47 : vector<256x128xf32>
    %49 = vector.extract_strided_slice %19 {offsets = [2, 0, 0], sizes = [16, 16, 4], strides = [1, 1, 1]} : vector<18x18x4xf32> to vector<16x16x4xf32>
    %50 = vector.shape_cast %49 : vector<16x16x4xf32> to vector<256x4xf32>
    %c24 = arith.constant 24 : index
    %c0_34 = arith.constant 0 : index
    %51 = vector.load %arg5[%c24, %c0_34] : memref<36x128xf32, #tpu.memory_space<vmem>>, vector<4x128xf32>
    %cst_35 = arith.constant dense<0.000000e+00> : vector<256x128xf32>
    %52 = tpu.matmul %50, %51, %cst_35 {dimension_numbers = #tpu.dot_dimension_numbers<[1], [0], [0], [1], [0, 0, 1, 1], [], []>} : vector<256x4xf32>, vector<4x128xf32>, vector<256x128xf32> -> vector<256x128xf32>
    %53 = arith.addf %48, %52 : vector<256x128xf32>
    %54 = vector.extract_strided_slice %19 {offsets = [2, 1, 0], sizes = [16, 16, 4], strides = [1, 1, 1]} : vector<18x18x4xf32> to vector<16x16x4xf32>
    %55 = vector.shape_cast %54 : vector<16x16x4xf32> to vector<256x4xf32>
    %c28 = arith.constant 28 : index
    %c0_36 = arith.constant 0 : index
    %56 = vector.load %arg5[%c28, %c0_36] : memref<36x128xf32, #tpu.memory_space<vmem>>, vector<4x128xf32>
    %cst_37 = arith.constant dense<0.000000e+00> : vector<256x128xf32>
    %57 = tpu.matmul %55, %56, %cst_37 {dimension_numbers = #tpu.dot_dimension_numbers<[1], [0], [0], [1], [0, 0, 1, 1], [], []>} : vector<256x4xf32>, vector<4x128xf32>, vector<256x128xf32> -> vector<256x128xf32>
    %58 = arith.addf %53, %57 : vector<256x128xf32>
    %59 = vector.extract_strided_slice %19 {offsets = [2, 2, 0], sizes = [16, 16, 4], strides = [1, 1, 1]} : vector<18x18x4xf32> to vector<16x16x4xf32>
    %60 = vector.shape_cast %59 : vector<16x16x4xf32> to vector<256x4xf32>
    %c32 = arith.constant 32 : index
    %c0_38 = arith.constant 0 : index
    %61 = vector.load %arg5[%c32, %c0_38] : memref<36x128xf32, #tpu.memory_space<vmem>>, vector<4x128xf32>
    %cst_39 = arith.constant dense<0.000000e+00> : vector<256x128xf32>
    %62 = tpu.matmul %60, %61, %cst_39 {dimension_numbers = #tpu.dot_dimension_numbers<[1], [0], [0], [1], [0, 0, 1, 1], [], []>} : vector<256x4xf32>, vector<4x128xf32>, vector<256x128xf32> -> vector<256x128xf32>
    %63 = arith.addf %58, %62 : vector<256x128xf32>
    %c0_40 = arith.constant 0 : index
    %c0_41 = arith.constant 0 : index
    %64 = vector.load %arg6[%c0_40, %c0_41] : memref<1x128xf32, #tpu.memory_space<vmem>>, vector<1x128xf32>
    %65 = vector.broadcast %64 : vector<1x128xf32> to vector<256x128xf32>
    %66 = arith.addf %63, %65 : vector<256x128xf32>
    %cst_42 = arith.constant 0.000000e+00 : f32
    %67 = vector.broadcast %cst_42 : f32 to vector<256x128xf32>
    %68 = arith.maximumf %66, %67 : vector<256x128xf32>
    %69 = vector.shape_cast %68 : vector<256x128xf32> to vector<8x2x8x2x128xf32>
    %70 = vector.extract_strided_slice %69 {offsets = [0, 0, 0, 0, 0], sizes = [8, 1, 8, 1, 128], strides = [1, 1, 1, 1, 1]} : vector<8x2x8x2x128xf32> to vector<8x1x8x1x128xf32>
    %71 = vector.shape_cast %70 : vector<8x1x8x1x128xf32> to vector<8x8x128xf32>
    %72 = vector.extract_strided_slice %69 {offsets = [0, 0, 0, 1, 0], sizes = [8, 1, 8, 1, 128], strides = [1, 1, 1, 1, 1]} : vector<8x2x8x2x128xf32> to vector<8x1x8x1x128xf32>
    %73 = vector.shape_cast %72 : vector<8x1x8x1x128xf32> to vector<8x8x128xf32>
    %74 = arith.maximumf %71, %73 : vector<8x8x128xf32>
    %75 = vector.extract_strided_slice %69 {offsets = [0, 1, 0, 0, 0], sizes = [8, 1, 8, 1, 128], strides = [1, 1, 1, 1, 1]} : vector<8x2x8x2x128xf32> to vector<8x1x8x1x128xf32>
    %76 = vector.shape_cast %75 : vector<8x1x8x1x128xf32> to vector<8x8x128xf32>
    %77 = vector.extract_strided_slice %69 {offsets = [0, 1, 0, 1, 0], sizes = [8, 1, 8, 1, 128], strides = [1, 1, 1, 1, 1]} : vector<8x2x8x2x128xf32> to vector<8x1x8x1x128xf32>
    %78 = vector.shape_cast %77 : vector<8x1x8x1x128xf32> to vector<8x8x128xf32>
    %79 = arith.maximumf %76, %78 : vector<8x8x128xf32>
    %80 = arith.maximumf %74, %79 : vector<8x8x128xf32>
    %c0_43 = arith.constant 0 : index
    %c0_44 = arith.constant 0 : index
    %c0_45 = arith.constant 0 : index
    %c0_46 = arith.constant 0 : index
    %81 = vector.load %arg7[%c0_43, %c0_44, %c0_45, %c0_46] : memref<1x8x8x128xf32, #tpu.memory_space<vmem>>, vector<1x8x8x128xf32>
    %82 = vector.shape_cast %81 : vector<1x8x8x128xf32> to vector<8x8x128xf32>
    %83 = vector.shape_cast %80 : vector<8x8x128xf32> to vector<1x8x8x128xf32>
    tpu.vector_store %arg7[%c0_43, %c0_44, %c0_45, %c0_46], %83 {strides = array<i32>} : memref<1x8x8x128xf32, #tpu.memory_space<vmem>>, vector<1x8x8x128xf32>,
    return
  }
  func.func @transform_0(%arg0: i32, %arg1: i32) -> (i32, i32, i32, i32) {
    %c0_i32 = arith.constant 0 : i32
    %c0_i32_0 = arith.constant 0 : i32
    %c0_i32_1 = arith.constant 0 : i32
    return %arg0, %arg1, %c0_i32, %c0_i32_0 : i32, i32, i32, i32
  }
  func.func @transform_1(%arg0: i32, %arg1: i32) -> (i32, i32, i32, i32) {
    %c16_i32 = arith.constant 16 : i32
    %0 = arith.muli %arg1, %c16_i32 : i32
    %c1_i32 = arith.constant 1 : i32
    %1 = arith.subi %0, %c1_i32 : i32
    %c0_i32 = arith.constant 0 : i32
    %2 = arith.maxsi %1, %c0_i32 : i32
    %c0_i32_0 = arith.constant 0 : i32
    %c0_i32_1 = arith.constant 0 : i32
    %c0_i32_2 = arith.constant 0 : i32
    return %arg0, %2, %c0_i32_0, %c0_i32_1 : i32, i32, i32, i32
  }
  func.func @transform_2(%arg0: i32, %arg1: i32) -> (i32, i32, i32, i32) {
    %c16_i32 = arith.constant 16 : i32
    %0 = arith.muli %arg1, %c16_i32 : i32
    %c16_i32_0 = arith.constant 16 : i32
    %1 = arith.addi %0, %c16_i32_0 : i32
    %c15_i32 = arith.constant 15 : i32
    %2 = arith.minsi %1, %c15_i32 : i32
    %c0_i32 = arith.constant 0 : i32
    %c0_i32_1 = arith.constant 0 : i32
    %c0_i32_2 = arith.constant 0 : i32
    return %arg0, %2, %c0_i32, %c0_i32_1 : i32, i32, i32, i32
  }
  func.func @transform_3(%arg0: i32, %arg1: i32) -> (i32, i32) {
    %c0_i32 = arith.constant 0 : i32
    %c0_i32_0 = arith.constant 0 : i32
    %c0_i32_1 = arith.constant 0 : i32
    return %c0_i32, %c0_i32_0 : i32, i32
  }
  func.func @transform_4(%arg0: i32, %arg1: i32) -> (i32, i32) {
    %c0_i32 = arith.constant 0 : i32
    %c0_i32_0 = arith.constant 0 : i32
    %c0_i32_1 = arith.constant 0 : i32
    return %c0_i32, %c0_i32_0 : i32, i32
  }
  func.func @transform_5(%arg0: i32, %arg1: i32) -> (i32, i32, i32, i32) {
    %c0_i32 = arith.constant 0 : i32
    %c0_i32_0 = arith.constant 0 : i32
    %c0_i32_1 = arith.constant 0 : i32
    return %arg0, %arg1, %c0_i32, %c0_i32_0 : i32, i32, i32, i32
  }
}

</mosaic_0001>

<bundles_post_ra>
// kernel: tpu_custom_call.1
= control target key start
LH: loop header
LB: loop body
LE: loop exit
PB: predicated region body
PF: predicated region fallthrough
CT: control target
= control target key end

     0   :  { %10 = vsyncpa [#allocation4], 0  ;;  %s5806_s0 = inlined_call_operand.vmem [shape: f32[2,16,16,4], index: 0, kind: input, shape index: {}]   ;;  %s5807_s1 = inlined_call_operand.vmem [shape: f32[2,16,16,4], index: 1, kind: input, shape index: {}]   ;;  %s5808_s2 = inlined_call_operand.vmem [shape: f32[2,16,16,4], index: 2, kind: input, shape index: {}]   ;;  %s5809_s3 = inlined_call_operand.vmem [shape: f32[36,128], index: 3, kind: input, shape index: {}]   ;;  %s5810_s4 = inlined_call_operand.vmem [shape: f32[1,128], index: 4, kind: input, shape index: {}]   ;;  %s5811_s5 = inlined_call_operand.hbm [shape: f32[2,8,8,128], index: 5, kind: output, shape index: {}]  }
   0x1   :  { %12 = vsyncpa [#allocation4 + $0x1], 0  ;;  %s4168_s18 = smov 0   ;;  %s4170_s19 = smov 0  }
   0x2   :  { %s4172_s20 = smov 0   ;;  %s4174_s1 = smov 0  }
   0x3   :  { %s4176_s2 = smov 0   ;;  %s4178_s21 = smov 0  }
   0x4 LB: > { %s3518_s22 = sadd.s32 4294967295, %s4133_s21   ;;  %s3519_s23 = sadd.s32 4294967294, %s4133_s21   ;;  %s4133_s21 = sphi %s4178_s21, %s18_s21   ;;  %s4129_s2 = sphi %s4176_s2, %s6030_s2   ;;  %s4125_s1 = sphi %s4174_s1, %s6029_s1   ;;  %s4121_s20 = sphi %s4172_s20, %s6028_s20   ;;  %s4117_s19 = sphi %s4170_s19, %s6027_s19   ;;  %s4113_s18 = sphi %s4168_s18, %s6026_s18  }
   0x5   : > { %s30_s24 = sadd.s32 1, %s4129_s2  ;;  %s181_s25 = sadd.s32 1, %s4121_s20 }
   0x6   : > { %p32_p0 = scmp.ge.s32.totalorder %s30_s24, 2  ;;  %p191_p1 = scmp.ne.s32.totalorder %s4121_s20, %s4117_s19 }
   0x7   : > { %p192_p2 = scmp.eq.s32.totalorder %s3518_s22, 1  ;;  %p197_p3 = scmp.ne.s32.totalorder %s4117_s19, %s4113_s18 }
   0x8   : > { %s6032_s24 = smov (%p32_p0, %s30_s24), 0  ;;  %p198_p5 = scmp.eq.s32.totalorder %s3519_s23, 1 }
   0x9   : > { %p4208_p4 = por %p192_p2, %p191_p1  ;;  %s176_s27 = ssub.s32 %s4129_s2, %s6032_s24 }
   0xa   : > { %p3522_p6 = scmp.ge.s32.totalorder %s4133_s21, 1  ;;  %p179_p7 = scmp.eq.s32.totalorder %s176_s27, 0 }
   0xb   : > { %p4215_p8 = por %p198_p5, %p197_p3  ;;  %p276_p9 = scmp.lt.s32.totalorder %s4133_s21, 3 }
   0xc   : > { %s4221_s29 = scalar_select %p179_p7, %s4121_s20, %s181_s25  }
   0xd   : > { %p277_p10 = pnand %p3522_p6, %p276_p9 }
   0xf   : > { %280 = sbr.rel (%p277_p10) target bundleno = 805 (0x325), region = 40 }
  0x14   : > { %v701_v0 = vld [vmem:[%s5809_s3 + $0x4] sm:$0xf]  ;;  %vm766_vm0 = vcmask 1043456   ;;  %p336_p11 = scmp.lt.s32.totalorder %s4125_s1, 1  ;;  %vm381_vm1 = vcmask 24576   ;;  %v4135_v1 = vmov 0.0  }
  0x15   : > { %3965 = vmatpush.msk.msra.mxu1 %vm766_vm0, %v701_v0  ;;  %3966 = vmatpush.msk.msra.mxu2 %vm766_vm0, %v701_v0  ;;  %386 = vst.msk [vmem:[#allocation2 + $0x60] sm:$0x1] %vm381_vm1, %v4135_v1  ;;  %vm422_vm2 = vcmask 31744   ;;  %vm620_vm3 = vcmask 1046528   ;;  %v1144_v9 = vld [vmem:[%s5809_s3 + $0x8] sm:$0xf] }
  0x16   : > { %s337_s7 = scalar_select %p336_p11, %s4125_s1, 1  ;;  %382 = vst.msk [vmem:[#allocation2] sm:$0x1] %vm381_vm1, %v4135_v1  ;;  %3967 = vmatpush.msk.msra.mxu3 %vm766_vm0, %v701_v0  ;;  %3530 = vmatpush.msk.msra.mxu0 %vm766_vm0, %v701_v0  ;;  %v1357_v10 = vld [vmem:[%s5809_s3 + $0xc] sm:$0xf]  ;;  %vm1063_vm4 = vcmask 1045504  }
  0x17   : > { %383 = vst.msk [vmem:[#allocation2 + $0x18] sm:$0x1] %vm381_vm1, %v4135_v1  ;;  %3596 = vmatpush.msk.msrb.mxu2 %vm766_vm0, %v1144_v9  ;;  %v571_v11 = vld [vmem:[%s5809_s3] sm:$0xf]  ;;  %v1518_v14 = vld [vmem:[%s5809_s3 + $0x10] sm:$0xf] }
  0x18   : > { %s3960_s8 = sshll.u32 %s337_s7, 8  ;;  %384 = vst.msk [vmem:[#allocation2 + $0x30] sm:$0x1] %vm381_vm1, %v4135_v1  ;;  %3629 = vmatpush.msk.msrb.mxu3 %vm766_vm0, %v1357_v10  ;;  %3563 = vmatpush.msk.msrb.mxu1 %vm766_vm0, %v571_v11  ;;  %vm3297_vm5 = vcmask 1041409   ;;  %vm3299_vm6 = vcmask 1042434   ;;  %vm3301_vm7 = vcmask 1043459  }
  0x19   : > { %s4243_s11 = scalar_lea.vmem %s5806_s0, %s3960_s8  ;;  %385 = vst.msk [vmem:[#allocation2 + $0x48] sm:$0x1] %vm381_vm1, %v4135_v1  ;;  %3662 = vmatpush.msk.msrb.mxu0 %vm766_vm0, %v1518_v14  ;;  %s332_s13 = sand.u32 1, %s4117_s19   ;;  %vm3303_vm8 = vcmask 1044484   ;;  %vm3305_vm9 = vcmask 1045509   ;;  %vm3307_vm10 = vcmask 1046534  }
  0x1a   : > { %v457_v2 = vld [vmem:[%s4243_s11 + $0x30] sm:$0xff]  ;;  %v458_v3 = vld [vmem:[%s4243_s11 + $0x38] sm:$0xff]  ;;  %387 = vst.msk [vmem:[#allocation2 + $0x78] sm:$0x1] %vm381_vm1, %v4135_v1  ;;  %v459_v20 = vld [vmem:[%s4243_s11 + $0x40] sm:$0xff]  ;;  %s3523_s14 = sshll.u32 %s332_s13, 6 }
  0x1b   : > { %491 = vst.msk [vmem:[#allocation2 + $0x61] sm:$0xff] %vm422_vm2, %v457_v2  ;;  %v465_v16 = vld [vmem:[%s4243_s11 + $0x70] sm:$0xff]  ;;  %v466_v17 = vld [vmem:[%s4243_s11 + $0x78] sm:$0xff]  ;;  %v460_v21 = vld [vmem:[%s4243_s11 + $0x48] sm:$0xff]  ;;  %vm3309_vm11 = vcmask 1047559   ;;  %s5486_s15 = scalar_lea.vmem [#allocation3], %s3523_s14 }
  0x1c   : > { %492 = vst.msk [vmem:[#allocation2 + $0x69] sm:$0xff] %vm422_vm2, %v458_v3  ;;  %v473_v18 = vld [vmem:[%s4243_s11 + $0xb0] sm:$0xff]  ;;  %v474_v19 = vld [vmem:[%s4243_s11 + $0xb8] sm:$0xff]  ;;  %v467_v23 = vld [vmem:[%s4243_s11 + $0x80] sm:$0xff]  ;;  %s3964_s22 = sshll.u32 %s4125_s1, 6  ;;  %s3391_s1 = sshll.u32 %s5486_s15, 4  ;;  %s3392_s1 = int_to_ptr.vmem [resolvable:$true] %s3391_s1 }
  0x1d   : > { %388 = vst.msk [vmem:[#allocation2 + $0x90] sm:$0x1] %vm381_vm1, %v4135_v1  ;;  %v468_v26 = vld [vmem:[%s4243_s11 + $0x88] sm:$0xff]  ;;  %v475_v28 = vld [vmem:[%s4243_s11 + $0xc0] sm:$0xff]  ;;  %v461_v40 = vld [vmem:[%s4243_s11 + $0x50] sm:$0xff]  ;;  %s3390_s27 = scalar_lea.hbm %s5811_s5, %s3964_s22  ;;  %s3377_s6 = scalar_lea.sflag [#allocation4], %s332_s13 }
  0x1e   : > { %389 = vst.msk [vmem:[#allocation2 + $0xa8] sm:$0x1] %vm381_vm1, %v4135_v1  ;;  %v476_v30 = vld [vmem:[%s4243_s11 + $0xc8] sm:$0xff]  ;;  %v451_v33 = vld [vmem:[%s4243_s11] sm:$0xff]  ;;  %v462_v44 = vld [vmem:[%s4243_s11 + $0x58] sm:$0xff]  ;;  %s3393_s30 = sshll.u32 %s3390_s27, 4  ;;  %s3394_s30 = int_to_ptr.hbm [resolvable:$true] %s3393_s30 }
  0x1f   : > { %390 = vst.msk [vmem:[#allocation2 + $0xc0] sm:$0x1] %vm381_vm1, %v4135_v1  ;;  %v452_v36 = vld [vmem:[%s4243_s11 + $0x8] sm:$0xff]  ;;  %v469_v48 = vld [vmem:[%s4243_s11 + $0x90] sm:$0xff]  ;;  %v470_v52 = vld [vmem:[%s4243_s11 + $0x98] sm:$0xff]  ;;  %s4069_s7 = sshra.s32 %s3394_s30, 4  ;;  %s4070_s7 = int_to_ptr.hbm [resolvable:$true] %s4069_s7 }
  0x20   : > { %391 = vst.msk [vmem:[#allocation2 + $0xd8] sm:$0x1] %vm381_vm1, %v4135_v1  ;;  %v477_v57 = vld [vmem:[%s4243_s11 + $0xd0] sm:$0xff]  ;;  %v478_v59 = vld [vmem:[%s4243_s11 + $0xd8] sm:$0xff]  ;;  %v464_v11 = vld [vmem:[%s4243_s11 + $0x68] sm:$0xff]  ;;  %s4071_s8 = scalar_lea.hbm %s4070_s7, 64  ;;  %p4076_p1 = scmp.lt.s32.totalorder %s4070_s7, %s5811_s5 }
  0x21   : > { %392 = vst.msk [vmem:[#allocation2 + $0xf0] sm:$0x1] %vm381_vm1, %v4135_v1  ;;  %v453_v62 = vld [vmem:[%s4243_s11 + $0x10] sm:$0xff]  ;;  %v454_v63 = vld [vmem:[%s4243_s11 + $0x18] sm:$0xff]  ;;  %p4072_p12 = scmp.ne.s32.totalorder %s4070_s7, %s4071_s8 }
  0x22   : > { %v4263_v4 = vld [vmem:[#allocation2 + $0x60] sm:$0xff]  ;;  %393 = vst.msk [vmem:[#allocation2 + $0x108] sm:$0x1] %vm381_vm1, %v4135_v1 }
  0x23   : > { %v4267_v5 = vld [vmem:[#allocation2 + $0x68] sm:$0xff]  ;;  %v641_v6 = vrot.slane %v4263_v4, 1  ;;  %394 = vst.msk [vmem:[#allocation2 + $0x120] sm:$0x1] %vm381_vm1, %v4135_v1  ;;  %p4073_p13 = pnand %p4072_p12, %p4208_p4 }
  0x24   : > { %v642_v7 = vrot.slane %v4267_v5, 1  ;;  %395 = vst.msk [vmem:[#allocation2 + $0x138] sm:$0x1] %vm381_vm1, %v4135_v1 }
  0x25   : > { %396 = vst.msk [vmem:[#allocation2 + $0x150] sm:$0x1] %vm381_vm1, %v4135_v1  ;;  %p4074_p0 = pneg %p4073_p13 }
  0x26   : > { %v4278_v8 = vsel %vm620_vm3, %v641_v6, %v642_v7  ;;  %397 = vst.msk [vmem:[#allocation2 + $0x168] sm:$0x1] %vm381_vm1, %v4135_v1  ;;  %v463_v6 = vld [vmem:[%s4243_s11 + $0x60] sm:$0xff] }
  0x27   : > { %5884 = vst [vmem:[#allocation6_spill] sm:$0xff] %v4278_v8  ;;  %3539 = vmatmul.msk.f32.vlgmr.msra.gmra.mxu1 %vm422_vm2, %v4278_v8 }
  0x28   : > { %398 = vst.msk [vmem:[#allocation2 + $0x180] sm:$0x1] %vm381_vm1, %v4135_v1 }
  0x29   : > { %399 = vst.msk [vmem:[#allocation2 + $0x198] sm:$0x1] %vm381_vm1, %v4135_v1 }
  0x2a   : > { %400 = vst.msk [vmem:[#allocation2 + $0x11] sm:$0x1] %vm381_vm1, %v4135_v1 }
  0x2b   : > { %401 = vst.msk [vmem:[#allocation2 + $0x29] sm:$0x1] %vm381_vm1, %v4135_v1 }
  0x2c   : > { %402 = vst.msk [vmem:[#allocation2 + $0x41] sm:$0x1] %vm381_vm1, %v4135_v1 }
  0x2d   : > { %403 = vst.msk [vmem:[#allocation2 + $0x59] sm:$0x1] %vm381_vm1, %v4135_v1 }
  0x2e   : > { %404 = vst.msk [vmem:[#allocation2 + $0x71] sm:$0x1] %vm381_vm1, %v4135_v1 }
  0x2f   : > { %405 = vst.msk [vmem:[#allocation2 + $0x89] sm:$0x1] %vm381_vm1, %v4135_v1 }
  0x30   : > { %406 = vst.msk [vmem:[#allocation2 + $0xa1] sm:$0x1] %vm381_vm1, %v4135_v1 }
  0x31   : > { %407 = vst.msk [vmem:[#allocation2 + $0xb9] sm:$0x1] %vm381_vm1, %v4135_v1 }
  0x32   : > { %408 = vst.msk [vmem:[#allocation2 + $0xd1] sm:$0x1] %vm381_vm1, %v4135_v1 }
  0x33   : > { %409 = vst.msk [vmem:[#allocation2 + $0xe9] sm:$0x1] %vm381_vm1, %v4135_v1 }
  0x34   : > { %410 = vst.msk [vmem:[#allocation2 + $0x101] sm:$0x1] %vm381_vm1, %v4135_v1 }
  0x35   : > { %411 = vst.msk [vmem:[#allocation2 + $0x119] sm:$0x1] %vm381_vm1, %v4135_v1  ;;  %v4324_v12 = vld [vmem:[#allocation2 + $0x70] sm:$0x3] }
  0x36   : > { %412 = vst.msk [vmem:[#allocation2 + $0x131] sm:$0x1] %vm381_vm1, %v4135_v1  ;;  %v644_v13 = vrot.slane %v4324_v12, 1 }
  0x37   : > { %413 = vst.msk [vmem:[#allocation2 + $0x149] sm:$0x1] %vm381_vm1, %v4135_v1 }
  0x38   : > { %414 = vst.msk [vmem:[#allocation2 + $0x161] sm:$0x1] %vm381_vm1, %v4135_v1  ;;  %v4338_v15 = vsel %vm620_vm3, %v642_v7, %v644_v13 }
  0x39   : > { %5885 = vst [vmem:[#allocation7_spill] sm:$0xff] %v4338_v15  ;;  %3540 = vmatmul.msk.f32.gmra.mxu1 %vm422_vm2, %v4338_v15 }
  0x3a   : > { %415 = vst.msk [vmem:[#allocation2 + $0x179] sm:$0x1] %vm381_vm1, %v4135_v1 }
  0x3b   : > { %416 = vst.msk [vmem:[#allocation2 + $0x191] sm:$0x1] %vm381_vm1, %v4135_v1 }
  0x3c   : > { %417 = vst.msk [vmem:[#allocation2 + $0x1a9] sm:$0x1] %vm381_vm1, %v4135_v1 }
  0x3d   : > { %423 = vst.msk [vmem:[#allocation2 + $0x1] sm:$0xff] %vm422_vm2, %v4135_v1 }
  0x3e   : > { %424 = vst.msk [vmem:[#allocation2 + $0x9] sm:$0xff] %vm422_vm2, %v4135_v1 }
  0x3f   : > { %439 = vst.msk [vmem:[#allocation2 + $0x199] sm:$0xff] %vm422_vm2, %v4135_v1 }
  0x40   : > { %440 = vst.msk [vmem:[#allocation2 + $0x1a1] sm:$0xff] %vm422_vm2, %v4135_v1 }
  0x41   : > { %499 = vst.msk [vmem:[#allocation2 + $0xc1] sm:$0xff] %vm422_vm2, %v465_v16  ;;  %v471_v16 = vld [vmem:[%s4243_s11 + $0xa0] sm:$0xff] }
  0x42   : > { %500 = vst.msk [vmem:[#allocation2 + $0xc9] sm:$0xff] %vm422_vm2, %v466_v17 }
  0x43   : > { %507 = vst.msk [vmem:[#allocation2 + $0x121] sm:$0xff] %vm422_vm2, %v473_v18 }
  0x44   : > { %508 = vst.msk [vmem:[#allocation2 + $0x129] sm:$0xff] %vm422_vm2, %v474_v19  ;;  %v4366_v22 = vld [vmem:[#allocation2] sm:$0xff]  ;;  %v472_v19 = vld [vmem:[%s4243_s11 + $0xa8] sm:$0xff] }
  0x45   : > { %v4369_v24 = vld [vmem:[#allocation2 + $0x8] sm:$0xff]  ;;  %v621_v25 = vrot.slane %v4366_v22, 1  ;;  %493 = vst.msk [vmem:[#allocation2 + $0x79] sm:$0xff] %vm422_vm2, %v459_v20  ;;  %v4378_v29 = vld [vmem:[#allocation2 + $0x10] sm:$0x3] }
  0x46   : > { %v622_v27 = vrot.slane %v4369_v24, 1  ;;  %494 = vst.msk [vmem:[#allocation2 + $0x81] sm:$0xff] %vm422_vm2, %v460_v21  ;;  %v624_v39 = vrot.slane %v4378_v29, 1 }
  0x47   : > { %501 = vst.msk [vmem:[#allocation2 + $0xd9] sm:$0xff] %vm422_vm2, %v467_v23 }
  0x48   : > { %v4381_v31 = vld [vmem:[#allocation2 + $0xc0] sm:$0xff]  ;;  %v623_v32 = vsel %vm620_vm3, %v621_v25, %v622_v27  ;;  %502 = vst.msk [vmem:[#allocation2 + $0xe1] sm:$0xff] %vm422_vm2, %v468_v26  ;;  %v625_v56 = vsel %vm620_vm3, %v622_v27, %v624_v39 }
  0x49   : > { %v4386_v34 = vld [vmem:[#allocation2 + $0xc8] sm:$0xff]  ;;  %v661_v35 = vrot.slane %v4381_v31, 1  ;;  %3531 = vmatmul.msk.f32.vlgmr.msra.gmra.mxu0 %vm422_vm2, %v623_v32  ;;  %509 = vst.msk [vmem:[#allocation2 + $0x139] sm:$0xff] %vm422_vm2, %v475_v28  ;;  %v4401_v43 = vld [vmem:[#allocation2 + $0xd0] sm:$0x3]  ;;  %v479_v27 = vld [vmem:[%s4243_s11 + $0xe0] sm:$0xff] }
  0x4a   : > { %v662_v37 = vrot.slane %v4386_v34, 1  ;;  %v4393_v38 = vld [vmem:[#allocation2 + $0x120] sm:$0xff]  ;;  %510 = vst.msk [vmem:[#allocation2 + $0x141] sm:$0xff] %vm422_vm2, %v476_v30  ;;  %v664_v54 = vrot.slane %v4401_v43, 1  ;;  %v480_v32 = vld [vmem:[%s4243_s11 + $0xe8] sm:$0xff] }
  0x4b   : > { %5886 = vst [vmem:[#allocation8_spill] sm:$0xff] %v4393_v38  ;;  %v4398_v41 = vld [vmem:[#allocation2 + $0x128] sm:$0xff]  ;;  %v681_v42 = vrot.slane %v4393_v38, 1  ;;  %v4415_v49 = vld [vmem:[#allocation2 + $0x130] sm:$0x3] }
  0x4c   : > { %5887 = vst [vmem:[#allocation9_spill] sm:$0xff] %v4398_v41  ;;  %v4406_v45 = vsel %vm620_vm3, %v661_v35, %v662_v37  ;;  %v682_v46 = vrot.slane %v4398_v41, 1  ;;  %v4409_v47 = vld [vmem:[#allocation2 + $0x78] sm:$0xff]  ;;  %v684_v60 = vrot.slane %v4415_v49, 1  ;;  %v4448_v0 = vsel %vm620_vm3, %v662_v37, %v664_v54 }
  0x4d   : > { %485 = vst.msk [vmem:[#allocation2 + $0x19] sm:$0xff] %vm422_vm2, %v451_v33  ;;  %3547 = vmatmul.msk.f32.vlgmr.msra.gmra.mxu2 %vm422_vm2, %v4406_v45  ;;  %v4417_v50 = vld [vmem:[#allocation2 + $0x80] sm:$0xff]  ;;  %v646_v51 = vrot.slane %v4409_v47, 1  ;;  %v4432_v58 = vld [vmem:[#allocation2 + $0x88] sm:$0x3] }
  0x4e   : > { %5888 = vst [vmem:[#allocation10_spill] sm:$0xff] %v4406_v45  ;;  %v4423_v53 = vsel %vm620_vm3, %v681_v42, %v682_v46  ;;  %v647_v55 = vrot.slane %v4417_v50, 1  ;;  %v4450_v1 = vld [vmem:[#allocation2 + $0xd8] sm:$0xff]  ;;  %v649_v2 = vrot.slane %v4432_v58, 1  ;;  %v4465_v13 = vsel %vm620_vm3, %v682_v46, %v684_v60 }
  0x4f   : > { %486 = vst.msk [vmem:[#allocation2 + $0x21] sm:$0xff] %vm422_vm2, %v452_v36  ;;  %3555 = vmatmul.msk.f32.vlgmr.msra.gmra.mxu3 %vm422_vm2, %v4423_v53  ;;  %v4457_v7 = vld [vmem:[#allocation2 + $0xe0] sm:$0xff]  ;;  %v666_v20 = vrot.slane %v4450_v1, 1  ;;  %v4513_v42 = vld [vmem:[#allocation2 + $0xe8] sm:$0x3] }
  0x50   : > { %5889 = vst [vmem:[#allocation11_spill] sm:$0xff] %v4415_v49  ;;  %v4438_v61 = vsel %vm620_vm3, %v646_v51, %v647_v55  ;;  %v4472_v17 = vld [vmem:[#allocation2 + $0x138] sm:$0xff]  ;;  %v667_v21 = vrot.slane %v4457_v7, 1  ;;  %v4481_v23 = vsel %vm620_vm3, %v647_v55, %v649_v2 }
  0x51   : > { %495 = vst.msk [vmem:[#allocation2 + $0x91] sm:$0xff] %vm422_vm2, %v461_v40  ;;  %3541 = vmatmul.msk.f32.gmra.mxu1 %vm422_vm2, %v4438_v61  ;;  %3532 = vmatmul.msk.f32.gmra.mxu0 %vm422_vm2, %v625_v56  ;;  %v4474_v18 = vld [vmem:[#allocation2 + $0x140] sm:$0xff]  ;;  %v686_v33 = vrot.slane %v4472_v17, 1  ;;  %v4523_v51 = vld [vmem:[#allocation2 + $0x148] sm:$0x3] }
  0x52   : > { %5890 = vst [vmem:[#allocation12_spill] sm:$0xff] %v4423_v53  ;;  %v687_v35 = vrot.slane %v4474_v18, 1  ;;  %v4507_v36 = vsel %vm620_vm3, %v666_v20, %v667_v21  ;;  %v689_v60 = vrot.slane %v4523_v51, 1  ;;  %v1990_v49 = vld [vmem:[%s5809_s3 + $0x1c] sm:$0xf] }
  0x53   : > { %496 = vst.msk [vmem:[#allocation2 + $0x99] sm:$0xff] %vm422_vm2, %v462_v44  ;;  %v455_v44 = vld [vmem:[%s4243_s11 + $0x20] sm:$0xff]  ;;  %3761 = vmatpush.msk.msra.mxu3 %vm766_vm0, %v1990_v49 }
  0x54   : > { %503 = vst.msk [vmem:[#allocation2 + $0xf1] sm:$0xff] %vm422_vm2, %v469_v48  ;;  %v4453_v3 = vld [vmem:[#allocation2 + $0x18] sm:$0xff]  ;;  %v4517_v46 = vsel %vm620_vm3, %v686_v33, %v687_v35  ;;  %v456_v48 = vld [vmem:[%s4243_s11 + $0x28] sm:$0xff] }
  0x55   : > { %5891 = vst [vmem:[#allocation13_spill] sm:$0xff] %v4438_v61  ;;  %v626_v10 = vrot.slane %v4453_v3, 1  ;;  %3548 = vmatmul.msk.f32.gmra.mxu2 %vm422_vm2, %v4448_v0 }
  0x56   : > { %504 = vst.msk [vmem:[#allocation2 + $0xf9] sm:$0xff] %vm422_vm2, %v470_v52  ;;  %v4459_v9 = vld [vmem:[#allocation2 + $0x20] sm:$0xff]  ;;  %v4486_v26 = vld [vmem:[#allocation2 + $0x28] sm:$0x3]  ;;  %v669_v52 = vrot.slane %v4513_v42, 1 }
  0x57   : > { %511 = vst.msk [vmem:[#allocation2 + $0x151] sm:$0xff] %vm422_vm2, %v477_v57  ;;  %v627_v14 = vrot.slane %v4459_v9, 1  ;;  %3556 = vmatmul.msk.f32.gmra.mxu3 %vm422_vm2, %v4465_v13  ;;  %v629_v40 = vrot.slane %v4486_v26, 1 }
  0x58   : > { %5892 = vst [vmem:[#allocation14_spill] sm:$0xff] %v4448_v0  ;;  %v4492_v28 = vld [vmem:[#allocation2 + $0x90] sm:$0xff] }
  0x59   : > { %512 = vst.msk [vmem:[#allocation2 + $0x159] sm:$0xff] %vm422_vm2, %v478_v59  ;;  %v4484_v25 = vsel %vm620_vm3, %v626_v10, %v627_v14  ;;  %3542 = vmatmul.msk.f32.gmra.mxu1 %vm422_vm2, %v4481_v23  ;;  %v651_v37 = vrot.slane %v4492_v28, 1  ;;  %v4531_v55 = vsel %vm620_vm3, %v627_v14, %v629_v40  ;;  %v4557_v14 = vsel %vm620_vm3, %v687_v35, %v689_v60 }
  0x5a   : > { %487 = vst.msk [vmem:[#allocation2 + $0x31] sm:$0xff] %vm422_vm2, %v453_v62  ;;  %v4494_v30 = vld [vmem:[#allocation2 + $0x98] sm:$0xff]  ;;  %3533 = vmatmul.msk.f32.gmra.mxu0 %vm422_vm2, %v4484_v25  ;;  %v4535_v56 = vld [vmem:[#allocation2 + $0xa0] sm:$0x3]  ;;  %v4547_v62 = vsel %vm620_vm3, %v667_v21, %v669_v52 }
  0x5b   : > { %5893 = vst [vmem:[#allocation15_spill] sm:$0xff] %v4465_v13  ;;  %v652_v39 = vrot.slane %v4494_v30, 1  ;;  %v4552_v10 = vld [vmem:[#allocation2 + $0xf0] sm:$0xff] }
  0x5c   : > { %488 = vst.msk [vmem:[#allocation2 + $0x39] sm:$0xff] %vm422_vm2, %v454_v63  ;;  %v654_v63 = vrot.slane %v4535_v56, 1  ;;  %v671_v20 = vrot.slane %v4552_v10, 1 }
  0x5d   : > { %5894 = vst [vmem:[#allocation16_spill] sm:$0xff] %v4472_v17  ;;  %3549 = vmatmul.msk.f32.gmra.mxu2 %vm422_vm2, %v4507_v36  ;;  %v4528_v54 = vsel %vm620_vm3, %v651_v37, %v652_v39 }
  0x5e   : > { %5895 = vst [vmem:[#allocation17_spill] sm:$0xff] %v4474_v18 }
  0x5f   : > { %497 = vst.msk [vmem:[#allocation2 + $0xa9] sm:$0xff] %vm422_vm2, %v463_v6  ;;  %3557 = vmatmul.msk.f32.gmra.mxu3 %vm422_vm2, %v4517_v46 }
  0x60   : > { %5896 = vst [vmem:[#allocation18_spill] sm:$0xff] %v4481_v23 }
  0x61   : > { %498 = vst.msk [vmem:[#allocation2 + $0xb1] sm:$0xff] %vm422_vm2, %v464_v11  ;;  %v4537_v57 = vld [vmem:[#allocation2 + $0x30] sm:$0xff]  ;;  %3543 = vmatmul.msk.f32.gmra.mxu1 %vm422_vm2, %v4528_v54  ;;  %v4554_v11 = vld [vmem:[#allocation2 + $0xf8] sm:$0xff] }
  0x62   : > { %505 = vst.msk [vmem:[#allocation2 + $0x109] sm:$0xff] %vm422_vm2, %v471_v16  ;;  %3534 = vmatmul.msk.f32.gmra.mxu0 %vm422_vm2, %v4531_v55  ;;  %v631_v2 = vrot.slane %v4537_v57, 1  ;;  %v4561_v16 = vld [vmem:[#allocation2 + $0x150] sm:$0xff]  ;;  %v672_v21 = vrot.slane %v4554_v11, 1 }
  0x63   : > { %506 = vst.msk [vmem:[#allocation2 + $0x111] sm:$0xff] %vm422_vm2, %v472_v19  ;;  %v4539_v59 = vld [vmem:[#allocation2 + $0x38] sm:$0xff]  ;;  %v4579_v37 = vld [vmem:[#allocation2 + $0x40] sm:$0x3]  ;;  %v691_v40 = vrot.slane %v4561_v16, 1 }
  0x64   : > { %513 = vst.msk [vmem:[#allocation2 + $0x169] sm:$0xff] %vm422_vm2, %v479_v27  ;;  %v632_v6 = vrot.slane %v4539_v59, 1  ;;  %v4563_v19 = vld [vmem:[#allocation2 + $0x158] sm:$0xff]  ;;  %v4568_v27 = vsel %vm620_vm3, %v652_v39, %v654_v63  ;;  %v4588_v39 = vsel %vm620_vm3, %v671_v20, %v672_v21  ;;  %v634_v60 = vrot.slane %v4579_v37, 1  ;;  %v4593_v63 = vld [vmem:[#allocation2 + $0x100] sm:$0x3] }
  0x65   : > { %5897 = vst [vmem:[#allocation19_spill] sm:$0xff] %v4507_v36  ;;  %3550 = vmatmul.msk.f32.gmra.mxu2 %vm422_vm2, %v4547_v62  ;;  %v1829_v20 = vld [vmem:[%s5809_s3 + $0x18] sm:$0xf] }
  0x66   : > { %514 = vst.msk [vmem:[#allocation2 + $0x171] sm:$0xff] %vm422_vm2, %v480_v32  ;;  %v4571_v32 = vsel %vm620_vm3, %v631_v2, %v632_v6  ;;  %v4575_v33 = vld [vmem:[#allocation2 + $0xa8] sm:$0xff]  ;;  %v4610_v18 = vsel %vm620_vm3, %v632_v6, %v634_v60  ;;  %3728 = vmatpush.msk.msra.mxu2 %vm766_vm0, %v1829_v20  ;;  %v1676_v6 = vld [vmem:[%s5809_s3 + $0x14] sm:$0xf] }
  0x67   : > { %5898 = vst [vmem:[#allocation20_spill] sm:$0xff] %v4517_v46  ;;  %3558 = vmatmul.msk.f32.gmra.mxu3 %vm422_vm2, %v4557_v14  ;;  %3695 = vmatpush.msk.msra.mxu1 %vm766_vm0, %v1676_v6 }
  0x68   : > { %489 = vst.msk [vmem:[#allocation2 + $0x49] sm:$0xff] %vm422_vm2, %v455_v44  ;;  %v4577_v35 = vld [vmem:[#allocation2 + $0xb0] sm:$0xff]  ;;  %v692_v44 = vrot.slane %v4563_v19, 1 }
  0x69   : > { %5899 = vst [vmem:[#allocation21_spill] sm:$0xff] %v4523_v51  ;;  %3544 = vmatmul.msk.f32.gmra.mxu1 %vm422_vm2, %v4568_v27  ;;  %v657_v52 = vrot.slane %v4577_v35, 1 }
  0x6a   : > { %490 = vst.msk [vmem:[#allocation2 + $0x51] sm:$0xff] %vm422_vm2, %v456_v48  ;;  %3535 = vmatmul.msk.f32.gmra.mxu0 %vm422_vm2, %v4571_v32  ;;  %v656_v48 = vrot.slane %v4575_v33, 1  ;;  %v4596_v2 = vsel %vm620_vm3, %v691_v40, %v692_v44  ;;  %v4642_v49 = vld [vmem:[#allocation2 + $0x110] sm:$0xff] }
  0x6b   : > { %5900 = vst [vmem:[#allocation22_spill] sm:$0xff] %v4528_v54  ;;  %v4649_v41 = vld [vmem:[#allocation2 + $0x168] sm:$0xff]  ;;  %v677_v13 = vrot.slane %v4642_v49, 1 }
  0x6c   : > { %5901 = vst [vmem:[#allocation23_spill] sm:$0xff] %v4547_v62  ;;  %v4607_v51 = vsel %vm620_vm3, %v656_v48, %v657_v52 }
  0x6d   : > { %5902 = vst [vmem:[#allocation24_spill] sm:$0xff] %v4557_v14  ;;  %3551 = vmatmul.msk.f32.gmra.mxu2 %vm422_vm2, %v4588_v39  ;;  %v4612_v14 = vld [vmem:[#allocation2 + $0xb8] sm:$0x3] }
  0x6e   : > { %5903 = vst [vmem:[#allocation25_spill] sm:$0xff] %v4561_v16  ;;  %v674_v16 = vrot.slane %v4593_v63, 1  ;;  %v659_v20 = vrot.slane %v4612_v14, 1 }
  0x6f   : > { %5904 = vst [vmem:[#allocation26_spill] sm:$0xff] %v4563_v19  ;;  %v4600_v19 = vld [vmem:[#allocation2 + $0x160] sm:$0x3]  ;;  %v4614_v40 = vld [vmem:[#allocation2 + $0x48] sm:$0xff]  ;;  %3559 = vmatmul.msk.f32.gmra.mxu3 %vm422_vm2, %v4596_v2 }
  0x70   : > { %5905 = vst [vmem:[#allocation27_spill] sm:$0xff] %v4568_v27  ;;  %v694_v48 = vrot.slane %v4600_v19, 1  ;;  %v4635_v60 = vsel %vm620_vm3, %v672_v21, %v674_v16  ;;  %v4651_v16 = vld [vmem:[#allocation2 + $0x170] sm:$0xff]  ;;  %v4656_v38 = vsel %vm620_vm3, %v657_v52, %v659_v20  ;;  %v4679_v20 = vld [vmem:[#allocation2 + $0x118] sm:$0x3] }
  0x71   : > { %5906 = vst [vmem:[#allocation28_spill] sm:$0xff] %v4593_v63  ;;  %v4619_v17 = vld [vmem:[#allocation2 + $0x50] sm:$0xff]  ;;  %3545 = vmatmul.msk.f32.gmra.mxu1 %vm422_vm2, %v4607_v51  ;;  %v696_v63 = vrot.slane %v4649_v41, 1 }
  0x72   : > { %5907 = vst [vmem:[#allocation29_spill] sm:$0xff] %v4596_v2  ;;  %3536 = vmatmul.msk.f32.gmra.mxu0 %vm422_vm2, %v4610_v18  ;;  %v636_v2 = vrot.slane %v4614_v40, 1  ;;  %v637_v46 = vrot.slane %v4619_v17, 1  ;;  %v4645_v6 = vsel %vm620_vm3, %v692_v44, %v694_v48  ;;  %v4663_v44 = vld [vmem:[#allocation2 + $0x58] sm:$0x3] }
  0x73   : > { %5908 = vst [vmem:[#allocation30_spill] sm:$0xff] %v4600_v19  ;;  %v4640_v19 = vld [vmem:[#allocation2 + $0x108] sm:$0xff]  ;;  %v2148_v48 = vld [vmem:[%s5809_s3 + $0x20] sm:$0xf] }
  0x74   : > { %5909 = vst [vmem:[#allocation31_spill] sm:$0xff] %v4607_v51  ;;  %v676_v21 = vrot.slane %v4640_v19, 1  ;;  %v4659_v53 = vsel %vm620_vm3, %v636_v2, %v637_v46  ;;  %3794 = vmatpush.msk.msra.mxu0 %vm766_vm0, %v2148_v48  ;;  %v639_v2 = vrot.slane %v4663_v44, 1  ;;  %v4686_v48 = vld [vmem:[#allocation2 + $0x178] sm:$0x3] }
  0x75   : > { %5910 = vst [vmem:[#allocation32_spill] sm:$0xff] %v4640_v19  ;;  %3552 = vmatmul.msk.f32.gmra.mxu2 %vm422_vm2, %v4635_v60  ;;  %v697_v19 = vrot.slane %v4651_v16, 1 }
  0x76   : > { %5911 = vst [vmem:[#allocation33_spill] sm:$0xff] %v4642_v49  ;;  %v4676_v52 = vsel %vm620_vm3, %v676_v21, %v677_v13  ;;  %v699_v21 = vrot.slane %v4686_v48, 1 }
  0x77   : > { %5912 = vst [vmem:[#allocation34_spill] sm:$0xff] %v4645_v6  ;;  %3560 = vmatmul.msk.f32.gmra.mxu3 %vm422_vm2, %v4645_v6  ;;  %v4682_v6 = vsel %vm620_vm3, %v696_v63, %v697_v19 }
  0x78   : > { %5913 = vst [vmem:[#allocation35_spill] sm:$0xff] %v4649_v41  ;;  %v4690_v41 = vsel %vm620_vm3, %v637_v46, %v639_v2  ;;  %v4703_v49 = vsel %vm620_vm3, %v697_v19, %v699_v21  ;;  %v1064_v46 = vrot.slane %v4366_v22, 2  ;;  %v1065_v2 = vrot.slane %v4369_v24, 2 }
  0x79   : > { %5914 = vst [vmem:[#allocation36_spill] sm:$0xff] %v4651_v16  ;;  %3546 = vmatmul.msk.f32.gmra.mxu1 %vm422_vm2, %v4656_v38  ;;  %v679_v16 = vrot.slane %v4679_v20, 1  ;;  %v1067_v19 = vrot.slane %v4378_v29, 2  ;;  %v1077_v21 = vrot.slane %v4579_v37, 2 }
  0x7a   : > { %5915 = vst [vmem:[#allocation37_spill] sm:$0xff] %v4656_v38  ;;  %3537 = vmatmul.msk.f32.gmra.mxu0 %vm422_vm2, %v4659_v53 }
  0x7b   : > { %5916 = vst [vmem:[#allocation38_spill] sm:$0xff] %v4682_v6  ;;  %v4700_v63 = vsel %vm620_vm3, %v677_v13, %v679_v16  ;;  %v1066_v13 = vsel %vm1063_vm4, %v1064_v46, %v1065_v2  ;;  %v1075_v16 = vrot.slane %v4539_v59, 2 }
  0x7c   : > { %5917 = vst [vmem:[#allocation39_spill] sm:$0xff] %v4700_v63 }
  0x7d   : > { %3553 = vmatmul.msk.f32.gmra.mxu2 %vm422_vm2, %v4676_v52  ;;  %5918 = vst [vmem:[#allocation40_spill] sm:$0xff] %v4703_v49  ;;  %v4772_v46 = vsel %vm1063_vm4, %v1075_v16, %v1077_v21 }
  0x7f   : > { %3561 = vmatmul.msk.f32.gmra.mxu3 %vm422_vm2, %v4682_v6 }
  0x81   : > { %3564 = vmatmul.msk.f32.vlgmr.msrb.gmra.mxu1 %vm422_vm2, %v4366_v22  ;;  %v1068_v22 = vsel %vm1063_vm4, %v1065_v2, %v1067_v19  ;;  %v1079_v2 = vrot.slane %v4614_v40, 2 }
  0x82   : > { %3538 = vmatmul.msk.f32.gmra.mxu0 %vm422_vm2, %v4690_v41 }
  0x85   : > { %3554 = vmatmul.msk.f32.gmra.mxu2 %vm422_vm2, %v4700_v63 }
  0x87   : > { %3562 = vmatmul.msk.f32.gmra.mxu3 %vm422_vm2, %v4703_v49 }
  0x89   : > { %3565 = vmatmul.msk.f32.gmra.mxu1 %vm422_vm2, %v4369_v24  ;;  %v1069_v24 = vrot.slane %v4453_v3, 2 }
  0x8a   : > { %3663 = vmatmul.msk.f32.vlgmr.msrb.gmra.mxu0 %vm422_vm2, %v4484_v25  ;;  %v1070_v25 = vrot.slane %v4459_v9, 2 }
  0x8c   : > { %v4735_v29 = vsel %vm1063_vm4, %v1069_v24, %v1070_v25 }
  0x8d   : > { %3597 = vmatmul.msk.f32.vlgmr.msrb.gmra.mxu2 %vm422_vm2, %v1066_v13  ;;  %v1080_v13 = vrot.slane %v4619_v17, 2 }
  0x8f   : > { %3630 = vmatmul.msk.f32.vlgmr.msrb.gmra.mxu3 %vm422_vm2, %v4453_v3  ;;  %v4785_v37 = vsel %vm1063_vm4, %v1079_v2, %v1080_v13 }
  0x91   : > { %3566 = vmatmul.msk.f32.gmra.mxu1 %vm422_vm2, %v4453_v3 }
  0x92   : > { %3664 = vmatmul.msk.f32.gmra.mxu0 %vm422_vm2, %v4531_v55  ;;  %v1072_v55 = vrot.slane %v4486_v26, 2 }
  0x94   : > { %v4747_v3 = vsel %vm1063_vm4, %v1070_v25, %v1072_v55  ;;  %v1084_v55 = vrot.slane %v4263_v4, 2 }
  0x95   : > { %3598 = vmatmul.msk.f32.gmra.mxu2 %vm422_vm2, %v1068_v22  ;;  %v1082_v22 = vrot.slane %v4663_v44, 2  ;;  %v1085_v44 = vrot.slane %v4267_v5, 2 }
  0x97   : > { %3631 = vmatmul.msk.f32.gmra.mxu3 %vm422_vm2, %v4459_v9  ;;  %v4799_v24 = vsel %vm1063_vm4, %v1080_v13, %v1082_v22 }
  0x99   : > { %3567 = vmatmul.msk.f32.gmra.mxu1 %vm422_vm2, %v4459_v9  ;;  %v1074_v9 = vrot.slane %v4537_v57, 2 }
  0x9a   : > { %3665 = vmatmul.msk.f32.gmra.mxu0 %vm422_vm2, %v4571_v32 }
  0x9b   : > { %v4760_v26 = vsel %vm1063_vm4, %v1074_v9, %v1075_v16  ;;  %v4816_v16 = vsel %vm1063_vm4, %v1084_v55, %v1085_v44  ;;  %v1090_v55 = vrot.slane %v4417_v50, 2 }
  0x9d   : > { %3599 = vmatmul.msk.f32.gmra.mxu2 %vm422_vm2, %v4735_v29 }
  0x9f   : > { %3632 = vmatmul.msk.f32.gmra.mxu3 %vm422_vm2, %v4537_v57 }
  0xa1   : > { %3568 = vmatmul.msk.f32.gmra.mxu1 %vm422_vm2, %v4537_v57 }
  0xa2   : > { %3666 = vmatmul.msk.f32.gmra.mxu0 %vm422_vm2, %v4610_v18 }
  0xa4   : > { %v4787_v19 = vpop.f32.mrf.mxu1 }
  0xa5   : > { %3600 = vmatmul.msk.f32.gmra.mxu2 %vm422_vm2, %v4747_v3 }
  0xa7   : > { %3633 = vmatmul.msk.f32.gmra.mxu3 %vm422_vm2, %v4539_v59 }
  0xa9   : > { %3569 = vmatmul.msk.f32.gmra.mxu1 %vm422_vm2, %v4539_v59 }
  0xaa   : > { %3667 = vmatmul.msk.f32.gmra.mxu0 %vm422_vm2, %v4659_v53 }
  0xad   : > { %3601 = vmatmul.msk.f32.gmra.mxu2 %vm422_vm2, %v4760_v26 }
  0xaf   : > { %3634 = vmatmul.msk.f32.gmra.mxu3 %vm422_vm2, %v4614_v40 }
  0xb1   : > { %3570 = vmatmul.msk.f32.gmra.mxu1 %vm422_vm2, %v4614_v40 }
  0xb2   : > { %3668 = vmatmul.msk.f32.gmra.mxu0 %vm422_vm2, %v4690_v41 }
  0xb5   : > { %3602 = vmatmul.msk.f32.gmra.mxu2 %vm422_vm2, %v4772_v46 }
  0xb6   : > { %v4801_v25 = vpop.f32.mrf.mxu1 }
  0xb7   : > { %3635 = vmatmul.msk.f32.gmra.mxu3 %vm422_vm2, %v4619_v17 }
  0xb9   : > { %3571 = vmatmul.msk.f32.gmra.mxu1 %vm422_vm2, %v4619_v17 }
  0xba   : > { %3669 = vmatmul.msk.f32.gmra.mxu0 %vm422_vm2, %v4278_v8 }
  0xbd   : > { %3603 = vmatmul.msk.f32.gmra.mxu2 %vm422_vm2, %v4785_v37 }
  0xbf   : > { %3636 = vmatmul.msk.f32.gmra.mxu3 %vm422_vm2, %v4263_v4 }
  0xc1   : > { %3572 = vmatmul.msk.f32.gmra.mxu1 %vm422_vm2, %v4263_v4  ;;  %v1087_v4 = vrot.slane %v4324_v12, 2  ;;  %v1089_v12 = vrot.slane %v4409_v47, 2 }
  0xc2   : > { %3670 = vmatmul.msk.f32.gmra.mxu0 %vm422_vm2, %v4338_v15 }
  0xc3   : > { %v4836_v22 = vsel %vm1063_vm4, %v1085_v44, %v1087_v4  ;;  %v1092_v4 = vrot.slane %v4432_v58, 2  ;;  %v1094_v58 = vrot.slane %v4492_v28, 2 }
  0xc4   : > { %5920 = vst [vmem:[#allocation42_spill] sm:$0xff] %v4836_v22 }
  0xc5   : > { %3604 = vmatmul.msk.f32.gmra.mxu2 %vm422_vm2, %v4799_v24 }
  0xc6   : > { %v4807_v9 = vpop.f32.mrf.mxu0 }
  0xc7   : > { %3637 = vmatmul.msk.f32.gmra.mxu3 %vm422_vm2, %v4267_v5 }
  0xc9   : > { %3573 = vmatmul.msk.f32.gmra.mxu1 %vm422_vm2, %v4267_v5 }
  0xca   : > { %3671 = vmatmul.msk.f32.gmra.mxu0 %vm422_vm2, %v4438_v61 }
  0xcd   : > { %3605 = vmatmul.msk.f32.gmra.mxu2 %vm422_vm2, %v4816_v16 }
  0xce   : > { %v4821_v21 = vpop.f32.mrf.mxu1  ;;  %v4823_v2 = vpop.f32.mrf.mxu0 }
  0xcf   : > { %3638 = vmatmul.msk.f32.gmra.mxu3 %vm422_vm2, %v4409_v47 }
  0xd0   : > { %v4827_v13 = vpop.f32.mrf.mxu2 }
  0xd1   : > { %3574 = vmatmul.msk.f32.gmra.mxu1 %vm422_vm2, %v4409_v47  ;;  %v4857_v47 = vsel %vm1063_vm4, %v1089_v12, %v1090_v55 }
  0xd2   : > { %3672 = vmatmul.msk.f32.gmra.mxu0 %vm422_vm2, %v4481_v23  ;;  %v4833_v5 = vpop.f32.mrf.mxu3  ;;  %5922 = vst [vmem:[#allocation44_spill] sm:$0xff] %v4857_v47 }
  0xd3   : > { %5919 = vst [vmem:[#allocation41_spill] sm:$0xff] %v4833_v5 }
  0xd5   : > { %3606 = vmatmul.msk.f32.gmra.mxu2 %vm422_vm2, %v4836_v22 }
  0xd6   : > { %v4842_v61 = vpop.f32.mrf.mxu1 }
  0xd7   : > { %v4844_v15 = vpop.f32.mrf.mxu0  ;;  %3639 = vmatmul.msk.f32.gmra.mxu3 %vm422_vm2, %v4417_v50 }
  0xd8   : > { %v4848_v23 = vpop.f32.mrf.mxu2 }
  0xd9   : > { %3575 = vmatmul.msk.f32.gmra.mxu1 %vm422_vm2, %v4417_v50 }
  0xda   : > { %3673 = vmatmul.msk.f32.gmra.mxu0 %vm422_vm2, %v4528_v54  ;;  %v4854_v44 = vpop.f32.mrf.mxu3  ;;  %v1095_v54 = vrot.slane %v4494_v30, 2 }
  0xdb   : > { %5921 = vst [vmem:[#allocation43_spill] sm:$0xff] %v4854_v44  ;;  %v4877_v44 = vsel %vm1063_vm4, %v1090_v55, %v1092_v4  ;;  %v1097_v4 = vrot.slane %v4535_v56, 2  ;;  %v1099_v56 = vrot.slane %v4575_v33, 2 }
  0xdc   : > { %5924 = vst [vmem:[#allocation46_spill] sm:$0xff] %v4877_v44 }
  0xdd   : > { %3607 = vmatmul.msk.f32.gmra.mxu2 %vm422_vm2, %v4857_v47 }
  0xde   : > { %v4862_v5 = vpop.f32.mrf.mxu1 }
  0xdf   : > { %v4864_v22 = vpop.f32.mrf.mxu0  ;;  %3640 = vmatmul.msk.f32.gmra.mxu3 %vm422_vm2, %v4492_v28 }
  0xe0   : > { %v4868_v50 = vpop.f32.mrf.mxu2 }
  0xe1   : > { %3576 = vmatmul.msk.f32.gmra.mxu1 %vm422_vm2, %v4492_v28  ;;  %v4898_v28 = vsel %vm1063_vm4, %v1094_v58, %v1095_v54 }
  0xe2   : > { %3674 = vmatmul.msk.f32.gmra.mxu0 %vm422_vm2, %v4568_v27  ;;  %v4874_v12 = vpop.f32.mrf.mxu3  ;;  %5926 = vst [vmem:[#allocation48_spill] sm:$0xff] %v4898_v28 }
  0xe3   : > { %5923 = vst [vmem:[#allocation45_spill] sm:$0xff] %v4874_v12 }
  0xe5   : > { %3608 = vmatmul.msk.f32.gmra.mxu2 %vm422_vm2, %v4877_v44 }
  0xe6   : > { %v4883_v47 = vpop.f32.mrf.mxu1 }
  0xe7   : > { %v4885_v8 = vpop.f32.mrf.mxu0  ;;  %3641 = vmatmul.msk.f32.gmra.mxu3 %vm422_vm2, %v4494_v30 }
  0xe8   : > { %v4889_v27 = vpop.f32.mrf.mxu2 }
  0xe9   : > { %3577 = vmatmul.msk.f32.gmra.mxu1 %vm422_vm2, %v4494_v30 }
  0xea   : > { %3675 = vmatmul.msk.f32.gmra.mxu0 %vm422_vm2, %v4607_v51  ;;  %v4895_v55 = vpop.f32.mrf.mxu3  ;;  %v1100_v51 = vrot.slane %v4577_v35, 2 }
  0xeb   : > { %5925 = vst [vmem:[#allocation47_spill] sm:$0xff] %v4895_v55  ;;  %v4918_v55 = vsel %vm1063_vm4, %v1095_v54, %v1097_v4  ;;  %v1102_v4 = vrot.slane %v4612_v14, 2  ;;  %v1104_v14 = vrot.slane %v4381_v31, 2 }
  0xec   : > { %5929 = vst [vmem:[#allocation51_spill] sm:$0xff] %v4918_v55 }
  0xed   : > { %3609 = vmatmul.msk.f32.gmra.mxu2 %vm422_vm2, %v4898_v28 }
  0xee   : > { %v4903_v12 = vpop.f32.mrf.mxu1 }
  0xef   : > { %v4905_v44 = vpop.f32.mrf.mxu0  ;;  %3642 = vmatmul.msk.f32.gmra.mxu3 %vm422_vm2, %v4575_v33 }
  0xf0   : > { %v4909_v30 = vpop.f32.mrf.mxu2 }
  0xf1   : > { %5927 = vst [vmem:[#allocation49_spill] sm:$0xff] %v4909_v30  ;;  %3578 = vmatmul.msk.f32.gmra.mxu1 %vm422_vm2, %v4575_v33  ;;  %v4939_v33 = vsel %vm1063_vm4, %v1099_v56, %v1100_v51 }
  0xf2   : > { %3676 = vmatmul.msk.f32.gmra.mxu0 %vm422_vm2, %v4656_v38  ;;  %v4915_v58 = vpop.f32.mrf.mxu3  ;;  %5932 = vst [vmem:[#allocation54_spill] sm:$0xff] %v4939_v33 }
  0xf3   : > { %5928 = vst [vmem:[#allocation50_spill] sm:$0xff] %v4915_v58 }
  0xf5   : > { %3610 = vmatmul.msk.f32.gmra.mxu2 %vm422_vm2, %v4918_v55 }
  0xf6   : > { %v4924_v28 = vpop.f32.mrf.mxu1 }
  0xf7   : > { %v4926_v30 = vpop.f32.mrf.mxu0  ;;  %3643 = vmatmul.msk.f32.gmra.mxu3 %vm422_vm2, %v4577_v35 }
  0xf8   : > { %v4930_v38 = vpop.f32.mrf.mxu2 }
  0xf9   : > { %5930 = vst [vmem:[#allocation52_spill] sm:$0xff] %v4930_v38  ;;  %3579 = vmatmul.msk.f32.gmra.mxu1 %vm422_vm2, %v4577_v35 }
  0xfa   : > { %3677 = vmatmul.msk.f32.gmra.mxu0 %vm422_vm2, %v4406_v45  ;;  %v4936_v54 = vpop.f32.mrf.mxu3  ;;  %v1105_v45 = vrot.slane %v4386_v34, 2 }
  0xfb   : > { %5931 = vst [vmem:[#allocation53_spill] sm:$0xff] %v4936_v54  ;;  %v4957_v54 = vsel %vm1063_vm4, %v1100_v51, %v1102_v4 }
  0xfc   : > { %5935 = vst [vmem:[#allocation57_spill] sm:$0xff] %v4957_v54  ;;  %v4974_v4 = vsel %vm1063_vm4, %v1104_v14, %v1105_v45 }
  0xfd   : > { %3611 = vmatmul.msk.f32.gmra.mxu2 %vm422_vm2, %v4939_v33  ;;  %5938 = vst [vmem:[#allocation60_spill] sm:$0xff] %v4974_v4 }
  0xfe   : > { %v967_v58 = vpop.f32.mrf.mxu1 }
  0xff   : > { %v4944_v55 = vpop.f32.mrf.mxu0  ;;  %3644 = vmatmul.msk.f32.gmra.mxu3 %vm422_vm2, %v4381_v31 }
 0x100   : > { %v4948_v35 = vpop.f32.mrf.mxu2 }
 0x101   : > { %5933 = vst [vmem:[#allocation55_spill] sm:$0xff] %v4948_v35  ;;  %3580 = vmatmul.msk.f32.gmra.mxu1 %vm422_vm2, %v4381_v31  ;;  %v1107_v31 = vrot.slane %v4401_v43, 2 }
 0x102   : > { %3678 = vmatmul.msk.f32.gmra.mxu0 %vm422_vm2, %v4448_v0  ;;  %v4954_v56 = vpop.f32.mrf.mxu3 }
 0x103   : > { %5934 = vst [vmem:[#allocation56_spill] sm:$0xff] %v4954_v56 }
 0x105   : > { %3612 = vmatmul.msk.f32.gmra.mxu2 %vm422_vm2, %v4957_v54  ;;  %v968_v54 = vadd.f32 %v967_v58, %v4807_v9  ;;  %v1109_v9 = vrot.slane %v4450_v1, 2  ;;  %v1110_v58 = vrot.slane %v4457_v7, 2 }
 0x106   : > { %v970_v33 = vpop.f32.mrf.mxu1 }
 0x107   : > { %v1543_v35 = vpop.f32.mrf.mxu0  ;;  %3645 = vmatmul.msk.f32.gmra.mxu3 %vm422_vm2, %v4386_v34 }
 0x108   : > { %v4965_v38 = vpop.f32.mrf.mxu2 }
 0x109   : > { %5936 = vst [vmem:[#allocation58_spill] sm:$0xff] %v4965_v38  ;;  %3581 = vmatmul.msk.f32.gmra.mxu1 %vm422_vm2, %v4386_v34 }
 0x10a   : > { %3679 = vmatmul.msk.f32.gmra.mxu0 %vm422_vm2, %v4507_v36  ;;  %v4971_v51 = vpop.f32.mrf.mxu3 }
 0x10b   : > { %5937 = vst [vmem:[#allocation59_spill] sm:$0xff] %v4971_v51  ;;  %v4987_v51 = vsel %vm1063_vm4, %v1105_v45, %v1107_v31 }
 0x10d   : > { %3613 = vmatmul.msk.f32.gmra.mxu2 %vm422_vm2, %v4974_v4  ;;  %v971_v4 = vadd.f32 %v970_v33, %v4823_v2  ;;  %v1112_v2 = vrot.slane %v4513_v42, 2 }
 0x10e   : > { %v973_v56 = vpop.f32.mrf.mxu1 }
 0x10f   : > { %v1546_v0 = vpop.f32.mrf.mxu0  ;;  %3646 = vmatmul.msk.f32.gmra.mxu3 %vm422_vm2, %v4450_v1 }
 0x110   : > { %v1229_v34 = vpop.f32.mrf.mxu2 }
 0x111   : > { %v1325_v38 = vadd.f32 %v1229_v34, %v968_v54  ;;  %3582 = vmatmul.msk.f32.gmra.mxu1 %vm422_vm2, %v4450_v1  ;;  %v5003_v1 = vsel %vm1063_vm4, %v1109_v9, %v1110_v58 }
 0x112   : > { %3680 = vmatmul.msk.f32.gmra.mxu0 %vm422_vm2, %v4547_v62  ;;  %v1384_v14 = vpop.f32.mrf.mxu3 }
 0x113   : > { %v1480_v43 = vadd.f32 %v1384_v14, %v1325_v38 }
 0x115   : > { %v4989_v36 = vadd.f32 %v1543_v35, %v1480_v43  ;;  %3614 = vmatmul.msk.f32.gmra.mxu2 %vm422_vm2, %v4987_v51  ;;  %v5018_v43 = vsel %vm1063_vm4, %v1110_v58, %v1112_v2 }
 0x116   : > { %v976_v54 = vpop.f32.mrf.mxu1 }
 0x117   : > { %v1549_v34 = vpop.f32.mrf.mxu0  ;;  %3647 = vmatmul.msk.f32.gmra.mxu3 %vm422_vm2, %v4457_v7 }
 0x118   : > { %v1232_v62 = vpop.f32.mrf.mxu2 }
 0x119   : > { %v1326_v45 = vadd.f32 %v1232_v62, %v971_v4  ;;  %3583 = vmatmul.msk.f32.gmra.mxu1 %vm422_vm2, %v4457_v7  ;;  %v974_v4 = vadd.f32 %v973_v56, %v4844_v15  ;;  %v1114_v15 = vrot.slane %v4552_v10, 2  ;;  %v1115_v56 = vrot.slane %v4554_v11, 2 }
 0x11a   : > { %3681 = vmatmul.msk.f32.gmra.mxu0 %vm422_vm2, %v4588_v39  ;;  %v1387_v38 = vpop.f32.mrf.mxu3 }
 0x11b   : > { %v1481_v35 = vadd.f32 %v1387_v38, %v1326_v45 }
 0x11d   : > { %v5005_v31 = vadd.f32 %v1546_v0, %v1481_v35  ;;  %3615 = vmatmul.msk.f32.gmra.mxu2 %vm422_vm2, %v5003_v1  ;;  %v977_v35 = vadd.f32 %v976_v54, %v4864_v22  ;;  %v5939_v22 = vld [vmem:[#allocation28_spill] sm:$0xff] }
 0x11e   : > { %v979_v33 = vpop.f32.mrf.mxu1  ;;  %v1117_v54 = vrot.slane %v5939_v22, 2 }
 0x11f   : > { %v1552_v62 = vpop.f32.mrf.mxu0  ;;  %3648 = vmatmul.msk.f32.gmra.mxu3 %vm422_vm2, %v4552_v10 }
 0x120   : > { %v1235_v7 = vpop.f32.mrf.mxu2 }
 0x121   : > { %v1327_v14 = vadd.f32 %v1235_v7, %v974_v4  ;;  %3584 = vmatmul.msk.f32.gmra.mxu1 %vm422_vm2, %v4552_v10  ;;  %v5034_v10 = vsel %vm1063_vm4, %v1114_v15, %v1115_v56  ;;  %v5049_v15 = vsel %vm1063_vm4, %v1115_v56, %v1117_v54 }
 0x122   : > { %3682 = vmatmul.msk.f32.gmra.mxu0 %vm422_vm2, %v4635_v60  ;;  %v1390_v0 = vpop.f32.mrf.mxu3 }
 0x123   : > { %v1482_v42 = vadd.f32 %v1390_v0, %v1327_v14 }
 0x125   : > { %v5020_v9 = vadd.f32 %v1549_v34, %v1482_v42  ;;  %3616 = vmatmul.msk.f32.gmra.mxu2 %vm422_vm2, %v5018_v43  ;;  %v980_v42 = vadd.f32 %v979_v33, %v4885_v8  ;;  %v5942_v33 = vld [vmem:[#allocation33_spill] sm:$0xff] }
 0x126   : > { %v982_v45 = vpop.f32.mrf.mxu1 }
 0x127   : > { %v1555_v38 = vpop.f32.mrf.mxu0  ;;  %3649 = vmatmul.msk.f32.gmra.mxu3 %vm422_vm2, %v4554_v11 }
 0x128   : > { %v1238_v4 = vpop.f32.mrf.mxu2 }
 0x129   : > { %v1328_v58 = vadd.f32 %v1238_v4, %v977_v35  ;;  %3585 = vmatmul.msk.f32.gmra.mxu1 %vm422_vm2, %v4554_v11  ;;  %v5940_v11 = vld [vmem:[#allocation32_spill] sm:$0xff] }
 0x12a   : > { %3683 = vmatmul.msk.f32.gmra.mxu0 %vm422_vm2, %v4676_v52  ;;  %v1393_v34 = vpop.f32.mrf.mxu3  ;;  %v1119_v8 = vrot.slane %v5940_v11, 2 }
 0x12b   : > { %v1483_v2 = vadd.f32 %v1393_v34, %v1328_v58 }
 0x12d   : > { %v5036_v7 = vadd.f32 %v1552_v62, %v1483_v2  ;;  %3617 = vmatmul.msk.f32.gmra.mxu2 %vm422_vm2, %v5034_v10  ;;  %v1120_v2 = vrot.slane %v5942_v33, 2 }
 0x12e   : > { %v985_v14 = vpop.f32.mrf.mxu1 }
 0x12f   : > { %v1558_v0 = vpop.f32.mrf.mxu0  ;;  %3650 = vmatmul.msk.f32.gmra.mxu3 %vm422_vm2, %v5940_v11 }
 0x130   : > { %v1241_v35 = vpop.f32.mrf.mxu2 }
 0x131   : > { %v1329_v4 = vadd.f32 %v1241_v35, %v980_v42  ;;  %3586 = vmatmul.msk.f32.gmra.mxu1 %vm422_vm2, %v5940_v11  ;;  %v983_v35 = vadd.f32 %v982_v45, %v4905_v44  ;;  %v5065_v11 = vsel %vm1063_vm4, %v1119_v8, %v1120_v2  ;;  %v1122_v44 = vrot.slane %v4679_v20, 2  ;;  %v5946_v8 = vld [vmem:[#allocation15_spill] sm:$0xff] }
 0x132   : > { %3684 = vmatmul.msk.f32.gmra.mxu0 %vm422_vm2, %v4700_v63  ;;  %v1396_v62 = vpop.f32.mrf.mxu3 }
 0x133   : > { %v1484_v58 = vadd.f32 %v1396_v62, %v1329_v4 }
 0x135   : > { %v5051_v34 = vadd.f32 %v1555_v38, %v1484_v58  ;;  %3618 = vmatmul.msk.f32.gmra.mxu2 %vm422_vm2, %v5049_v15  ;;  %v5943_v38 = vld [vmem:[#allocation12_spill] sm:$0xff]  ;;  %v986_v58 = vadd.f32 %v985_v14, %v4926_v30  ;;  %v5948_v14 = vld [vmem:[#allocation9_spill] sm:$0xff] }
 0x136   : > { %v988_v22 = vpop.f32.mrf.mxu1 }
 0x137   : > { %5941 = vst [vmem:[#allocation28_spill] sm:$0xff] %v5051_v34  ;;  %v1561_v42 = vpop.f32.mrf.mxu0  ;;  %3651 = vmatmul.msk.f32.gmra.mxu3 %vm422_vm2, %v5942_v33 }
 0x138   : > { %v1244_v63 = vpop.f32.mrf.mxu2 }
 0x139   : > { %v1330_v56 = vadd.f32 %v1244_v63, %v983_v35  ;;  %3587 = vmatmul.msk.f32.gmra.mxu1 %vm422_vm2, %v5942_v33  ;;  %v5945_v33 = vld [vmem:[#allocation8_spill] sm:$0xff] }
 0x13a   : > { %3685 = vmatmul.msk.f32.gmra.mxu0 %vm422_vm2, %v5943_v38  ;;  %v1399_v54 = vpop.f32.mrf.mxu3  ;;  %v1124_v30 = vrot.slane %v5945_v33, 2 }
 0x13b   : > { %v1485_v4 = vadd.f32 %v1399_v54, %v1330_v56  ;;  %v5080_v56 = vsel %vm1063_vm4, %v1120_v2, %v1122_v44 }
 0x13d   : > { %v5067_v62 = vadd.f32 %v1558_v0, %v1485_v4  ;;  %3619 = vmatmul.msk.f32.gmra.mxu2 %vm422_vm2, %v5065_v11  ;;  %v1125_v4 = vrot.slane %v5948_v14, 2 }
 0x13e   : > { %v991_v45 = vpop.f32.mrf.mxu1 }
 0x13f   : > { %5944 = vst [vmem:[#allocation32_spill] sm:$0xff] %v5067_v62  ;;  %v1564_v63 = vpop.f32.mrf.mxu0  ;;  %3652 = vmatmul.msk.f32.gmra.mxu3 %vm422_vm2, %v5945_v33  ;;  %v989_v62 = vadd.f32 %v988_v22, %v4944_v55  ;;  %v5096_v44 = vsel %vm1063_vm4, %v1124_v30, %v1125_v4  ;;  %v5951_v55 = vld [vmem:[#allocation11_spill] sm:$0xff] }
 0x140   : > { %v1247_v35 = vpop.f32.mrf.mxu2  ;;  %v1127_v22 = vrot.slane %v5951_v55, 2 }
 0x141   : > { %v1331_v34 = vadd.f32 %v1247_v35, %v986_v58  ;;  %3588 = vmatmul.msk.f32.gmra.mxu1 %vm422_vm2, %v5945_v33 }
 0x142   : > { %3686 = vmatmul.msk.f32.gmra.mxu0 %vm422_vm2, %v5946_v8  ;;  %v1402_v0 = vpop.f32.mrf.mxu3 }
 0x143   : > { %v1486_v20 = vadd.f32 %v1402_v0, %v1331_v34  ;;  %v5949_v34 = vld [vmem:[#allocation20_spill] sm:$0xff] }
 0x145   : > { %v5082_v54 = vadd.f32 %v1561_v42, %v1486_v20  ;;  %3620 = vmatmul.msk.f32.gmra.mxu2 %vm422_vm2, %v5080_v56 }
 0x146   : > { %v994_v58 = vpop.f32.mrf.mxu1 }
 0x147   : > { %5947 = vst [vmem:[#allocation33_spill] sm:$0xff] %v5082_v54  ;;  %v1567_v35 = vpop.f32.mrf.mxu0  ;;  %3653 = vmatmul.msk.f32.gmra.mxu3 %vm422_vm2, %v5948_v14 }
 0x148   : > { %v1250_v8 = vpop.f32.mrf.mxu2 }
 0x149   : > { %v1332_v2 = vadd.f32 %v1250_v8, %v989_v62  ;;  %3589 = vmatmul.msk.f32.gmra.mxu1 %vm422_vm2, %v5948_v14  ;;  %v992_v8 = vadd.f32 %v991_v45, %v4787_v19  ;;  %v5952_v14 = vld [vmem:[#allocation16_spill] sm:$0xff]  ;;  %v5955_v45 = vld [vmem:[#allocation17_spill] sm:$0xff] }
 0x14a   : > { %3687 = vmatmul.msk.f32.gmra.mxu0 %vm422_vm2, %v5949_v34  ;;  %v1405_v42 = vpop.f32.mrf.mxu3  ;;  %v1129_v19 = vrot.slane %v5952_v14, 2 }
 0x14b   : > { %v1487_v33 = vadd.f32 %v1405_v42, %v1332_v2  ;;  %v5111_v2 = vsel %vm1063_vm4, %v1125_v4, %v1127_v22 }
 0x14d   : > { %v5098_v0 = vadd.f32 %v1564_v63, %v1487_v33  ;;  %3621 = vmatmul.msk.f32.gmra.mxu2 %vm422_vm2, %v5096_v44  ;;  %v5953_v63 = vld [vmem:[#allocation24_spill] sm:$0xff] }
 0x14e   : > { %v997_v20 = vpop.f32.mrf.mxu1 }
 0x14f   : > { %5950 = vst [vmem:[#allocation12_spill] sm:$0xff] %v5098_v0  ;;  %v1570_v62 = vpop.f32.mrf.mxu0  ;;  %3654 = vmatmul.msk.f32.gmra.mxu3 %vm422_vm2, %v5952_v14  ;;  %v481_v0 = vld [vmem:[%s4243_s11 + $0xf0] sm:$0xff] }
 0x150   : > { %v1253_v34 = vpop.f32.mrf.mxu2  ;;  %515 = vst.msk [vmem:[#allocation2 + $0x181] sm:$0xff] %vm422_vm2, %v481_v0 }
 0x151   : > { %v1333_v54 = vadd.f32 %v1253_v34, %v992_v8  ;;  %3590 = vmatmul.msk.f32.gmra.mxu1 %vm422_vm2, %v5952_v14  ;;  %v1130_v34 = vrot.slane %v5955_v45, 2 }
 0x152   : > { %3688 = vmatmul.msk.f32.gmra.mxu0 %vm422_vm2, %v5953_v63  ;;  %v1408_v30 = vpop.f32.mrf.mxu3  ;;  %v995_v63 = vadd.f32 %v994_v58, %v4801_v25  ;;  %v5958_v58 = vld [vmem:[#allocation21_spill] sm:$0xff] }
 0x153   : > { %v1488_v42 = vadd.f32 %v1408_v30, %v1333_v54  ;;  %v5129_v14 = vsel %vm1063_vm4, %v1129_v19, %v1130_v34  ;;  %v1132_v0 = vrot.slane %v5958_v58, 2 }
 0x155   : > { %v5113_v33 = vadd.f32 %v1567_v35, %v1488_v42  ;;  %3622 = vmatmul.msk.f32.gmra.mxu2 %vm422_vm2, %v5111_v2  ;;  %v5956_v35 = vld [vmem:[#allocation29_spill] sm:$0xff]  ;;  %v482_v42 = vld [vmem:[%s4243_s11 + $0xf8] sm:$0xff]  ;;  %s4075_s11 = scalar_lea.hbm %s5811_s5, 128 }
 0x156   : > { %v1000_v55 = vpop.f32.mrf.mxu1  ;;  %516 = vst.msk [vmem:[#allocation2 + $0x189] sm:$0xff] %vm422_vm2, %v482_v42  ;;  %p4077_p2 = scmp.lt.s32.totalorder %s4075_s11, %s4071_s8 }
 0x157   : > { %5954 = vst [vmem:[#allocation8_spill] sm:$0xff] %v5113_v33  ;;  %v1573_v8 = vpop.f32.mrf.mxu0  ;;  %3655 = vmatmul.msk.f32.gmra.mxu3 %vm422_vm2, %v5955_v45  ;;  %v5959_v33 = vld [vmem:[#allocation25_spill] sm:$0xff] }
 0x158   : > { %v1256_v54 = vpop.f32.mrf.mxu2  ;;  %p4078_p3 = por %p4077_p2, %p4076_p1 }
 0x159   : > { %v1334_v4 = vadd.f32 %v1256_v54, %v995_v63  ;;  %3591 = vmatmul.msk.f32.gmra.mxu1 %vm422_vm2, %v5955_v45  ;;  %v998_v54 = vadd.f32 %v997_v20, %v4821_v21  ;;  %v1134_v21 = vrot.slane %v5959_v33, 2  ;;  %v5962_v20 = vld [vmem:[#allocation26_spill] sm:$0xff] }
 0x15a   : > { %3689 = vmatmul.msk.f32.gmra.mxu0 %vm422_vm2, %v5956_v35  ;;  %v1411_v22 = vpop.f32.mrf.mxu3  ;;  %v1135_v58 = vrot.slane %v5962_v20, 2  ;;  %p4079_p5 = pnand %p4078_p3, %p4074_p0 }
 0x15b   : > { %v1489_v30 = vadd.f32 %v1411_v22, %v1334_v4  ;;  %v5960_v4 = vld [vmem:[#allocation34_spill] sm:$0xff]  ;;  %v5146_v22 = vsel %vm1063_vm4, %v1130_v34, %v1132_v0 }
 0x15d   : > { %v5133_v25 = vadd.f32 %v1570_v62, %v1489_v30  ;;  %3623 = vmatmul.msk.f32.gmra.mxu2 %vm422_vm2, %v5129_v14 }
 0x15e   : > { %v1003_v63 = vpop.f32.mrf.mxu1 }
 0x15f   : > { %5957 = vst [vmem:[#allocation9_spill] sm:$0xff] %v5133_v25  ;;  %v1576_v45 = vpop.f32.mrf.mxu0  ;;  %3656 = vmatmul.msk.f32.gmra.mxu3 %vm422_vm2, %v5959_v33  ;;  %v1001_v25 = vadd.f32 %v1000_v55, %v4842_v61  ;;  %v5965_v61 = vld [vmem:[#allocation30_spill] sm:$0xff] }
 0x160   : > { %v1259_v19 = vpop.f32.mrf.mxu2  ;;  %v1137_v55 = vrot.slane %v5965_v61, 2  ;;  %v5968_v61 = vld [vmem:[#allocation36_spill] sm:$0xff] }
 0x161   : > { %v1335_v35 = vadd.f32 %v1259_v19, %v998_v54  ;;  %3592 = vmatmul.msk.f32.gmra.mxu1 %vm422_vm2, %v5959_v33  ;;  %v5162_v33 = vsel %vm1063_vm4, %v1134_v21, %v1135_v58 }
 0x162   : > { %3690 = vmatmul.msk.f32.gmra.mxu0 %vm422_vm2, %v5960_v4  ;;  %v1414_v62 = vpop.f32.mrf.mxu3  ;;  %5963 = vst [vmem:[#allocation16_spill] sm:$0xff] %v5162_v33 }
 0x163   : > { %v1490_v30 = vadd.f32 %v1414_v62, %v1335_v35 }
 0x165   : > { %v5148_v42 = vadd.f32 %v1573_v8, %v1490_v30  ;;  %3624 = vmatmul.msk.f32.gmra.mxu2 %vm422_vm2, %v5146_v22  ;;  %v5966_v30 = vld [vmem:[#allocation35_spill] sm:$0xff] }
 0x166   : > { %v1006_v54 = vpop.f32.mrf.mxu1 }
 0x167   : > { %5961 = vst [vmem:[#allocation11_spill] sm:$0xff] %v5148_v42  ;;  %v1579_v19 = vpop.f32.mrf.mxu0  ;;  %3657 = vmatmul.msk.f32.gmra.mxu3 %vm422_vm2, %v5962_v20 }
 0x168   : > { %v1262_v4 = vpop.f32.mrf.mxu2 }
 0x169   : > { %v1336_v34 = vadd.f32 %v1262_v4, %v1001_v25  ;;  %3593 = vmatmul.msk.f32.gmra.mxu1 %vm422_vm2, %v5962_v20  ;;  %v1004_v4 = vadd.f32 %v1003_v63, %v4862_v5  ;;  %v566_v20 = vld [vmem:[#allocation2 + $0x188] sm:$0xff] }
 0x16a   : > { %3691 = vmatmul.msk.f32.gmra.mxu0 %vm422_vm2, %v4682_v6  ;;  %v1417_v8 = vpop.f32.mrf.mxu3 }
 0x16b   : > { %v1491_v35 = vadd.f32 %v1417_v8, %v1336_v34  ;;  %v5177_v34 = vsel %vm1063_vm4, %v1135_v58, %v1137_v55  ;;  %v1007_v58 = vadd.f32 %v1006_v54, %v4883_v47  ;;  %v1142_v47 = vrot.slane %v4686_v48, 2 }
 0x16d   : > { %v5164_v0 = vadd.f32 %v1576_v45, %v1491_v35  ;;  %3625 = vmatmul.msk.f32.gmra.mxu2 %vm422_vm2, %v5162_v33  ;;  %v565_v45 = vld [vmem:[#allocation2 + $0x180] sm:$0xff]  ;;  %v1514_v35 = vrot.slane %v566_v20, 1 }
 0x16e   : > { %v1009_v62 = vpop.f32.mrf.mxu1  ;;  %v1513_v8 = vrot.slane %v565_v45, 1 }
 0x16f   : > { %5964 = vst [vmem:[#allocation17_spill] sm:$0xff] %v5164_v0  ;;  %v1582_v25 = vpop.f32.mrf.mxu0  ;;  %3658 = vmatmul.msk.f32.gmra.mxu3 %vm422_vm2, %v5966_v30 }
 0x170   : > { %v1265_v6 = vpop.f32.mrf.mxu2 }
 0x171   : > { %v1337_v42 = vadd.f32 %v1265_v6, %v1004_v4  ;;  %3594 = vmatmul.msk.f32.gmra.mxu1 %vm422_vm2, %v5966_v30  ;;  %v1139_v6 = vrot.slane %v5966_v30, 2  ;;  %v1140_v4 = vrot.slane %v5968_v61, 2 }
 0x172   : > { %3692 = vmatmul.msk.f32.gmra.mxu0 %vm422_vm2, %v4703_v49  ;;  %v1420_v21 = vpop.f32.mrf.mxu3  ;;  %v5186_v49 = vsel %vm620_vm3, %v1513_v8, %v1514_v35 }
 0x173   : > { %v1492_v5 = vadd.f32 %v1420_v21, %v1337_v42  ;;  %5969 = vst [vmem:[#allocation25_spill] sm:$0xff] %v5186_v49  ;;  %v567_v42 = vld [vmem:[#allocation2 + $0x190] sm:$0x3]  ;;  %v5196_v21 = vsel %vm1063_vm4, %v1139_v6, %v1140_v4  ;;  %v5213_v48 = vsel %vm1063_vm4, %v1140_v4, %v1142_v47 }
 0x174   : > { %v1516_v8 = vrot.slane %v567_v42, 1 }
 0x175   : > { %v5179_v63 = vadd.f32 %v1579_v19, %v1492_v5  ;;  %3626 = vmatmul.msk.f32.gmra.mxu2 %vm422_vm2, %v5177_v34 }
 0x176   : > { %v1012_v0 = vpop.f32.mrf.mxu1 }
 0x177   : > { %5967 = vst [vmem:[#allocation21_spill] sm:$0xff] %v5179_v63  ;;  %v1585_v33 = vpop.f32.mrf.mxu0  ;;  %3659 = vmatmul.msk.f32.gmra.mxu3 %vm422_vm2, %v5968_v61 }
 0x178   : > { %v1268_v19 = vpop.f32.mrf.mxu2 }
 0x179   : > { %v1338_v55 = vadd.f32 %v1268_v19, %v1007_v58  ;;  %3595 = vmatmul.msk.f32.gmra.mxu1 %vm422_vm2, %v5968_v61  ;;  %v5204_v61 = vsel %vm620_vm3, %v1514_v35, %v1516_v8  ;;  %v1010_v19 = vadd.f32 %v1009_v62, %v4903_v12 }
 0x17a   : > { %3693 = vmatmul.msk.f32.gmra.mxu0 %vm422_vm2, %v5186_v49  ;;  %v1423_v30 = vpop.f32.mrf.mxu3 }
 0x17b   : > { %v1493_v5 = vadd.f32 %v1423_v30, %v1338_v55 }
 0x17d   : > { %v5198_v63 = vadd.f32 %v1582_v25, %v1493_v5  ;;  %3627 = vmatmul.msk.f32.gmra.mxu2 %vm422_vm2, %v5196_v21 }
 0x17e   : > { %v1015_v54 = vpop.f32.mrf.mxu1 }
 0x17f   : > { %v1588_v58 = vpop.f32.mrf.mxu0  ;;  %3660 = vmatmul.msk.f32.gmra.mxu3 %vm422_vm2, %v565_v45  ;;  %v1013_v45 = vadd.f32 %v1012_v0, %v4924_v28  ;;  %v1016_v28 = vadd.f32 %v1015_v54, %v4827_v13 }
 0x180   : > { %v1271_v6 = vpop.f32.mrf.mxu2 }
 0x181   : > { %v1339_v49 = vadd.f32 %v1271_v6, %v1010_v19  ;;  %3696 = vmatmul.msk.f32.vlgmr.msra.gmra.mxu1 %vm422_vm2, %v4735_v29 }
 0x182   : > { %3694 = vmatmul.msk.f32.gmra.mxu0 %vm422_vm2, %v5204_v61  ;;  %v1426_v25 = vpop.f32.mrf.mxu3 }
 0x183   : > { %v1494_v42 = vadd.f32 %v1426_v25, %v1339_v49 }
 0x185   : > { %v5215_v55 = vadd.f32 %v1585_v33, %v1494_v42  ;;  %3628 = vmatmul.msk.f32.gmra.mxu2 %vm422_vm2, %v5213_v48 }
 0x186   : > { %v1018_v12 = vpop.f32.mrf.mxu1 }
 0x187   : > { %v1591_v62 = vpop.f32.mrf.mxu0  ;;  %3661 = vmatmul.msk.f32.gmra.mxu3 %vm422_vm2, %v566_v20  ;;  %v1019_v54 = vadd.f32 %v1018_v12, %v4848_v23 }
 0x188   : > { %v1274_v29 = vpop.f32.mrf.mxu2 }
 0x189   : > { %v1340_v35 = vadd.f32 %v1274_v29, %v1013_v45  ;;  %3697 = vmatmul.msk.f32.gmra.mxu1 %vm422_vm2, %v4747_v3 }
 0x18a   : > { %3795 = vmatmul.msk.f32.vlgmr.msra.gmra.mxu0 %vm422_vm2, %v4760_v26  ;;  %v1429_v49 = vpop.f32.mrf.mxu3 }
 0x18b   : > { %v1495_v33 = vadd.f32 %v1429_v49, %v1340_v35 }
 0x18d   : > { %v5225_v4 = vadd.f32 %v1588_v58, %v1495_v33  ;;  %3729 = vmatmul.msk.f32.vlgmr.msra.gmra.mxu2 %vm422_vm2, %v4537_v57 }
 0x18e   : > { %v1021_v30 = vpop.f32.mrf.mxu1 }
 0x18f   : > { %v1594_v8 = vpop.f32.mrf.mxu0  ;;  %3762 = vmatmul.msk.f32.vlgmr.msra.gmra.mxu3 %vm422_vm2, %v4571_v32  ;;  %v1022_v25 = vadd.f32 %v1021_v30, %v4868_v50  ;;  %v5970_v30 = vld [vmem:[#allocation49_spill] sm:$0xff] }
 0x190   : > { %v1277_v0 = vpop.f32.mrf.mxu2 }
 0x191   : > { %v1341_v20 = vadd.f32 %v1277_v0, %v1016_v28  ;;  %3698 = vmatmul.msk.f32.gmra.mxu1 %vm422_vm2, %v4760_v26 }
 0x192   : > { %3796 = vmatmul.msk.f32.gmra.mxu0 %vm422_vm2, %v4772_v46  ;;  %v1432_v3 = vpop.f32.mrf.mxu3 }
 0x193   : > { %v1496_v5 = vadd.f32 %v1432_v3, %v1341_v20 }
 0x195   : > { %v5236_v47 = vadd.f32 %v1591_v62, %v1496_v5  ;;  %3730 = vmatmul.msk.f32.gmra.mxu2 %vm422_vm2, %v4539_v59 }
 0x196   : > { %v1024_v57 = vpop.f32.mrf.mxu1 }
 0x197   : > { %v1597_v13 = vpop.f32.mrf.mxu0  ;;  %3763 = vmatmul.msk.f32.gmra.mxu3 %vm422_vm2, %v4610_v18  ;;  %v1025_v45 = vadd.f32 %v1024_v57, %v4889_v27  ;;  %v4028_v57 = vld [vmem:[#allocation2 + $0x68] sm:$0xff] }
 0x198   : > { %v1280_v32 = vpop.f32.mrf.mxu2 }
 0x199   : > { %v1342_v58 = vadd.f32 %v1280_v32, %v1019_v54  ;;  %3699 = vmatmul.msk.f32.gmra.mxu1 %vm422_vm2, %v4772_v46  ;;  %v5973_v32 = vld [vmem:[#allocation52_spill] sm:$0xff] }
 0x19a   : > { %3797 = vmatmul.msk.f32.gmra.mxu0 %vm422_vm2, %v4785_v37  ;;  %v1435_v26 = vpop.f32.mrf.mxu3 }
 0x19b   : > { %v1497_v19 = vadd.f32 %v1435_v26, %v1342_v58  ;;  %v5974_v26 = vld [vmem:[#allocation7_spill] sm:$0xff] }
 0x19d   : > { %v5247_v6 = vadd.f32 %v1594_v8, %v1497_v19  ;;  %3731 = vmatmul.msk.f32.gmra.mxu2 %vm422_vm2, %v4614_v40 }
 0x19e   : > { %v1027_v59 = vpop.f32.mrf.mxu1 }
 0x19f   : > { %v1600_v23 = vpop.f32.mrf.mxu0  ;;  %3764 = vmatmul.msk.f32.gmra.mxu3 %vm422_vm2, %v4659_v53  ;;  %v1028_v8 = vadd.f32 %v1027_v59, %v5970_v30  ;;  %v4030_v30 = vld [vmem:[#allocation2 + $0x80] sm:$0xff] }
 0x1a0   : > { %v1283_v18 = vpop.f32.mrf.mxu2 }
 0x1a1   : > { %v1343_v42 = vadd.f32 %v1283_v18, %v1022_v25  ;;  %3700 = vmatmul.msk.f32.gmra.mxu1 %vm422_vm2, %v4785_v37 }
 0x1a2   : > { %3798 = vmatmul.msk.f32.gmra.mxu0 %vm422_vm2, %v4799_v24  ;;  %v1438_v46 = vpop.f32.mrf.mxu3 }
 0x1a3   : > { %v1498_v12 = vadd.f32 %v1438_v46, %v1343_v42  ;;  %v4029_v42 = vld [vmem:[#allocation2 + $0x78] sm:$0xff] }
 0x1a5   : > { %v5258_v62 = vadd.f32 %v1597_v13, %v1498_v12  ;;  %3732 = vmatmul.msk.f32.gmra.mxu2 %vm422_vm2, %v4619_v17  ;;  %v4027_v17 = vld [vmem:[#allocation2 + $0x60] sm:$0xff] }
 0x1a6   : > { %v1030_v40 = vpop.f32.mrf.mxu1 }
 0x1a7   : > { %v1603_v50 = vpop.f32.mrf.mxu0  ;;  %3765 = vmatmul.msk.f32.gmra.mxu3 %vm422_vm2, %v4690_v41  ;;  %v5971_v41 = vld [vmem:[#allocation6_spill] sm:$0xff]  ;;  %v1031_v58 = vadd.f32 %v1030_v40, %v5973_v32  ;;  %v5976_v40 = vld [vmem:[#allocation55_spill] sm:$0xff] }
 0x1a8   : > { %v1286_v53 = vpop.f32.mrf.mxu2 }
 0x1a9   : > { %v1344_v29 = vadd.f32 %v1286_v53, %v1025_v45  ;;  %3701 = vmatmul.msk.f32.gmra.mxu1 %vm422_vm2, %v4799_v24  ;;  %v5972_v24 = vld [vmem:[#allocation42_spill] sm:$0xff]  ;;  %v5977_v45 = vld [vmem:[#allocation13_spill] sm:$0xff] }
 0x1aa   : > { %3799 = vmatmul.msk.f32.gmra.mxu0 %vm422_vm2, %v4816_v16  ;;  %v1441_v37 = vpop.f32.mrf.mxu3 }
 0x1ab   : > { %v1499_v35 = vadd.f32 %v1441_v37, %v1344_v29  ;;  %v5978_v37 = vld [vmem:[#allocation46_spill] sm:$0xff] }
 0x1ad   : > { %v5269_v49 = vadd.f32 %v1600_v23, %v1499_v35  ;;  %3733 = vmatmul.msk.f32.gmra.mxu2 %vm422_vm2, %v4027_v17 }
 0x1ae   : > { %v1033_v33 = vpop.f32.mrf.mxu1 }
 0x1af   : > { %v1606_v27 = vpop.f32.mrf.mxu0  ;;  %3766 = vmatmul.msk.f32.gmra.mxu3 %vm422_vm2, %v5971_v41  ;;  %v5979_v41 = vld [vmem:[#allocation58_spill] sm:$0xff] }
 0x1b0   : > { %v1289_v28 = vpop.f32.mrf.mxu2 }
 0x1b1   : > { %v1345_v0 = vadd.f32 %v1289_v28, %v1028_v8  ;;  %3702 = vmatmul.msk.f32.gmra.mxu1 %vm422_vm2, %v4816_v16  ;;  %v5975_v16 = vld [vmem:[#allocation44_spill] sm:$0xff] }
 0x1b2   : > { %3800 = vmatmul.msk.f32.gmra.mxu0 %vm422_vm2, %v5972_v24  ;;  %v1444_v20 = vpop.f32.mrf.mxu3 }
 0x1b3   : > { %v1500_v3 = vadd.f32 %v1444_v20, %v1345_v0  ;;  %v5980_v0 = vld [vmem:[#allocation18_spill] sm:$0xff] }
 0x1b5   : > { %v5279_v5 = vadd.f32 %v1603_v50, %v1500_v3  ;;  %3734 = vmatmul.msk.f32.gmra.mxu2 %vm422_vm2, %v4028_v57  ;;  %v1034_v50 = vadd.f32 %v1033_v33, %v5976_v40  ;;  %v5981_v3 = vld [vmem:[#allocation48_spill] sm:$0xff] }
 0x1b6   : > { %v1036_v13 = vpop.f32.mrf.mxu1 }
 0x1b7   : > { %v1609_v54 = vpop.f32.mrf.mxu0  ;;  %3767 = vmatmul.msk.f32.gmra.mxu3 %vm422_vm2, %v5974_v26  ;;  %v1037_v28 = vadd.f32 %v1036_v13, %v5979_v41  ;;  %v5987_v41 = vld [vmem:[#allocation54_spill] sm:$0xff] }
 0x1b8   : > { %v1292_v19 = vpop.f32.mrf.mxu2 }
 0x1b9   : > { %v1346_v59 = vadd.f32 %v1292_v19, %v1031_v58  ;;  %3703 = vmatmul.msk.f32.gmra.mxu1 %vm422_vm2, %v5972_v24  ;;  %v4031_v58 = vld [vmem:[#allocation2 + $0x90] sm:$0xff]  ;;  %v5982_v19 = vld [vmem:[#allocation41_spill] sm:$0xff] }
 0x1ba   : > { %3801 = vmatmul.msk.f32.gmra.mxu0 %vm422_vm2, %v5975_v16  ;;  %v1447_v23 = vpop.f32.mrf.mxu3 }
 0x1bb   : > { %v1501_v25 = vadd.f32 %v1447_v23, %v1346_v59 }
 0x1bd   : > { %v5289_v18 = vadd.f32 %v1606_v27, %v1501_v25  ;;  %3735 = vmatmul.msk.f32.gmra.mxu2 %vm422_vm2, %v4029_v42  ;;  %v5984_v42 = vld [vmem:[#allocation51_spill] sm:$0xff] }
 0x1be   : > { %v1039_v46 = vpop.f32.mrf.mxu1 }
 0x1bf   : > { %v1612_v12 = vpop.f32.mrf.mxu0  ;;  %3768 = vmatmul.msk.f32.gmra.mxu3 %vm422_vm2, %v5977_v45  ;;  %v1040_v59 = vadd.f32 %v1039_v46, %v5982_v19  ;;  %v4032_v45 = vld [vmem:[#allocation2 + $0x98] sm:$0xff] }
 0x1c0   : > { %v1295_v53 = vpop.f32.mrf.mxu2 }
 0x1c1   : > { %v1347_v29 = vadd.f32 %v1295_v53, %v1034_v50  ;;  %3704 = vmatmul.msk.f32.gmra.mxu1 %vm422_vm2, %v5975_v16  ;;  %v5983_v16 = vld [vmem:[#allocation22_spill] sm:$0xff] }
 0x1c2   : > { %3802 = vmatmul.msk.f32.gmra.mxu0 %vm422_vm2, %v5978_v37  ;;  %v1450_v35 = vpop.f32.mrf.mxu3 }
 0x1c3   : > { %v1502_v17 = vadd.f32 %v1450_v35, %v1347_v29  ;;  %v5985_v29 = vld [vmem:[#allocation43_spill] sm:$0xff] }
 0x1c4   : > { %v5986_v35 = vld [vmem:[#allocation27_spill] sm:$0xff] }
 0x1c5   : > { %v5299_v27 = vadd.f32 %v1609_v54, %v1502_v17  ;;  %3736 = vmatmul.msk.f32.gmra.mxu2 %vm422_vm2, %v4030_v30 }
 0x1c6   : > { %v1042_v8 = vpop.f32.mrf.mxu1 }
 0x1c7   : > { %v1615_v33 = vpop.f32.mrf.mxu0  ;;  %3769 = vmatmul.msk.f32.gmra.mxu3 %vm422_vm2, %v5980_v0 }
 0x1c8   : > { %v1298_v24 = vpop.f32.mrf.mxu2 }
 0x1c9   : > { %v1348_v20 = vadd.f32 %v1298_v24, %v1037_v28  ;;  %3705 = vmatmul.msk.f32.gmra.mxu1 %vm422_vm2, %v5978_v37  ;;  %v1043_v37 = vadd.f32 %v1042_v8, %v5985_v29  ;;  %v4033_v24 = vld [vmem:[#allocation2 + $0xa8] sm:$0xff] }
 0x1ca   : > { %3803 = vmatmul.msk.f32.gmra.mxu0 %vm422_vm2, %v5981_v3  ;;  %v1453_v57 = vpop.f32.mrf.mxu3 }
 0x1cb   : > { %v1503_v54 = vadd.f32 %v1453_v57, %v1348_v20 }
 0x1cd   : > { %v5309_v32 = vadd.f32 %v1612_v12, %v1503_v54  ;;  %3737 = vmatmul.msk.f32.gmra.mxu2 %vm422_vm2, %v4031_v58  ;;  %v5989_v54 = vld [vmem:[#allocation31_spill] sm:$0xff] }
 0x1ce   : > { %v1045_v26 = vpop.f32.mrf.mxu1 }
 0x1cf   : > { %v1618_v13 = vpop.f32.mrf.mxu0  ;;  %3770 = vmatmul.msk.f32.gmra.mxu3 %vm422_vm2, %v5983_v16 }
 0x1d0   : > { %v1301_v23 = vpop.f32.mrf.mxu2 }
 0x1d1   : > { %v1349_v25 = vadd.f32 %v1301_v23, %v1040_v59  ;;  %3706 = vmatmul.msk.f32.gmra.mxu1 %vm422_vm2, %v5981_v3  ;;  %v5988_v3 = vld [vmem:[#allocation45_spill] sm:$0xff] }
 0x1d2   : > { %3804 = vmatmul.msk.f32.gmra.mxu0 %vm422_vm2, %v5984_v42  ;;  %v1456_v12 = vpop.f32.mrf.mxu3  ;;  %v1046_v57 = vadd.f32 %v1045_v26, %v5988_v3  ;;  %v5990_v59 = vld [vmem:[#allocation57_spill] sm:$0xff]  ;;  %v5995_v3 = vld [vmem:[#allocation10_spill] sm:$0xff] }
 0x1d3   : > { %v1504_v40 = vadd.f32 %v1456_v12, %v1349_v25  ;;  %v4034_v25 = vld [vmem:[#allocation2 + $0xb0] sm:$0xff]  ;;  %v5991_v12 = vld [vmem:[#allocation47_spill] sm:$0xff] }
 0x1d5   : > { %v5319_v50 = vadd.f32 %v1615_v33, %v1504_v40  ;;  %3738 = vmatmul.msk.f32.gmra.mxu2 %vm422_vm2, %v4032_v45  ;;  %v5992_v45 = vld [vmem:[#allocation37_spill] sm:$0xff] }
 0x1d6   : > { %v1048_v53 = vpop.f32.mrf.mxu1 }
 0x1d7   : > { %v1621_v46 = vpop.f32.mrf.mxu0  ;;  %3771 = vmatmul.msk.f32.gmra.mxu3 %vm422_vm2, %v5986_v35  ;;  %v1049_v40 = vadd.f32 %v1048_v53, %v5991_v12  ;;  %v5993_v35 = vld [vmem:[#allocation60_spill] sm:$0xff]  ;;  %v5997_v12 = vld [vmem:[#allocation14_spill] sm:$0xff] }
 0x1d8   : > { %v1304_v17 = vpop.f32.mrf.mxu2 }
 0x1d9   : > { %v1350_v30 = vadd.f32 %v1304_v17, %v1043_v37  ;;  %3707 = vmatmul.msk.f32.gmra.mxu1 %vm422_vm2, %v5984_v42 }
 0x1da   : > { %3805 = vmatmul.msk.f32.gmra.mxu0 %vm422_vm2, %v5987_v41  ;;  %v1459_v33 = vpop.f32.mrf.mxu3 }
 0x1db   : > { %v1505_v28 = vadd.f32 %v1459_v33, %v1350_v30 }
 0x1dd   : > { %v5329_v0 = vadd.f32 %v1618_v13, %v1505_v28  ;;  %3739 = vmatmul.msk.f32.gmra.mxu2 %vm422_vm2, %v4033_v24  ;;  %v5994_v28 = vld [vmem:[#allocation50_spill] sm:$0xff] }
 0x1de   : > { %v1051_v20 = vpop.f32.mrf.mxu1 }
 0x1df   : > { %v1624_v8 = vpop.f32.mrf.mxu0  ;;  %3772 = vmatmul.msk.f32.gmra.mxu3 %vm422_vm2, %v5989_v54  ;;  %v1052_v24 = vadd.f32 %v1051_v20, %v5994_v28  ;;  %v5999_v28 = vld [vmem:[#allocation19_spill] sm:$0xff] }
 0x1e0   : > { %v1307_v58 = vpop.f32.mrf.mxu2 }
 0x1e1   : > { %v1351_v19 = vadd.f32 %v1307_v58, %v1046_v57  ;;  %3708 = vmatmul.msk.f32.gmra.mxu1 %vm422_vm2, %v5987_v41  ;;  %v4035_v41 = vld [vmem:[#allocation2 + $0xc0] sm:$0xff] }
 0x1e2   : > { %3806 = vmatmul.msk.f32.gmra.mxu0 %vm422_vm2, %v5990_v59  ;;  %v1462_v13 = vpop.f32.mrf.mxu3 }
 0x1e3   : > { %v1506_v16 = vadd.f32 %v1462_v13, %v1351_v19 }
 0x1e5   : > { %v5339_v23 = vadd.f32 %v1621_v46, %v1506_v16  ;;  %3740 = vmatmul.msk.f32.gmra.mxu2 %vm422_vm2, %v4034_v25  ;;  %v5996_v16 = vld [vmem:[#allocation53_spill] sm:$0xff] }
 0x1e6   : > { %v1054_v42 = vpop.f32.mrf.mxu1 }
 0x1e7   : > { %v1627_v26 = vpop.f32.mrf.mxu0  ;;  %3773 = vmatmul.msk.f32.gmra.mxu3 %vm422_vm2, %v5992_v45  ;;  %v1055_v25 = vadd.f32 %v1054_v42, %v5996_v16  ;;  %v6001_v16 = vld [vmem:[#allocation23_spill] sm:$0xff] }
 0x1e8   : > { %v1310_v29 = vpop.f32.mrf.mxu2 }
 0x1e9   : > { %v1352_v37 = vadd.f32 %v1310_v29, %v1049_v40  ;;  %3709 = vmatmul.msk.f32.gmra.mxu1 %vm422_vm2, %v5990_v59  ;;  %v4036_v59 = vld [vmem:[#allocation2 + $0xc8] sm:$0xff] }
 0x1ea   : > { %3807 = vmatmul.msk.f32.gmra.mxu0 %vm422_vm2, %v5993_v35  ;;  %v1465_v46 = vpop.f32.mrf.mxu3 }
 0x1eb   : > { %v1507_v17 = vadd.f32 %v1465_v46, %v1352_v37 }
 0x1ed   : > { %v5349_v30 = vadd.f32 %v1624_v8, %v1507_v17  ;;  %3741 = vmatmul.msk.f32.gmra.mxu2 %vm422_vm2, %v4035_v41  ;;  %v5998_v17 = vld [vmem:[#allocation56_spill] sm:$0xff] }
 0x1ee   : > { %v1057_v33 = vpop.f32.mrf.mxu1 }
 0x1ef   : > { %v1630_v53 = vpop.f32.mrf.mxu0  ;;  %3774 = vmatmul.msk.f32.gmra.mxu3 %vm422_vm2, %v5995_v3  ;;  %v1058_v41 = vadd.f32 %v1057_v33, %v5998_v17 }
 0x1f0   : > { %v1313_v57 = vpop.f32.mrf.mxu2 }
 0x1f1   : > { %v1353_v54 = vadd.f32 %v1313_v57, %v1052_v24  ;;  %3710 = vmatmul.msk.f32.gmra.mxu1 %vm422_vm2, %v5993_v35  ;;  %v4037_v35 = vld [vmem:[#allocation2 + $0xd8] sm:$0xff] }
 0x1f2   : > { %3808 = vmatmul.msk.f32.gmra.mxu0 %vm422_vm2, %v4987_v51  ;;  %v1468_v8 = vpop.f32.mrf.mxu3 }
 0x1f3   : > { %v1508_v58 = vadd.f32 %v1468_v8, %v1353_v54  ;;  %v4038_v54 = vld [vmem:[#allocation2 + $0xe0] sm:$0xff] }
 0x1f5   : > { %v5359_v19 = vadd.f32 %v1627_v26, %v1508_v58  ;;  %3742 = vmatmul.msk.f32.gmra.mxu2 %vm422_vm2, %v4036_v59  ;;  %v6000_v58 = vld [vmem:[#allocation59_spill] sm:$0xff] }
 0x1f6   : > { %v1060_v13 = vpop.f32.mrf.mxu1 }
 0x1f7   : > { %v1633_v20 = vpop.f32.mrf.mxu0  ;;  %3775 = vmatmul.msk.f32.gmra.mxu3 %vm422_vm2, %v5997_v12  ;;  %v1061_v59 = vadd.f32 %v1060_v13, %v6000_v58 }
 0x1f8   : > { %v1316_v40 = vpop.f32.mrf.mxu2 }
 0x1f9   : > { %v1354_v45 = vadd.f32 %v1316_v40, %v1055_v25  ;;  %3711 = vmatmul.msk.f32.gmra.mxu1 %vm422_vm2, %v4987_v51 }
 0x1fa   : > { %3809 = vmatmul.msk.f32.gmra.mxu0 %vm422_vm2, %v5003_v1  ;;  %v1471_v26 = vpop.f32.mrf.mxu3 }
 0x1fb   : > { %v1509_v29 = vadd.f32 %v1471_v26, %v1354_v45  ;;  %v4039_v45 = vld [vmem:[#allocation2 + $0xf0] sm:$0xff] }
 0x1fd   : > { %v5369_v37 = vadd.f32 %v1630_v53, %v1509_v29  ;;  %3743 = vmatmul.msk.f32.gmra.mxu2 %vm422_vm2, %v4037_v35 }
 0x1fe   : > { %v1701_v46 = vpop.f32.mrf.mxu1 }
 0x1ff   : > { %v1636_v42 = vpop.f32.mrf.mxu0  ;;  %3776 = vmatmul.msk.f32.gmra.mxu3 %vm422_vm2, %v5999_v28  ;;  %v1797_v29 = vadd.f32 %v1701_v46, %v4989_v36  ;;  %v5403_v36 = vld [vmem:[%s5810_s4] ss:$0 sm:$0xff] }
 0x200   : > { %v1319_v24 = vpop.f32.mrf.mxu2 }
 0x201   : > { %v1355_v3 = vadd.f32 %v1319_v24, %v1058_v41  ;;  %3712 = vmatmul.msk.f32.gmra.mxu1 %vm422_vm2, %v5003_v1  ;;  %v4040_v41 = vld [vmem:[#allocation2 + $0xf8] sm:$0xff] }
 0x202   : > { %3810 = vmatmul.msk.f32.gmra.mxu0 %vm422_vm2, %v5018_v43  ;;  %v1474_v51 = vpop.f32.mrf.mxu3 }
 0x203   : > { %v1510_v53 = vadd.f32 %v1474_v51, %v1355_v3 }
 0x205   : > { %v5379_v57 = vadd.f32 %v1633_v20, %v1510_v53  ;;  %3744 = vmatmul.msk.f32.gmra.mxu2 %vm422_vm2, %v4038_v54 }
 0x206   : > { %v1704_v8 = vpop.f32.mrf.mxu1 }
 0x207   : > { %v2173_v33 = vpop.f32.mrf.mxu0  ;;  %3777 = vmatmul.msk.f32.gmra.mxu3 %vm422_vm2, %v6001_v16  ;;  %v1798_v24 = vadd.f32 %v1704_v8, %v5005_v31 }
 0x208   : > { %v1322_v25 = vpop.f32.mrf.mxu2 }
 0x209   : > { %v1356_v12 = vadd.f32 %v1322_v25, %v1061_v59  ;;  %3713 = vmatmul.msk.f32.gmra.mxu1 %vm422_vm2, %v5018_v43 }
 0x20a   : > { %3811 = vmatmul.msk.f32.gmra.mxu0 %vm422_vm2, %v5034_v10  ;;  %v1477_v1 = vpop.f32.mrf.mxu3 }
 0x20b   : > { %v1511_v20 = vadd.f32 %v1477_v1, %v1356_v12 }
 0x20d   : > { %v5389_v40 = vadd.f32 %v1636_v42, %v1511_v20  ;;  %3745 = vmatmul.msk.f32.gmra.mxu2 %vm422_vm2, %v4039_v45 }
 0x20e   : > { %v1707_v26 = vpop.f32.mrf.mxu1 }
 0x20f   : > { %6002 = vst [vmem:[#allocation26_spill] sm:$0xff] %v5389_v40  ;;  %v2176_v13 = vpop.f32.mrf.mxu0  ;;  %3778 = vmatmul.msk.f32.gmra.mxu3 %vm422_vm2, %v4588_v39 }
 0x210   : > { %v1856_v35 = vpop.f32.mrf.mxu2 }
 0x211   : > { %v1952_v17 = vadd.f32 %v1856_v35, %v1797_v29  ;;  %3714 = vmatmul.msk.f32.gmra.mxu1 %vm422_vm2, %v5034_v10 }
 0x212   : > { %3812 = vmatmul.msk.f32.gmra.mxu0 %vm422_vm2, %v5049_v15  ;;  %v2015_v43 = vpop.f32.mrf.mxu3 }
 0x213   : > { %v2111_v42 = vadd.f32 %v2015_v43, %v1952_v17 }
 0x215   : > { %3746 = vmatmul.msk.f32.gmra.mxu2 %vm422_vm2, %v4040_v41  ;;  %v2269_v28 = vadd.f32 %v2173_v33, %v2111_v42  ;;  %v4041_v33 = vld [vmem:[#allocation2 + $0x108] sm:$0xff]  ;;  %v6003_v42 = vld [vmem:[#allocation39_spill] sm:$0xff] }
 0x216   : > { %v1710_v39 = vpop.f32.mrf.mxu1 }
 0x217   : > { %v2179_v46 = vpop.f32.mrf.mxu0  ;;  %3779 = vmatmul.msk.f32.gmra.mxu3 %vm422_vm2, %v4635_v60  ;;  %v2305_v51 = vadd.f32 %v5403_v36, %v2269_v28  ;;  %v1799_v60 = vadd.f32 %v1707_v26, %v5020_v9  ;;  %v4042_v9 = vld [vmem:[#allocation2 + $0x110] sm:$0xff] }
 0x218   : > { %v1859_v10 = vpop.f32.mrf.mxu2 }
 0x219   : > { %v1953_v3 = vadd.f32 %v1859_v10, %v1798_v24  ;;  %3715 = vmatmul.msk.f32.gmra.mxu1 %vm422_vm2, %v5049_v15  ;;  %v2337_v58 = vmax.f32 %v2305_v51, 0.0 }
 0x21a   : > { %3813 = vmatmul.msk.f32.gmra.mxu0 %vm422_vm2, %v5065_v11  ;;  %v2018_v53 = vpop.f32.mrf.mxu3 }
 0x21b   : > { %v2112_v54 = vadd.f32 %v2018_v53, %v1953_v3  ;;  %v2401_v25 = vrot.slane %v2337_v58, 2  ;;  %v2402_v20 = vrot.slane %v2337_v58, 4  ;;  %v3827_v26 = vrot.slane %v2337_v58, 9 }
 0x21d   : > { %3747 = vmatmul.msk.f32.gmra.mxu2 %vm422_vm2, %v4041_v33  ;;  %v2270_v15 = vadd.f32 %v2176_v13, %v2112_v54  ;;  %v3828_v13 = vrot.slane %v2401_v25, 9  ;;  %v3829_v41 = vrot.slane %v2402_v20, 9  ;;  %v2785_v51 = vmax.f32 %v2337_v58, %v3827_v26 }
 0x21e   : > { %v5414_v31 = vpop.f32.mrf.mxu1 }
 0x21f   : > { %v2182_v8 = vpop.f32.mrf.mxu0  ;;  %3780 = vmatmul.msk.f32.gmra.mxu3 %vm422_vm2, %v4676_v52  ;;  %v2306_v45 = vadd.f32 %v5403_v36, %v2270_v15  ;;  %v2403_v52 = vrot.slane %v2337_v58, 6  ;;  %v2787_v15 = vmax.f32 %v2402_v20, %v3829_v41 }
 0x220   : > { %v1862_v59 = vpop.f32.mrf.mxu2 }
 0x221   : > { %v1954_v16 = vadd.f32 %v1862_v59, %v1799_v60  ;;  %3716 = vmatmul.msk.f32.gmra.mxu1 %vm422_vm2, %v5065_v11  ;;  %v1800_v11 = vadd.f32 %v1710_v39, %v5036_v7  ;;  %v5431_v28 = vmax.f32 %v2306_v45, 0.0  ;;  %v3830_v3 = vrot.slane %v2403_v52, 9 }
 0x222   : > { %3814 = vmatmul.msk.f32.gmra.mxu0 %vm422_vm2, %v5080_v56  ;;  %v2021_v12 = vpop.f32.mrf.mxu3  ;;  %v2786_v7 = vmax.f32 %v2401_v25, %v3828_v13 }
 0x223   : > { %v2113_v1 = vadd.f32 %v2021_v12, %v1954_v16  ;;  %v2404_v59 = vrot.slane %v5431_v28, 2  ;;  %v2405_v16 = vrot.slane %v5431_v28, 4  ;;  %v2788_v58 = vmax.f32 %v2403_v52, %v3830_v3 }
 0x224   : > { %v2406_v25 = vrot.slane %v5431_v28, 6  ;;  %v3831_v26 = vrot.slane %v5431_v28, 9 }
 0x225   : > { %v2271_v29 = vadd.f32 %v2179_v46, %v2113_v1  ;;  %3748 = vmatmul.msk.f32.gmra.mxu2 %vm422_vm2, %v4042_v9  ;;  %v4043_v9 = vld [vmem:[#allocation2 + $0x120] sm:$0xff] }
 0x226   : > { %v1716_v35 = vpop.f32.mrf.mxu1 }
 0x227   : > { %v5425_v17 = vpop.f32.mrf.mxu0  ;;  %v2307_v43 = vadd.f32 %v5403_v36, %v2271_v29  ;;  %3781 = vmatmul.msk.f32.gmra.mxu3 %vm422_vm2, %v6003_v42 }
 0x228   : > { %v1865_v46 = vpop.f32.mrf.mxu2 }
 0x229   : > { %v2339_v24 = vmax.f32 %v2307_v43, 0.0  ;;  %v1955_v10 = vadd.f32 %v1865_v46, %v1800_v11  ;;  %3717 = vmatmul.msk.f32.gmra.mxu1 %vm422_vm2, %v5080_v56 }
 0x22a   : > { %3815 = vmatmul.msk.f32.gmra.mxu0 %vm422_vm2, %v5096_v44  ;;  %v2024_v39 = vpop.f32.mrf.mxu3 }
 0x22b   : > { %v2407_v53 = vrot.slane %v2339_v24, 2  ;;  %v2408_v54 = vrot.slane %v2339_v24, 4  ;;  %v2409_v33 = vrot.slane %v2339_v24, 6  ;;  %v3891_v60 = vrot.slane %v2339_v24, 9 }
 0x22c   : > { %v2114_v12 = vadd.f32 %v2024_v39, %v1955_v10  ;;  %v6004_v10 = vld [vmem:[#allocation28_spill] sm:$0xff] }
 0x22d   : > { %v3892_v56 = vrot.slane %v2407_v53, 9  ;;  %v3893_v1 = vrot.slane %v2408_v54, 9  ;;  %v3894_v45 = vrot.slane %v2409_v33, 9  ;;  %v3041_v29 = vmax.f32 %v2339_v24, %v3891_v60  ;;  %3749 = vmatmul.msk.f32.gmra.mxu2 %vm422_vm2, %v4043_v9 }
 0x22e   : > { %v2272_v13 = vadd.f32 %v2182_v8, %v2114_v12  ;;  %v5442_v11 = vpop.f32.mrf.mxu1  ;;  %v3832_v24 = vrot.slane %v2404_v59, 9  ;;  %v1801_v52 = vadd.f32 %v5414_v31, %v6004_v10  ;;  %v3833_v8 = vrot.slane %v2405_v16, 9  ;;  %v4044_v10 = vld [vmem:[#allocation2 + $0x128] sm:$0xff] }
 0x22f   : > { %v5444_v20 = vpop.f32.mrf.mxu0  ;;  %v3042_v43 = vmax.f32 %v2407_v53, %v3892_v56  ;;  %v3043_v42 = vmax.f32 %v2408_v54, %v3893_v1  ;;  %v3044_v41 = vmax.f32 %v2409_v33, %v3894_v45  ;;  %v3105_v46 = vmax.f32 %v2785_v51, %v3041_v29  ;;  %3782 = vmatmul.msk.f32.gmra.mxu3 %vm422_vm2, %v5943_v38  ;;  %v6005_v45 = vld [vmem:[#allocation32_spill] sm:$0xff] }
 0x230   : > { %v2308_v3 = vadd.f32 %v5403_v36, %v2272_v13  ;;  %v1868_v39 = vpop.f32.mrf.mxu2  ;;  %v3834_v51 = vrot.slane %v2406_v25, 9  ;;  %v2789_v38 = vmax.f32 %v5431_v28, %v3831_v26  ;;  %v1802_v29 = vadd.f32 %v1716_v35, %v6005_v45 }
 0x231   : > { %v3106_v60 = vmax.f32 %v2786_v7, %v3042_v43  ;;  %v3107_v12 = vmax.f32 %v2787_v15, %v3043_v42  ;;  %v3108_v9 = vmax.f32 %v2788_v58, %v3044_v41  ;;  %3718 = vmatmul.msk.f32.gmra.mxu1 %vm422_vm2, %v5096_v44  ;;  %v1956_v54 = vadd.f32 %v1868_v39, %v1801_v52 }
 0x232   : > { %3816 = vmatmul.msk.f32.gmra.mxu0 %vm422_vm2, %v5111_v2  ;;  %v2340_v53 = vmax.f32 %v2308_v3, 0.0  ;;  %v2027_v33 = vpop.f32.mrf.mxu3  ;;  %v3233_v31 = vperm.slane %v3105_v46, 0  ;;  %v2790_v43 = vmax.f32 %v2404_v59, %v3832_v24  ;;  %v2791_v39 = vmax.f32 %v2405_v16, %v3833_v8 }
 0x233   : > { %v3234_v56 = vperm.slane %v3106_v60, 0  ;;  %v3235_v1 = vperm.slane %v3107_v12, 0  ;;  %v3236_v44 = vperm.slane %v3108_v9, 0  ;;  %v2115_v41 = vadd.f32 %v2027_v33, %v1956_v54  ;;  %v6006_v12 = vld [vmem:[#allocation15_spill] sm:$0xff] }
 0x234   : > { %v2410_v7 = vrot.slane %v2340_v53, 2  ;;  %v2411_v15 = vrot.slane %v2340_v53, 4  ;;  %v2412_v58 = vrot.slane %v2340_v53, 6  ;;  %v3895_v13 = vrot.slane %v2340_v53, 9 }
 0x235   : > { %v3298_v42 = vsel %vm3297_vm5, %v3234_v56, %v3233_v31  ;;  %3750 = vmatmul.msk.f32.gmra.mxu2 %vm422_vm2, %v4044_v10  ;;  %v2273_v24 = vadd.f32 %v5425_v17, %v2115_v41  ;;  %v2792_v9 = vmax.f32 %v2406_v25, %v3834_v51  ;;  %v6007_v10 = vld [vmem:[#allocation33_spill] sm:$0xff] }
 0x236   : > { %v3300_v28 = vsel %vm3299_vm6, %v3235_v1, %v3298_v42  ;;  %v3896_v26 = vrot.slane %v2410_v7, 9  ;;  %v3897_v46 = vrot.slane %v2411_v15, 9  ;;  %v3898_v52 = vrot.slane %v2412_v58, 9  ;;  %v5460_v3 = vpop.f32.mrf.mxu1 }
 0x237   : > { %v2191_v35 = vpop.f32.mrf.mxu0  ;;  %v3302_v60 = vsel %vm3301_vm7, %v3236_v44, %v3300_v28  ;;  %v3045_v59 = vmax.f32 %v2340_v53, %v3895_v13  ;;  %3783 = vmatmul.msk.f32.gmra.mxu3 %vm422_vm2, %v6006_v12  ;;  %v2309_v25 = vadd.f32 %v5403_v36, %v2273_v24  ;;  %v1803_v28 = vadd.f32 %v5442_v11, %v6007_v10 }
 0x238   : > { %v3046_v54 = vmax.f32 %v2410_v7, %v3896_v26  ;;  %v3047_v33 = vmax.f32 %v2411_v15, %v3897_v46  ;;  %v3048_v31 = vmax.f32 %v2412_v58, %v3898_v52  ;;  %v1871_v56 = vpop.f32.mrf.mxu2  ;;  %v6008_v26 = vld [vmem:[#allocation20_spill] sm:$0xff] }
 0x239   : > { %v3109_v1 = vmax.f32 %v2789_v38, %v3045_v59  ;;  %v1957_v45 = vadd.f32 %v1871_v56, %v1802_v29  ;;  %3719 = vmatmul.msk.f32.gmra.mxu1 %vm422_vm2, %v5111_v2  ;;  %v4045_v2 = vld [vmem:[#allocation2 + $0x138] sm:$0xff] }
 0x23a   : > { %3817 = vmatmul.msk.f32.gmra.mxu0 %vm422_vm2, %v5129_v14  ;;  %v3110_v17 = vmax.f32 %v2790_v43, %v3046_v54  ;;  %v3111_v16 = vmax.f32 %v2791_v39, %v3047_v33  ;;  %v3112_v8 = vmax.f32 %v2792_v9, %v3048_v31  ;;  %v2030_v51 = vpop.f32.mrf.mxu3  ;;  %v2341_v43 = vmax.f32 %v2309_v25, 0.0 }
 0x23b   : > { %v3237_v53 = vperm.slane %v3109_v1, 0  ;;  %v2116_v29 = vadd.f32 %v2030_v51, %v1957_v45 }
 0x23c   : > { %v3238_v7 = vperm.slane %v3110_v17, 0  ;;  %v3239_v38 = vperm.slane %v3111_v16, 0  ;;  %v3240_v58 = vperm.slane %v3112_v8, 0  ;;  %v2413_v59 = vrot.slane %v2341_v43, 2  ;;  %v6009_v17 = vld [vmem:[#allocation12_spill] sm:$0xff] }
 0x23d   : > { %v3304_v15 = vsel %vm3303_vm8, %v3237_v53, %v3302_v60  ;;  %3751 = vmatmul.msk.f32.gmra.mxu2 %vm422_vm2, %v4045_v2  ;;  %v2274_v52 = vadd.f32 %v5444_v20, %v2116_v29  ;;  %v2414_v12 = vrot.slane %v2341_v43, 4  ;;  %v4046_v20 = vld [vmem:[#allocation2 + $0x140] sm:$0xff]  ;;  %v2415_v33 = vrot.slane %v2341_v43, 6 }
 0x23e   : > { %v3306_v13 = vsel %vm3305_vm9, %v3238_v7, %v3304_v15  ;;  %v5477_v44 = vpop.f32.mrf.mxu1  ;;  %v3835_v31 = vrot.slane %v2341_v43, 9  ;;  %v3836_v56 = vrot.slane %v2413_v59, 9  ;;  %v6010_v8 = vld [vmem:[#allocation24_spill] sm:$0xff] }
 0x23f   : > { %v2194_v42 = vpop.f32.mrf.mxu0  ;;  %v3308_v41 = vsel %vm3307_vm10, %v3239_v38, %v3306_v13  ;;  %3784 = vmatmul.msk.f32.gmra.mxu3 %vm422_vm2, %v6008_v26  ;;  %v2310_v9 = vadd.f32 %v5403_v36, %v2274_v52  ;;  %v3837_v25 = vrot.slane %v2414_v12, 9  ;;  %v3838_v38 = vrot.slane %v2415_v33, 9 }
 0x240   : > { %v3310_v46 = vsel %vm3309_vm11, %v3240_v58, %v3308_v41  ;;  %v1874_v39 = vpop.f32.mrf.mxu2  ;;  %v2793_v29 = vmax.f32 %v2341_v43, %v3835_v31  ;;  %v2794_v15 = vmax.f32 %v2413_v59, %v3836_v56  ;;  %v6011_v58 = vld [vmem:[#allocation16_spill] sm:$0xff] }
 0x241   : > { %3368 = vst [vmem:[%s5486_s15] sm:$0xff] %v3310_v46  ;;  %v1958_v60 = vadd.f32 %v1874_v39, %v1803_v28  ;;  %3720 = vmatmul.msk.f32.gmra.mxu1 %vm422_vm2, %v5129_v14  ;;  %v1804_v14 = vadd.f32 %v5460_v3, %v6009_v17  ;;  %v5502_v51 = vmax.f32 %v2310_v9, 0.0  ;;  %v2795_v28 = vmax.f32 %v2414_v12, %v3837_v25  ;;  %v6013_v25 = vld [vmem:[#allocation8_spill] sm:$0xff] }
 0x242   : > { %v2033_v24 = vpop.f32.mrf.mxu3  ;;  %3818 = vmatmul.msk.f32.gmra.mxu0 %vm422_vm2, %v5146_v22 }
 0x243   : > { %v2117_v11 = vadd.f32 %v2033_v24, %v1958_v60  ;;  %v2416_v26 = vrot.slane %v5502_v51, 2  ;;  %v2417_v46 = vrot.slane %v5502_v51, 4  ;;  %v4047_v24 = vld [vmem:[#allocation2 + $0x150] sm:$0xff]  ;;  %v3839_v9 = vrot.slane %v5502_v51, 9 }
 0x245   : > { %v2275_v54 = vadd.f32 %v2191_v35, %v2117_v11  ;;  %3752 = vmatmul.msk.f32.gmra.mxu2 %vm422_vm2, %v4046_v20  ;;  %v2418_v11 = vrot.slane %v5502_v51, 6 }
 0x246   : > { %v1728_v1 = vpop.f32.mrf.mxu1 }
 0x247   : > { %v5495_v45 = vpop.f32.mrf.mxu0  ;;  %v2311_v16 = vadd.f32 %v5403_v36, %v2275_v54  ;;  %3785 = vmatmul.msk.f32.gmra.mxu3 %vm422_vm2, %v6010_v8  ;;  %v3840_v8 = vrot.slane %v2416_v26, 9 }
 0x248   : > { %v1877_v35 = vpop.f32.mrf.mxu2 }
 0x249   : > { %v2343_v53 = vmax.f32 %v2311_v16, 0.0  ;;  %v1959_v7 = vadd.f32 %v1877_v35, %v1804_v14  ;;  %3721 = vmatmul.msk.f32.gmra.mxu1 %vm422_vm2, %v5146_v22  ;;  %v2796_v22 = vmax.f32 %v2415_v33, %v3838_v38  ;;  %v6012_v16 = vld [vmem:[#allocation29_spill] sm:$0xff]  ;;  %v1805_v33 = vadd.f32 %v5477_v44, %v6013_v25 }
 0x24a   : > { %v2036_v2 = vpop.f32.mrf.mxu3  ;;  %3819 = vmatmul.msk.f32.gmra.mxu0 %vm422_vm2, %v6011_v58 }
 0x24b   : > { %v2419_v3 = vrot.slane %v2343_v53, 2  ;;  %v2420_v13 = vrot.slane %v2343_v53, 4  ;;  %v2421_v41 = vrot.slane %v2343_v53, 6  ;;  %v3899_v10 = vrot.slane %v2343_v53, 9 }
 0x24c   : > { %v2118_v52 = vadd.f32 %v2036_v2, %v1959_v7  ;;  %v3841_v7 = vrot.slane %v2417_v46, 9 }
 0x24d   : > { %v3900_v39 = vrot.slane %v2419_v3, 9  ;;  %v3901_v43 = vrot.slane %v2420_v13, 9  ;;  %v3902_v60 = vrot.slane %v2421_v41, 9  ;;  %v3049_v59 = vmax.f32 %v2343_v53, %v3899_v10  ;;  %3753 = vmatmul.msk.f32.gmra.mxu2 %vm422_vm2, %v4047_v24 }
 0x24e   : > { %v2276_v54 = vadd.f32 %v2194_v42, %v2118_v52  ;;  %v5513_v20 = vpop.f32.mrf.mxu1  ;;  %v3842_v10 = vrot.slane %v2418_v11, 9  ;;  %v2799_v25 = vmax.f32 %v2417_v46, %v3841_v7 }
 0x24f   : > { %v5515_v12 = vpop.f32.mrf.mxu0  ;;  %v3050_v31 = vmax.f32 %v2419_v3, %v3900_v39  ;;  %v3051_v56 = vmax.f32 %v2420_v13, %v3901_v43  ;;  %v3052_v17 = vmax.f32 %v2421_v41, %v3902_v60  ;;  %v3113_v14 = vmax.f32 %v2793_v29, %v3049_v59  ;;  %3786 = vmatmul.msk.f32.gmra.mxu3 %vm422_vm2, %v6012_v16  ;;  %v6014_v43 = vld [vmem:[#allocation9_spill] sm:$0xff] }
 0x250   : > { %v2312_v35 = vadd.f32 %v5403_v36, %v2276_v54  ;;  %v1880_v53 = vpop.f32.mrf.mxu2  ;;  %v2797_v3 = vmax.f32 %v5502_v51, %v3839_v9  ;;  %v1806_v60 = vadd.f32 %v1728_v1, %v6014_v43 }
 0x251   : > { %v3114_v42 = vmax.f32 %v2794_v15, %v3050_v31  ;;  %v3115_v38 = vmax.f32 %v2795_v28, %v3051_v56  ;;  %v3116_v2 = vmax.f32 %v2796_v22, %v3052_v17  ;;  %v1960_v41 = vadd.f32 %v1880_v53, %v1805_v33  ;;  %3722 = vmatmul.msk.f32.gmra.mxu1 %vm422_vm2, %v6011_v58  ;;  %v4048_v31 = vld [vmem:[#allocation2 + $0x158] sm:$0xff] }
 0x252   : > { %v2344_v13 = vmax.f32 %v2312_v35, 0.0  ;;  %v2039_v29 = vpop.f32.mrf.mxu3  ;;  %3820 = vmatmul.msk.f32.gmra.mxu0 %vm422_vm2, %v5177_v34  ;;  %v3241_v44 = vperm.slane %v3113_v14, 0  ;;  %v2798_v22 = vmax.f32 %v2416_v26, %v3840_v8  ;;  %v6015_v8 = vld [vmem:[#allocation34_spill] sm:$0xff]  ;;  %v2800_v53 = vmax.f32 %v2418_v11, %v3842_v10 }
 0x253   : > { %v3242_v52 = vperm.slane %v3114_v42, 0  ;;  %v3243_v39 = vperm.slane %v3115_v38, 0  ;;  %v3244_v51 = vperm.slane %v3116_v2, 0  ;;  %v2119_v54 = vadd.f32 %v2039_v29, %v1960_v41 }
 0x254   : > { %v2422_v15 = vrot.slane %v2344_v13, 2  ;;  %v2423_v28 = vrot.slane %v2344_v13, 4  ;;  %v2424_v59 = vrot.slane %v2344_v13, 6  ;;  %v3903_v24 = vrot.slane %v2344_v13, 9 }
 0x255   : > { %v3311_v9 = vsel %vm3297_vm5, %v3242_v52, %v3241_v44  ;;  %3754 = vmatmul.msk.f32.gmra.mxu2 %vm422_vm2, %v4048_v31  ;;  %v2277_v26 = vadd.f32 %v5495_v45, %v2119_v54  ;;  %v6017_v31 = vld [vmem:[#allocation38_spill] sm:$0xff] }
 0x256   : > { %v3312_v58 = vsel %vm3299_vm6, %v3243_v39, %v3311_v9  ;;  %v3904_v56 = vrot.slane %v2422_v15, 9  ;;  %v3905_v17 = vrot.slane %v2423_v28, 9  ;;  %v3906_v14 = vrot.slane %v2424_v59, 9  ;;  %v5531_v16 = vpop.f32.mrf.mxu1  ;;  %v6016_v9 = vld [vmem:[#allocation11_spill] sm:$0xff] }
 0x257   : > { %v2203_v1 = vpop.f32.mrf.mxu0  ;;  %v3313_v33 = vsel %vm3301_vm7, %v3244_v51, %v3312_v58  ;;  %v3053_v35 = vmax.f32 %v2344_v13, %v3903_v24  ;;  %3787 = vmatmul.msk.f32.gmra.mxu3 %vm422_vm2, %v6015_v8  ;;  %v2313_v44 = vadd.f32 %v5403_v36, %v2277_v26  ;;  %v1807_v54 = vadd.f32 %v5513_v20, %v6016_v9  ;;  %v4050_v20 = vld [vmem:[#allocation2 + $0x180] sm:$0xff]  ;;  %v5560_v8 = vld [vmem:[#allocation2 + $0x188] sm:$0xff] }
 0x258   : > { %v3054_v42 = vmax.f32 %v2422_v15, %v3904_v56  ;;  %v3055_v38 = vmax.f32 %v2423_v28, %v3905_v17  ;;  %v3056_v2 = vmax.f32 %v2424_v59, %v3906_v14  ;;  %v1883_v41 = vpop.f32.mrf.mxu2  ;;  %v4049_v28 = vld [vmem:[#allocation2 + $0x168] sm:$0xff]  ;;  %v1671_v26 = vrot.slane %v4050_v20, 2 }
 0x259   : > { %v3117_v29 = vmax.f32 %v2797_v3, %v3053_v35  ;;  %v1961_v52 = vadd.f32 %v1883_v41, %v1806_v60  ;;  %3723 = vmatmul.msk.f32.gmra.mxu1 %vm422_vm2, %v5177_v34  ;;  %v2345_v15 = vmax.f32 %v2313_v44, 0.0  ;;  %v4052_v44 = vld [vmem:[#allocation2 + $0x170] sm:$0xff] }
 0x25a   : > { %v3118_v39 = vmax.f32 %v2798_v22, %v3054_v42  ;;  %v3119_v43 = vmax.f32 %v2799_v25, %v3055_v38  ;;  %v3120_v46 = vmax.f32 %v2800_v53, %v3056_v2  ;;  %v2042_v7 = vpop.f32.mrf.mxu3  ;;  %3821 = vmatmul.msk.f32.gmra.mxu0 %vm422_vm2, %v5196_v21  ;;  %v1672_v53 = vrot.slane %v5560_v8, 2 }
 0x25b   : > { %v3245_v45 = vperm.slane %v3117_v29, 0  ;;  %v2120_v11 = vadd.f32 %v2042_v7, %v1961_v52  ;;  %v2425_v17 = vrot.slane %v2345_v15, 2  ;;  %v2426_v14 = vrot.slane %v2345_v15, 4 }
 0x25c   : > { %v3246_v10 = vperm.slane %v3118_v39, 0  ;;  %v3247_v13 = vperm.slane %v3119_v43, 0  ;;  %v3248_v60 = vperm.slane %v3120_v46, 0  ;;  %v3843_v38 = vrot.slane %v2345_v15, 9  ;;  %v6018_v46 = vld [vmem:[#allocation17_spill] sm:$0xff] }
 0x25d   : > { %v3314_v3 = vsel %vm3303_vm8, %v3245_v45, %v3313_v33  ;;  %3755 = vmatmul.msk.f32.gmra.mxu2 %vm422_vm2, %v4049_v28  ;;  %v2278_v24 = vadd.f32 %v5515_v12, %v2120_v11  ;;  %v2427_v33 = vrot.slane %v2345_v15, 6  ;;  %v3844_v2 = vrot.slane %v2425_v17, 9  ;;  %v6019_v11 = vld [vmem:[#allocation40_spill] sm:$0xff]  ;;  %v6020_v28 = vld [vmem:[#allocation21_spill] sm:$0xff] }
 0x25e   : > { %v3315_v59 = vsel %vm3305_vm9, %v3246_v10, %v3314_v3  ;;  %v1737_v34 = vpop.f32.mrf.mxu1  ;;  %v3845_v41 = vrot.slane %v2426_v14, 9  ;;  %v1808_v7 = vadd.f32 %v5531_v16, %v6018_v46  ;;  %v1673_v10 = vsel %vm1063_vm4, %v1671_v26, %v1672_v53 }
 0x25f   : > { %v5546_v22 = vpop.f32.mrf.mxu0  ;;  %v3316_v51 = vsel %vm3307_vm10, %v3247_v13, %v3315_v59  ;;  %3788 = vmatmul.msk.f32.gmra.mxu3 %vm422_vm2, %v6017_v31  ;;  %v2314_v12 = vadd.f32 %v5403_v36, %v2278_v24  ;;  %v3846_v52 = vrot.slane %v2427_v33, 9  ;;  %v2801_v13 = vmax.f32 %v2345_v15, %v3843_v38 }
 0x260   : > { %v3317_v58 = vsel %vm3309_vm11, %v3248_v60, %v3316_v51  ;;  %v1886_v56 = vpop.f32.mrf.mxu2  ;;  %v1809_v60 = vadd.f32 %v1737_v34, %v6020_v28  ;;  %v2802_v59 = vmax.f32 %v2425_v17, %v3844_v2  ;;  %v2803_v24 = vmax.f32 %v2426_v14, %v3845_v41  ;;  %v5582_v14 = vld [vmem:[#allocation2 + $0x1a0] sm:$0xff] }
 0x261   : > { %3369 = vst [vmem:[%s5486_s15 + $0x8] sm:$0xff] %v3317_v58  ;;  %v1962_v25 = vadd.f32 %v1886_v56, %v1807_v54  ;;  %3724 = vmatmul.msk.f32.gmra.mxu1 %vm422_vm2, %v5196_v21  ;;  %v5564_v39 = vmax.f32 %v2314_v12, 0.0  ;;  %v2804_v54 = vmax.f32 %v2427_v33, %v3846_v52  ;;  %v4053_v56 = vld [vmem:[#allocation2 + $0x190] sm:$0x3] }
 0x262   : > { %v2045_v35 = vpop.f32.mrf.mxu3  ;;  %3822 = vmatmul.msk.f32.gmra.mxu0 %vm422_vm2, %v5213_v48  ;;  %v1674_v15 = vrot.slane %v4053_v56, 2 }
 0x263   : > { %v2121_v42 = vadd.f32 %v2045_v35, %v1962_v25  ;;  %v2428_v16 = vrot.slane %v5564_v39, 2  ;;  %v2429_v33 = vrot.slane %v5564_v39, 4  ;;  %v2430_v35 = vrot.slane %v5564_v39, 6 }
 0x264   : > { %v3847_v26 = vrot.slane %v5564_v39, 9 }
 0x265   : > { %v2279_v29 = vadd.f32 %v2203_v1, %v2121_v42  ;;  %3756 = vmatmul.msk.f32.gmra.mxu2 %vm422_vm2, %v4052_v44  ;;  %v5574_v1 = vld [vmem:[#allocation2 + $0x198] sm:$0xff] }
 0x266   : > { %v1740_v21 = vpop.f32.mrf.mxu1  ;;  %v2805_v56 = vmax.f32 %v5564_v39, %v3847_v26 }
 0x267   : > { %v5566_v43 = vpop.f32.mrf.mxu0  ;;  %v2315_v45 = vadd.f32 %v5403_v36, %v2279_v29  ;;  %3789 = vmatmul.msk.f32.gmra.mxu3 %vm422_vm2, %v6019_v11  ;;  %v3848_v29 = vrot.slane %v2428_v16, 9 }
 0x268   : > { %v1889_v3 = vpop.f32.mrf.mxu2 }
 0x269   : > { %v2347_v51 = vmax.f32 %v2315_v45, 0.0  ;;  %v1963_v9 = vadd.f32 %v1889_v3, %v1808_v7  ;;  %3725 = vmatmul.msk.f32.gmra.mxu1 %vm422_vm2, %v5213_v48  ;;  %v1675_v45 = vsel %vm1063_vm4, %v1672_v53, %v1674_v15  ;;  %v1810_v7 = vadd.f32 %v1740_v21, %v5198_v63 }
 0x26a   : > { %v2048_v31 = vpop.f32.mrf.mxu3  ;;  %3823 = vmatmul.msk.f32.gmra.mxu0 %vm422_vm2, %v1673_v10  ;;  %v2806_v53 = vmax.f32 %v2428_v16, %v3848_v29 }
 0x26b   : > { %v2431_v25 = vrot.slane %v2347_v51, 2  ;;  %v2432_v12 = vrot.slane %v2347_v51, 4  ;;  %v2433_v34 = vrot.slane %v2347_v51, 6  ;;  %v3907_v17 = vrot.slane %v2347_v51, 9 }
 0x26c   : > { %v2122_v42 = vadd.f32 %v2048_v31, %v1963_v9  ;;  %v6021_v31 = vld [vmem:[#allocation25_spill] sm:$0xff] }
 0x26d   : > { %v3908_v48 = vrot.slane %v2431_v25, 9  ;;  %v3909_v38 = vrot.slane %v2432_v12, 9  ;;  %v3910_v2 = vrot.slane %v2433_v34, 9  ;;  %v3057_v41 = vmax.f32 %v2347_v51, %v3907_v17  ;;  %3757 = vmatmul.msk.f32.gmra.mxu2 %vm422_vm2, %v4050_v20 }
 0x26e   : > { %v2280_v44 = vadd.f32 %v5546_v22, %v2122_v42  ;;  %v5589_v52 = vpop.f32.mrf.mxu1  ;;  %v3849_v51 = vrot.slane %v2429_v33, 9  ;;  %v3850_v20 = vrot.slane %v2430_v35, 9 }
 0x26f   : > { %v5591_v46 = vpop.f32.mrf.mxu0  ;;  %v3058_v11 = vmax.f32 %v2431_v25, %v3908_v48  ;;  %v3059_v3 = vmax.f32 %v2432_v12, %v3909_v38  ;;  %v3060_v28 = vmax.f32 %v2433_v34, %v3910_v2  ;;  %v3121_v9 = vmax.f32 %v2801_v13, %v3057_v41  ;;  %3790 = vmatmul.msk.f32.gmra.mxu3 %vm422_vm2, %v6021_v31 }
 0x270   : > { %v2316_v22 = vadd.f32 %v5403_v36, %v2280_v44  ;;  %v1892_v17 = vpop.f32.mrf.mxu2  ;;  %v2143_v13 = vrot.slane %v5574_v1, 2  ;;  %v2144_v48 = vrot.slane %v5582_v14, 2  ;;  %v2807_v63 = vmax.f32 %v2429_v33, %v3849_v51 }
 0x271   : > { %v3122_v42 = vmax.f32 %v2802_v59, %v3058_v11  ;;  %v3123_v58 = vmax.f32 %v2803_v24, %v3059_v3  ;;  %v3124_v40 = vmax.f32 %v2804_v54, %v3060_v28  ;;  %v1964_v25 = vadd.f32 %v1892_v17, %v1809_v60  ;;  %3726 = vmatmul.msk.f32.gmra.mxu1 %vm422_vm2, %v1673_v10 }
 0x272   : > { %v2348_v15 = vmax.f32 %v2316_v22, 0.0  ;;  %v2051_v12 = vpop.f32.mrf.mxu3  ;;  %3824 = vmatmul.msk.f32.gmra.mxu0 %vm422_vm2, %v1675_v45  ;;  %v3249_v34 = vperm.slane %v3121_v9, 0  ;;  %v2808_v33 = vmax.f32 %v2430_v35, %v3850_v20 }
 0x273   : > { %v3250_v39 = vperm.slane %v3122_v42, 0  ;;  %v3251_v26 = vperm.slane %v3123_v58, 0  ;;  %v3252_v21 = vperm.slane %v3124_v40, 0  ;;  %v2123_v16 = vadd.f32 %v2051_v12, %v1964_v25 }
 0x274   : > { %v2434_v59 = vrot.slane %v2348_v15, 2  ;;  %v2435_v24 = vrot.slane %v2348_v15, 4  ;;  %v2436_v54 = vrot.slane %v2348_v15, 6  ;;  %v3911_v38 = vrot.slane %v2348_v15, 9 }
 0x275   : > { %v3318_v60 = vsel %vm3297_vm5, %v3250_v39, %v3249_v34  ;;  %3758 = vmatmul.msk.f32.gmra.mxu2 %vm422_vm2, %v5560_v8  ;;  %v2281_v28 = vadd.f32 %v5566_v43, %v2123_v16  ;;  %v2145_v40 = vsel %vm1063_vm4, %v2143_v13, %v2144_v48  ;;  %v570_v43 = vld [vmem:[#allocation2 + $0x1a8] sm:$0x3] }
 0x276   : > { %v3319_v10 = vsel %vm3299_vm6, %v3251_v26, %v3318_v60  ;;  %v3912_v2 = vrot.slane %v2434_v59, 9  ;;  %v3913_v41 = vrot.slane %v2435_v24, 9  ;;  %v3914_v29 = vrot.slane %v2436_v54, 9  ;;  %v1746_v58 = vpop.f32.mrf.mxu1 }
 0x277   : > { %v2215_v44 = vpop.f32.mrf.mxu0  ;;  %v3320_v11 = vsel %vm3301_vm7, %v3252_v21, %v3319_v10  ;;  %v3061_v3 = vmax.f32 %v2348_v15, %v3911_v38  ;;  %3791 = vmatmul.msk.f32.gmra.mxu3 %vm422_vm2, %v5204_v61  ;;  %v2317_v17 = vadd.f32 %v5403_v36, %v2281_v28  ;;  %v2146_v13 = vrot.slane %v570_v43, 2 }
 0x278   : > { %v3062_v9 = vmax.f32 %v2434_v59, %v3912_v2  ;;  %v3063_v8 = vmax.f32 %v2435_v24, %v3913_v41  ;;  %v3064_v31 = vmax.f32 %v2436_v54, %v3914_v29  ;;  %v1895_v51 = vpop.f32.mrf.mxu2  ;;  %v6022_v26 = vrot.slane %v5582_v14, 1 }
 0x279   : > { %v3125_v22 = vmax.f32 %v2805_v56, %v3061_v3  ;;  %v1965_v42 = vadd.f32 %v1895_v51, %v1810_v7  ;;  %3727 = vmatmul.msk.f32.gmra.mxu1 %vm422_vm2, %v1675_v45  ;;  %v6023_v56 = vrot.slane %v5574_v1, 1  ;;  %v2349_v24 = vmax.f32 %v2317_v17, 0.0 }
 0x27a   : > { %v3126_v25 = vmax.f32 %v2806_v53, %v3062_v9  ;;  %v3127_v12 = vmax.f32 %v2807_v63, %v3063_v8  ;;  %v3128_v34 = vmax.f32 %v2808_v33, %v3064_v31  ;;  %v2054_v15 = vpop.f32.mrf.mxu3  ;;  %3825 = vmatmul.msk.f32.gmra.mxu0 %vm422_vm2, %v2145_v40  ;;  %v1811_v21 = vadd.f32 %v5589_v52, %v5215_v55 }
 0x27b   : > { %v3253_v61 = vperm.slane %v3125_v22, 0  ;;  %v2124_v39 = vadd.f32 %v2054_v15, %v1965_v42  ;;  %v1987_v7 = vsel %vm620_vm3, %v6023_v56, %v6022_v26  ;;  %v2147_v60 = vsel %vm1063_vm4, %v2144_v48, %v2146_v13 }
 0x27c   : > { %v3254_v35 = vperm.slane %v3126_v25, 0  ;;  %v3255_v20 = vperm.slane %v3127_v12, 0  ;;  %v3256_v45 = vperm.slane %v3128_v34, 0  ;;  %v1988_v2 = vrot.slane %v570_v43, 1 }
 0x27d   : > { %v3321_v53 = vsel %vm3303_vm8, %v3253_v61, %v3320_v11  ;;  %3759 = vmatmul.msk.f32.gmra.mxu2 %vm422_vm2, %v5574_v1  ;;  %v2282_v10 = vadd.f32 %v5591_v46, %v2124_v39  ;;  %v2437_v29 = vrot.slane %v2349_v24, 2  ;;  %v2438_v28 = vrot.slane %v2349_v24, 4 }
 0x27e   : > { %v3322_v59 = vsel %vm3305_vm9, %v3254_v35, %v3321_v53  ;;  %v1749_v54 = vpop.f32.mrf.mxu1  ;;  %v6024_v52 = vmov %v6022_v26  ;;  %v2439_v46 = vrot.slane %v2349_v24, 6  ;;  %v3851_v33 = vrot.slane %v2349_v24, 9 }
 0x27f   : > { %v2218_v38 = vpop.f32.mrf.mxu0  ;;  %v3323_v63 = vsel %vm3307_vm10, %v3255_v20, %v3322_v59  ;;  %3792 = vmatmul.msk.f32.gmra.mxu3 %vm422_vm2, %v1987_v7  ;;  %v2318_v55 = vadd.f32 %v5403_v36, %v2282_v10  ;;  %v1989_v48 = vsel %vm620_vm3, %v6024_v52, %v1988_v2  ;;  %v3852_v9 = vrot.slane %v2437_v29, 9 }
 0x280   : > { %v3324_v16 = vsel %vm3309_vm11, %v3256_v45, %v3323_v63  ;;  %v1898_v1 = vpop.f32.mrf.mxu2  ;;  %v1812_v51 = vadd.f32 %v1746_v58, %v5225_v4  ;;  %v3853_v17 = vrot.slane %v2438_v28, 9  ;;  %v3854_v34 = vrot.slane %v2439_v46, 9 }
 0x281   : > { %3370 = vst [vmem:[%s5486_s15 + $0x10] sm:$0xff] %v3324_v16  ;;  %v1966_v41 = vadd.f32 %v1898_v1, %v1811_v21  ;;  %v5645_v42 = vmax.f32 %v2318_v55, 0.0  ;;  %v2810_v15 = vmax.f32 %v2437_v29, %v3852_v9 }
 0x282   : > { %v2057_v11 = vpop.f32.mrf.mxu3  ;;  %3826 = vmatmul.msk.f32.gmra.mxu0 %vm422_vm2, %v2147_v60  ;;  %v2811_v39 = vmax.f32 %v2438_v28, %v3853_v17  ;;  %v2812_v59 = vmax.f32 %v2439_v46, %v3854_v34 }
 0x283   : > { %v2125_v3 = vadd.f32 %v2057_v11, %v1966_v41  ;;  %v2440_v4 = vrot.slane %v5645_v42, 2  ;;  %v2441_v58 = vrot.slane %v5645_v42, 4  ;;  %v2442_v63 = vrot.slane %v5645_v42, 6 }
 0x284   : > { %v1813_v11 = vadd.f32 %v1749_v54, %v5236_v47 }
 0x285   : > { %v2283_v40 = vadd.f32 %v2215_v44, %v2125_v3  ;;  %3760 = vmatmul.msk.f32.gmra.mxu2 %vm422_vm2, %v5582_v14  ;;  %v2809_v14 = vmax.f32 %v2349_v24, %v3851_v33  ;;  %v3855_v24 = vrot.slane %v5645_v42, 9  ;;  %v3856_v29 = vrot.slane %v2440_v4, 9 }
 0x286   : > { %v1752_v8 = vpop.f32.mrf.mxu1  ;;  %v3857_v55 = vrot.slane %v2441_v58, 9  ;;  %v3858_v46 = vrot.slane %v2442_v63, 9 }
 0x287   : > { %v5640_v31 = vpop.f32.mrf.mxu0  ;;  %v2319_v22 = vadd.f32 %v5403_v36, %v2283_v40  ;;  %3793 = vmatmul.msk.f32.gmra.mxu3 %vm422_vm2, %v1989_v48  ;;  %v2814_v34 = vmax.f32 %v2440_v4, %v3856_v29 }
 0x288   : > { %v1901_v25 = vpop.f32.mrf.mxu2 }
 0x289   : > { %v2351_v44 = vmax.f32 %v2319_v22, 0.0  ;;  %v1967_v12 = vadd.f32 %v1901_v25, %v1812_v51 }
 0x28a   : > { %v2060_v43 = vpop.f32.mrf.mxu3 }
 0x28b   : > { %v2443_v61 = vrot.slane %v2351_v44, 2  ;;  %v2444_v13 = vrot.slane %v2351_v44, 4  ;;  %v2445_v35 = vrot.slane %v2351_v44, 6  ;;  %v3915_v20 = vrot.slane %v2351_v44, 9 }
 0x28c   : > { %v2126_v26 = vadd.f32 %v2060_v43, %v1967_v12 }
 0x28d   : > { %v3916_v56 = vrot.slane %v2443_v61, 9  ;;  %v3917_v7 = vrot.slane %v2444_v13, 9  ;;  %v3918_v53 = vrot.slane %v2445_v35, 9  ;;  %v3065_v45 = vmax.f32 %v2351_v44, %v3915_v20 }
 0x28e   : > { %v2284_v21 = vadd.f32 %v2218_v38, %v2126_v26  ;;  %v5651_v60 = vpop.f32.mrf.mxu1  ;;  %v2813_v38 = vmax.f32 %v5645_v42, %v3855_v24  ;;  %v1814_v44 = vadd.f32 %v1752_v8, %v5247_v6  ;;  %v2815_v26 = vmax.f32 %v2441_v58, %v3857_v55 }
 0x28f   : > { %v5653_v16 = vpop.f32.mrf.mxu0  ;;  %v3066_v10 = vmax.f32 %v2443_v61, %v3916_v56  ;;  %v3067_v1 = vmax.f32 %v2444_v13, %v3917_v7  ;;  %v3068_v2 = vmax.f32 %v2445_v35, %v3918_v53  ;;  %v3129_v41 = vmax.f32 %v2809_v14, %v3065_v45 }
 0x290   : > { %v2320_v3 = vadd.f32 %v5403_v36, %v2284_v21  ;;  %v1904_v28 = vpop.f32.mrf.mxu2  ;;  %v2816_v7 = vmax.f32 %v2442_v63, %v3858_v46 }
 0x291   : > { %v3130_v52 = vmax.f32 %v2810_v15, %v3066_v10  ;;  %v3131_v48 = vmax.f32 %v2811_v39, %v3067_v1  ;;  %v3132_v40 = vmax.f32 %v2812_v59, %v3068_v2  ;;  %v1968_v9 = vadd.f32 %v1904_v28, %v1813_v11 }
 0x292   : > { %v2352_v33 = vmax.f32 %v2320_v3, 0.0  ;;  %v2063_v51 = vpop.f32.mrf.mxu3  ;;  %v3257_v22 = vperm.slane %v3129_v41, 0  ;;  %v5666_v41 = vld [vmem:[%s5810_s4] ss:$0 sm:$0xff] }
 0x293   : > { %v3258_v17 = vperm.slane %v3130_v52, 0  ;;  %v3259_v25 = vperm.slane %v3131_v48, 0  ;;  %v3260_v14 = vperm.slane %v3132_v40, 0  ;;  %v2127_v43 = vadd.f32 %v2063_v51, %v1968_v9 }
 0x294   : > { %v2446_v12 = vrot.slane %v2352_v33, 2  ;;  %v2447_v47 = vrot.slane %v2352_v33, 4  ;;  %v2448_v54 = vrot.slane %v2352_v33, 6  ;;  %v3919_v36 = vrot.slane %v2352_v33, 9 }
 0x295   : > { %v3325_v15 = vsel %vm3297_vm5, %v3258_v17, %v3257_v22  ;;  %v2285_v8 = vadd.f32 %v5640_v31, %v2127_v43 }
 0x296   : > { %v3326_v61 = vsel %vm3299_vm6, %v3259_v25, %v3325_v15  ;;  %v3920_v42 = vrot.slane %v2446_v12, 9  ;;  %v3921_v13 = vrot.slane %v2447_v47, 9  ;;  %v3922_v35 = vrot.slane %v2448_v54, 9  ;;  %v1758_v20 = vpop.f32.mrf.mxu1 }
 0x297   : > { %v2227_v39 = vpop.f32.mrf.mxu0  ;;  %v3327_v56 = vsel %vm3301_vm7, %v3260_v14, %v3326_v61  ;;  %v3069_v6 = vmax.f32 %v2352_v33, %v3919_v36  ;;  %v2321_v58 = vadd.f32 %v5666_v41, %v2285_v8  ;;  %v1815_v33 = vadd.f32 %v5651_v60, %v5258_v62 }
 0x298   : > { %v3070_v53 = vmax.f32 %v2446_v12, %v3920_v42  ;;  %v3071_v4 = vmax.f32 %v2447_v47, %v3921_v13  ;;  %v3072_v45 = vmax.f32 %v2448_v54, %v3922_v35  ;;  %v1907_v59 = vpop.f32.mrf.mxu2  ;;  %v1816_v62 = vadd.f32 %v1758_v20, %v5269_v49 }
 0x299   : > { %v3133_v24 = vmax.f32 %v2813_v38, %v3069_v6  ;;  %v1969_v21 = vadd.f32 %v1907_v59, %v1814_v44  ;;  %v2353_v48 = vmax.f32 %v2321_v58, 0.0 }
 0x29a   : > { %v3134_v10 = vmax.f32 %v2814_v34, %v3070_v53  ;;  %v3135_v1 = vmax.f32 %v2815_v26, %v3071_v4  ;;  %v3136_v2 = vmax.f32 %v2816_v7, %v3072_v45  ;;  %v2066_v29 = vpop.f32.mrf.mxu3 }
 0x29b   : > { %v3261_v31 = vperm.slane %v3133_v24, 0  ;;  %v2128_v3 = vadd.f32 %v2066_v29, %v1969_v21  ;;  %v2449_v25 = vrot.slane %v2353_v48, 2  ;;  %v2450_v47 = vrot.slane %v2353_v48, 4 }
 0x29c   : > { %v3262_v63 = vperm.slane %v3134_v10, 0  ;;  %v3263_v11 = vperm.slane %v3135_v1, 0  ;;  %v3264_v55 = vperm.slane %v3136_v2, 0  ;;  %v2451_v34 = vrot.slane %v2353_v48, 6 }
 0x29d   : > { %v3328_v28 = vsel %vm3303_vm8, %v3261_v31, %v3327_v56  ;;  %v2286_v51 = vadd.f32 %v5653_v16, %v2128_v3  ;;  %v3859_v14 = vrot.slane %v2353_v48, 9  ;;  %v3860_v15 = vrot.slane %v2449_v25, 9 }
 0x29e   : > { %v3329_v52 = vsel %vm3305_vm9, %v3262_v63, %v3328_v28  ;;  %v1761_v40 = vpop.f32.mrf.mxu1  ;;  %v3861_v16 = vrot.slane %v2450_v47, 9  ;;  %v3862_v56 = vrot.slane %v2451_v34, 9 }
 0x29f   : > { %v2230_v46 = vpop.f32.mrf.mxu0  ;;  %v3330_v38 = vsel %vm3307_vm10, %v3263_v11, %v3329_v52  ;;  %v2322_v54 = vadd.f32 %v5666_v41, %v2286_v51  ;;  %v2817_v6 = vmax.f32 %v2353_v48, %v3859_v14  ;;  %v2818_v8 = vmax.f32 %v2449_v25, %v3860_v15 }
 0x2a0   : > { %v3331_v9 = vsel %vm3309_vm11, %v3264_v55, %v3330_v38  ;;  %v1910_v22 = vpop.f32.mrf.mxu2  ;;  %v2819_v59 = vmax.f32 %v2450_v47, %v3861_v16  ;;  %v2820_v58 = vmax.f32 %v2451_v34, %v3862_v56 }
 0x2a1   : > { %3371 = vst [vmem:[%s5486_s15 + $0x18] sm:$0xff] %v3331_v9  ;;  %v1970_v17 = vadd.f32 %v1910_v22, %v1815_v33  ;;  %v5682_v42 = vmax.f32 %v2322_v54, 0.0  ;;  %v1817_v33 = vadd.f32 %v1761_v40, %v5279_v5 }
 0x2a2   : > { %v2069_v44 = vpop.f32.mrf.mxu3 }
 0x2a3   : > { %v2129_v12 = vadd.f32 %v2069_v44, %v1970_v17  ;;  %v2452_v24 = vrot.slane %v5682_v42, 2  ;;  %v2453_v49 = vrot.slane %v5682_v42, 4  ;;  %v2454_v29 = vrot.slane %v5682_v42, 6 }
 0x2a4   : > { %v3863_v31 = vrot.slane %v5682_v42, 9 }
 0x2a5   : > { %v2287_v36 = vadd.f32 %v2227_v39, %v2129_v12  ;;  %v3864_v38 = vrot.slane %v2452_v24, 9  ;;  %v3865_v22 = vrot.slane %v2453_v49, 9  ;;  %v3866_v12 = vrot.slane %v2454_v29, 9 }
 0x2a6   : > { %v1764_v43 = vpop.f32.mrf.mxu1 }
 0x2a7   : > { %v5678_v61 = vpop.f32.mrf.mxu0  ;;  %v2323_v60 = vadd.f32 %v5666_v41, %v2287_v36 }
 0x2a8   : > { %v1913_v13 = vpop.f32.mrf.mxu2 }
 0x2a9   : > { %v2355_v35 = vmax.f32 %v2323_v60, 0.0  ;;  %v1971_v26 = vadd.f32 %v1913_v13, %v1816_v62  ;;  %v1818_v62 = vadd.f32 %v1764_v43, %v5289_v18  ;;  %v2822_v13 = vmax.f32 %v2452_v24, %v3864_v38 }
 0x2aa   : > { %v2072_v39 = vpop.f32.mrf.mxu3 }
 0x2ab   : > { %v2455_v7 = vrot.slane %v2355_v35, 2  ;;  %v2456_v53 = vrot.slane %v2355_v35, 4  ;;  %v2457_v4 = vrot.slane %v2355_v35, 6  ;;  %v3923_v45 = vrot.slane %v2355_v35, 9 }
 0x2ac   : > { %v2130_v20 = vadd.f32 %v2072_v39, %v1971_v26 }
 0x2ad   : > { %v3924_v21 = vrot.slane %v2455_v7, 9  ;;  %v3925_v10 = vrot.slane %v2456_v53, 9  ;;  %v3926_v1 = vrot.slane %v2457_v4, 9  ;;  %v3073_v2 = vmax.f32 %v2355_v35, %v3923_v45 }
 0x2ae   : > { %v2288_v63 = vadd.f32 %v2230_v46, %v2130_v20  ;;  %v5688_v11 = vpop.f32.mrf.mxu1  ;;  %v2821_v46 = vmax.f32 %v5682_v42, %v3863_v31 }
 0x2af   : > { %v2236_v3 = vpop.f32.mrf.mxu0  ;;  %v3074_v28 = vmax.f32 %v2455_v7, %v3924_v21  ;;  %v3075_v55 = vmax.f32 %v2456_v53, %v3925_v10  ;;  %v3076_v52 = vmax.f32 %v2457_v4, %v3926_v1  ;;  %v3137_v48 = vmax.f32 %v2817_v6, %v3073_v2 }
 0x2b0   : > { %v2324_v9 = vadd.f32 %v5666_v41, %v2288_v63  ;;  %v1916_v51 = vpop.f32.mrf.mxu2  ;;  %v2823_v4 = vmax.f32 %v2453_v49, %v3865_v22 }
 0x2b1   : > { %v3138_v17 = vmax.f32 %v2818_v8, %v3074_v28  ;;  %v3139_v25 = vmax.f32 %v2819_v59, %v3075_v55  ;;  %v3140_v44 = vmax.f32 %v2820_v58, %v3076_v52  ;;  %v1972_v54 = vadd.f32 %v1916_v51, %v1817_v33 }
 0x2b2   : > { %v2356_v47 = vmax.f32 %v2324_v9, 0.0  ;;  %v2075_v36 = vpop.f32.mrf.mxu3  ;;  %v3265_v34 = vperm.slane %v3137_v48, 0  ;;  %v2824_v59 = vmax.f32 %v2454_v29, %v3866_v12 }
 0x2b3   : > { %v3266_v14 = vperm.slane %v3138_v17, 0  ;;  %v3267_v15 = vperm.slane %v3139_v25, 0  ;;  %v3268_v35 = vperm.slane %v3140_v44, 0  ;;  %v2131_v56 = vadd.f32 %v2075_v36, %v1972_v54 }
 0x2b4   : > { %v2458_v60 = vrot.slane %v2356_v47, 2  ;;  %v2459_v5 = vrot.slane %v2356_v47, 4  ;;  %v2460_v40 = vrot.slane %v2356_v47, 6  ;;  %v3927_v16 = vrot.slane %v2356_v47, 9 }
 0x2b5   : > { %v3332_v26 = vsel %vm3297_vm5, %v3266_v14, %v3265_v34  ;;  %v2289_v43 = vadd.f32 %v5678_v61, %v2131_v56  ;;  %v1819_v17 = vadd.f32 %v5688_v11, %v5299_v27 }
 0x2b6   : > { %v3333_v6 = vsel %vm3299_vm6, %v3267_v15, %v3332_v26  ;;  %v3928_v42 = vrot.slane %v2458_v60, 9  ;;  %v3929_v8 = vrot.slane %v2459_v5, 9  ;;  %v3930_v39 = vrot.slane %v2460_v40, 9  ;;  %v1770_v7 = vpop.f32.mrf.mxu1 }
 0x2b7   : > { %v2239_v53 = vpop.f32.mrf.mxu0  ;;  %v3334_v45 = vsel %vm3301_vm7, %v3268_v35, %v3333_v6  ;;  %v3077_v18 = vmax.f32 %v2356_v47, %v3927_v16  ;;  %v2325_v28 = vadd.f32 %v5666_v41, %v2289_v43  ;;  %v1820_v27 = vadd.f32 %v1770_v7, %v5309_v32 }
 0x2b8   : > { %v3078_v20 = vmax.f32 %v2458_v60, %v3928_v42  ;;  %v3079_v24 = vmax.f32 %v2459_v5, %v3929_v8  ;;  %v3080_v21 = vmax.f32 %v2460_v40, %v3930_v39  ;;  %v1919_v10 = vpop.f32.mrf.mxu2 }
 0x2b9   : > { %v3141_v1 = vmax.f32 %v2821_v46, %v3077_v18  ;;  %v1973_v2 = vadd.f32 %v1919_v10, %v1818_v62  ;;  %v2357_v9 = vmax.f32 %v2325_v28, 0.0 }
 0x2ba   : > { %v3142_v58 = vmax.f32 %v2822_v13, %v3078_v20  ;;  %v3143_v31 = vmax.f32 %v2823_v4, %v3079_v24  ;;  %v3144_v63 = vmax.f32 %v2824_v59, %v3080_v21  ;;  %v2078_v55 = vpop.f32.mrf.mxu3 }
 0x2bb   : > { %v3269_v49 = vperm.slane %v3141_v1, 0  ;;  %v2132_v52 = vadd.f32 %v2078_v55, %v1973_v2  ;;  %v2461_v54 = vrot.slane %v2357_v9, 2  ;;  %v2462_v15 = vrot.slane %v2357_v9, 4 }
 0x2bc   : > { %v3270_v48 = vperm.slane %v3142_v58, 0  ;;  %v3271_v38 = vperm.slane %v3143_v31, 0  ;;  %v3272_v29 = vperm.slane %v3144_v63, 0  ;;  %v2463_v62 = vrot.slane %v2357_v9, 6 }
 0x2bd   : > { %v3335_v61 = vsel %vm3303_vm8, %v3269_v49, %v3334_v45  ;;  %v2290_v51 = vadd.f32 %v2236_v3, %v2132_v52  ;;  %v3867_v60 = vrot.slane %v2357_v9, 9  ;;  %v3868_v5 = vrot.slane %v2461_v54, 9 }
 0x2be   : > { %v3336_v33 = vsel %vm3305_vm9, %v3270_v48, %v3335_v61  ;;  %v1773_v25 = vpop.f32.mrf.mxu1  ;;  %v3869_v13 = vrot.slane %v2462_v15, 9  ;;  %v3870_v35 = vrot.slane %v2463_v62, 9 }
 0x2bf   : > { %v3337_v22 = vsel %vm3307_vm10, %v3271_v38, %v3336_v33  ;;  %v2242_v44 = vpop.f32.mrf.mxu0  ;;  %v2326_v36 = vadd.f32 %v5666_v41, %v2290_v51  ;;  %v2825_v8 = vmax.f32 %v2357_v9, %v3867_v60  ;;  %v2826_v39 = vmax.f32 %v2461_v54, %v3868_v5 }
 0x2c0   : > { %v3338_v12 = vsel %vm3309_vm11, %v3272_v29, %v3337_v22  ;;  %v1922_v46 = vpop.f32.mrf.mxu2  ;;  %v2827_v32 = vmax.f32 %v2462_v15, %v3869_v13  ;;  %v2828_v7 = vmax.f32 %v2463_v62, %v3870_v35  ;;  %v1821_v61 = vadd.f32 %v1773_v25, %v5319_v50 }
 0x2c1   : > { %3372 = vst [vmem:[%s5486_s15 + $0x20] sm:$0xff] %v3338_v12  ;;  %v1974_v47 = vadd.f32 %v1922_v46, %v1819_v17  ;;  %v5707_v40 = vmax.f32 %v2326_v36, 0.0 }
 0x2c2   : > { %v2081_v34 = vpop.f32.mrf.mxu3 }
 0x2c3   : > { %v2133_v14 = vadd.f32 %v2081_v34, %v1974_v47  ;;  %v2465_v20 = vrot.slane %v5707_v40, 4  ;;  %v2466_v58 = vrot.slane %v5707_v40, 6  ;;  %v3871_v31 = vrot.slane %v5707_v40, 9 }
 0x2c5   : > { %v2291_v3 = vadd.f32 %v2239_v53, %v2133_v14  ;;  %v2464_v53 = vrot.slane %v5707_v40, 2  ;;  %v3873_v9 = vrot.slane %v2465_v20, 9  ;;  %v3874_v12 = vrot.slane %v2466_v58, 9 }
 0x2c6   : > { %v1776_v56 = vpop.f32.mrf.mxu1  ;;  %v2829_v46 = vmax.f32 %v5707_v40, %v3871_v31 }
 0x2c7   : > { %v2327_v11 = vadd.f32 %v5666_v41, %v2291_v3  ;;  %v5711_v16 = vpop.f32.mrf.mxu0  ;;  %v3872_v63 = vrot.slane %v2464_v53, 9  ;;  %v2831_v5 = vmax.f32 %v2465_v20, %v3873_v9 }
 0x2c8   : > { %v1925_v26 = vpop.f32.mrf.mxu2 }
 0x2c9   : > { %v2359_v6 = vmax.f32 %v2327_v11, 0.0  ;;  %v1975_v42 = vadd.f32 %v1925_v26, %v1820_v27  ;;  %v2830_v34 = vmax.f32 %v2464_v53, %v3872_v63 }
 0x2ca   : > { %v2084_v4 = vpop.f32.mrf.mxu3 }
 0x2cb   : > { %v2467_v45 = vrot.slane %v2359_v6, 2  ;;  %v2468_v18 = vrot.slane %v2359_v6, 4  ;;  %v2469_v43 = vrot.slane %v2359_v6, 6  ;;  %v3931_v59 = vrot.slane %v2359_v6, 9 }
 0x2cc   : > { %v2134_v24 = vadd.f32 %v2084_v4, %v1975_v42  ;;  %v2832_v4 = vmax.f32 %v2466_v58, %v3874_v12 }
 0x2cd   : > { %v3932_v21 = vrot.slane %v2467_v45, 9  ;;  %v3933_v10 = vrot.slane %v2468_v18, 9  ;;  %v3934_v1 = vrot.slane %v2469_v43, 9  ;;  %v3081_v2 = vmax.f32 %v2359_v6, %v3931_v59 }
 0x2ce   : > { %v2292_v28 = vadd.f32 %v2242_v44, %v2134_v24  ;;  %v1779_v36 = vpop.f32.mrf.mxu1 }
 0x2cf   : > { %v3082_v55 = vmax.f32 %v2467_v45, %v3932_v21  ;;  %v3083_v49 = vmax.f32 %v2468_v18, %v3933_v10  ;;  %v3084_v52 = vmax.f32 %v2469_v43, %v3934_v1  ;;  %v3145_v48 = vmax.f32 %v2825_v8, %v3081_v2  ;;  %v2248_v38 = vpop.f32.mrf.mxu0 }
 0x2d0   : > { %v2328_v29 = vadd.f32 %v5666_v41, %v2292_v28  ;;  %v1928_v33 = vpop.f32.mrf.mxu2 }
 0x2d1   : > { %v3146_v51 = vmax.f32 %v2826_v39, %v3082_v55  ;;  %v3147_v22 = vmax.f32 %v2827_v32, %v3083_v49  ;;  %v3148_v17 = vmax.f32 %v2828_v7, %v3084_v52  ;;  %v1976_v54 = vadd.f32 %v1928_v33, %v1821_v61 }
 0x2d2   : > { %v2360_v47 = vmax.f32 %v2328_v29, 0.0  ;;  %v2087_v44 = vpop.f32.mrf.mxu3  ;;  %v3273_v14 = vperm.slane %v3145_v48, 0  ;;  %v1822_v39 = vadd.f32 %v1776_v56, %v5329_v0  ;;  %v1823_v61 = vadd.f32 %v1779_v36, %v5339_v23 }
 0x2d3   : > { %v3274_v15 = vperm.slane %v3146_v51, 0  ;;  %v3275_v62 = vperm.slane %v3147_v22, 0  ;;  %v3276_v27 = vperm.slane %v3148_v17, 0  ;;  %v2135_v13 = vadd.f32 %v2087_v44, %v1976_v54 }
 0x2d4   : > { %v2470_v3 = vrot.slane %v2360_v47, 2  ;;  %v2471_v50 = vrot.slane %v2360_v47, 4  ;;  %v2472_v25 = vrot.slane %v2360_v47, 6  ;;  %v3935_v60 = vrot.slane %v2360_v47, 9 }
 0x2d5   : > { %v3339_v11 = vsel %vm3297_vm5, %v3274_v15, %v3273_v14  ;;  %v2293_v53 = vadd.f32 %v5711_v16, %v2135_v13 }
 0x2d6   : > { %v3340_v35 = vsel %vm3299_vm6, %v3275_v62, %v3339_v11  ;;  %v3936_v40 = vrot.slane %v2470_v3, 9  ;;  %v3937_v26 = vrot.slane %v2471_v50, 9  ;;  %v3938_v6 = vrot.slane %v2472_v25, 9  ;;  %v1782_v16 = vpop.f32.mrf.mxu1 }
 0x2d7   : > { %v3341_v42 = vsel %vm3301_vm7, %v3276_v27, %v3340_v35  ;;  %v3085_v8 = vmax.f32 %v2360_v47, %v3935_v60  ;;  %v2251_v20 = vpop.f32.mrf.mxu0  ;;  %v2329_v1 = vadd.f32 %v5666_v41, %v2293_v53  ;;  %v1824_v23 = vadd.f32 %v1782_v16, %v5349_v30 }
 0x2d8   : > { %v3086_v45 = vmax.f32 %v2470_v3, %v3936_v40  ;;  %v3087_v18 = vmax.f32 %v2471_v50, %v3937_v26  ;;  %v3088_v43 = vmax.f32 %v2472_v25, %v3938_v6  ;;  %v1931_v59 = vpop.f32.mrf.mxu2 }
 0x2d9   : > { %v3149_v32 = vmax.f32 %v2829_v46, %v3085_v8  ;;  %v1977_v7 = vadd.f32 %v1931_v59, %v1822_v39  ;;  %v2361_v49 = vmax.f32 %v2329_v1, 0.0 }
 0x2da   : > { %v3150_v24 = vmax.f32 %v2830_v34, %v3086_v45  ;;  %v3151_v21 = vmax.f32 %v2831_v5, %v3087_v18  ;;  %v3152_v10 = vmax.f32 %v2832_v4, %v3088_v43  ;;  %v2090_v2 = vpop.f32.mrf.mxu3 }
 0x2db   : > { %v3277_v31 = vperm.slane %v3149_v32, 0  ;;  %v2136_v63 = vadd.f32 %v2090_v2, %v1977_v7  ;;  %v2473_v51 = vrot.slane %v2361_v49, 2  ;;  %v2474_v47 = vrot.slane %v2361_v49, 4 }
 0x2dc   : > { %v3278_v0 = vperm.slane %v3150_v24, 0  ;;  %v3279_v56 = vperm.slane %v3151_v21, 0  ;;  %v3280_v28 = vperm.slane %v3152_v10, 0  ;;  %v2475_v54 = vrot.slane %v2361_v49, 6 }
 0x2dd   : > { %v3342_v58 = vsel %vm3303_vm8, %v3277_v31, %v3341_v42  ;;  %v2294_v52 = vadd.f32 %v2248_v38, %v2136_v63  ;;  %v3875_v34 = vrot.slane %v2361_v49, 9  ;;  %v3876_v38 = vrot.slane %v2473_v51, 9 }
 0x2de   : > { %v3343_v55 = vsel %vm3305_vm9, %v3278_v0, %v3342_v58  ;;  %v1785_v15 = vpop.f32.mrf.mxu1  ;;  %v3877_v62 = vrot.slane %v2474_v47, 9  ;;  %v3878_v3 = vrot.slane %v2475_v54, 9 }
 0x2df   : > { %v3344_v48 = vsel %vm3307_vm10, %v3279_v56, %v3343_v55  ;;  %v2330_v22 = vadd.f32 %v5666_v41, %v2294_v52  ;;  %v2254_v46 = vpop.f32.mrf.mxu0  ;;  %v2833_v5 = vmax.f32 %v2361_v49, %v3875_v34  ;;  %v2834_v27 = vmax.f32 %v2473_v51, %v3876_v38 }
 0x2e0   : > { %v3345_v29 = vsel %vm3309_vm11, %v3280_v28, %v3344_v48  ;;  %v1934_v33 = vpop.f32.mrf.mxu2  ;;  %v2835_v42 = vmax.f32 %v2474_v47, %v3877_v62  ;;  %v2836_v8 = vmax.f32 %v2475_v54, %v3878_v3  ;;  %v1825_v2 = vadd.f32 %v1785_v15, %v5359_v19 }
 0x2e1   : > { %3373 = vst [vmem:[%s5486_s15 + $0x28] sm:$0xff] %v3345_v29  ;;  %v1978_v9 = vadd.f32 %v1934_v33, %v1823_v61  ;;  %v5733_v14 = vmax.f32 %v2330_v22, 0.0 }
 0x2e2   : > { %v2093_v17 = vpop.f32.mrf.mxu3 }
 0x2e3   : > { %v2137_v12 = vadd.f32 %v2093_v17, %v1978_v9  ;;  %v2476_v11 = vrot.slane %v5733_v14, 2  ;;  %v2477_v30 = vrot.slane %v5733_v14, 4  ;;  %v2478_v59 = vrot.slane %v5733_v14, 6 }
 0x2e4   : > { %v3879_v32 = vrot.slane %v5733_v14, 9 }
 0x2e5   : > { %v2295_v44 = vadd.f32 %v2251_v20, %v2137_v12  ;;  %v3880_v7 = vrot.slane %v2476_v11, 9  ;;  %v3881_v56 = vrot.slane %v2477_v30, 9  ;;  %v3882_v55 = vrot.slane %v2478_v59, 9 }
 0x2e6   : > { %v1788_v0 = vpop.f32.mrf.mxu1  ;;  %v2837_v49 = vmax.f32 %v5733_v14, %v3879_v32 }
 0x2e7   : > { %v2331_v36 = vadd.f32 %v5666_v41, %v2295_v44  ;;  %v2257_v43 = vpop.f32.mrf.mxu0  ;;  %v2838_v29 = vmax.f32 %v2476_v11, %v3880_v7  ;;  %v1826_v3 = vadd.f32 %v1788_v0, %v5369_v37 }
 0x2e8   : > { %v1937_v50 = vpop.f32.mrf.mxu2 }
 0x2e9   : > { %v2363_v25 = vmax.f32 %v2331_v36, 0.0  ;;  %v1979_v60 = vadd.f32 %v1937_v50, %v1824_v23  ;;  %v2840_v23 = vmax.f32 %v2478_v59, %v3882_v55 }
 0x2ea   : > { %v2096_v13 = vpop.f32.mrf.mxu3 }
 0x2eb   : > { %v2479_v35 = vrot.slane %v2363_v25, 2  ;;  %v2480_v40 = vrot.slane %v2363_v25, 4  ;;  %v2481_v26 = vrot.slane %v2363_v25, 6  ;;  %v3939_v6 = vrot.slane %v2363_v25, 9 }
 0x2ec   : > { %v2138_v39 = vadd.f32 %v2096_v13, %v1979_v60 }
 0x2ed   : > { %v3940_v53 = vrot.slane %v2479_v35, 9  ;;  %v3941_v4 = vrot.slane %v2480_v40, 9  ;;  %v3942_v45 = vrot.slane %v2481_v26, 9  ;;  %v3089_v18 = vmax.f32 %v2363_v25, %v3939_v6 }
 0x2ee   : > { %v2296_v20 = vadd.f32 %v2254_v46, %v2138_v39  ;;  %v2839_v46 = vmax.f32 %v2477_v30, %v3881_v56 }
 0x2ef   : > { %v3090_v24 = vmax.f32 %v2479_v35, %v3940_v53  ;;  %v3091_v21 = vmax.f32 %v2480_v40, %v3941_v4  ;;  %v3092_v10 = vmax.f32 %v2481_v26, %v3942_v45  ;;  %v3153_v1 = vmax.f32 %v2833_v5, %v3089_v18  ;;  %v2260_v50 = vpop.f32.mrf.mxu0 }
 0x2f0   : > { %v2332_v31 = vadd.f32 %v5666_v41, %v2296_v20  ;;  %v1940_v63 = vpop.f32.mrf.mxu2 }
 0x2f1   : > { %v3154_v16 = vmax.f32 %v2834_v27, %v3090_v24  ;;  %v3155_v58 = vmax.f32 %v2835_v42, %v3091_v21  ;;  %v3156_v28 = vmax.f32 %v2836_v8, %v3092_v10  ;;  %v1980_v48 = vadd.f32 %v1940_v63, %v1825_v2  ;;  %v1791_v42 = vpop.f32.mrf.mxu1 }
 0x2f2   : > { %v2364_v52 = vmax.f32 %v2332_v31, 0.0  ;;  %v2099_v61 = vpop.f32.mrf.mxu3  ;;  %v3281_v33 = vperm.slane %v3153_v1, 0  ;;  %v1827_v32 = vadd.f32 %v1791_v42, %v5379_v57 }
 0x2f3   : > { %v3282_v9 = vperm.slane %v3154_v16, 0  ;;  %v3283_v51 = vperm.slane %v3155_v58, 0  ;;  %v3284_v47 = vperm.slane %v3156_v28, 0  ;;  %v2139_v44 = vadd.f32 %v2099_v61, %v1980_v48 }
 0x2f4   : > { %v2482_v22 = vrot.slane %v2364_v52, 2  ;;  %v2483_v19 = vrot.slane %v2364_v52, 4  ;;  %v2484_v17 = vrot.slane %v2364_v52, 6  ;;  %v3943_v12 = vrot.slane %v2364_v52, 9 }
 0x2f5   : > { %v3346_v54 = vsel %vm3297_vm5, %v3282_v9, %v3281_v33  ;;  %v2297_v27 = vadd.f32 %v2257_v43, %v2139_v44 }
 0x2f6   : > { %v3347_v34 = vsel %vm3299_vm6, %v3283_v51, %v3346_v54  ;;  %v3944_v38 = vrot.slane %v2482_v22, 9  ;;  %v3945_v14 = vrot.slane %v2483_v19, 9  ;;  %v3946_v15 = vrot.slane %v2484_v17, 9 }
 0x2f7   : > { %v3348_v36 = vsel %vm3301_vm7, %v3284_v47, %v3347_v34  ;;  %v3093_v62 = vmax.f32 %v2364_v52, %v3943_v12  ;;  %v2333_v4 = vadd.f32 %v5666_v41, %v2297_v27  ;;  %v2263_v10 = vpop.f32.mrf.mxu0 }
 0x2f8   : > { %v3094_v25 = vmax.f32 %v2482_v22, %v3944_v38  ;;  %v3095_v60 = vmax.f32 %v2483_v19, %v3945_v14  ;;  %v3096_v5 = vmax.f32 %v2484_v17, %v3946_v15  ;;  %v1943_v11 = vpop.f32.mrf.mxu2 }
 0x2f9   : > { %v3157_v13 = vmax.f32 %v2837_v49, %v3093_v62  ;;  %v1981_v6 = vadd.f32 %v1943_v11, %v1826_v3  ;;  %v2365_v20 = vmax.f32 %v2333_v4, 0.0  ;;  %v1794_v16 = vpop.f32.mrf.mxu1  ;;  %v6025_v49 = vld [vmem:[#allocation26_spill] sm:$0xff] }
 0x2fa   : > { %v3158_v35 = vmax.f32 %v2838_v29, %v3094_v25  ;;  %v3159_v40 = vmax.f32 %v2839_v46, %v3095_v60  ;;  %v3160_v26 = vmax.f32 %v2840_v23, %v3096_v5  ;;  %v2102_v8 = vpop.f32.mrf.mxu3  ;;  %v1828_v57 = vadd.f32 %v1794_v16, %v6025_v49 }
 0x2fb   : > { %v3285_v30 = vperm.slane %v3157_v13, 0  ;;  %v2140_v43 = vadd.f32 %v2102_v8, %v1981_v6  ;;  %v2485_v63 = vrot.slane %v2365_v20, 2  ;;  %v2486_v0 = vrot.slane %v2365_v20, 4 }
 0x2fc   : > { %v3286_v39 = vperm.slane %v3158_v35, 0  ;;  %v3287_v53 = vperm.slane %v3159_v40, 0  ;;  %v3288_v45 = vperm.slane %v3160_v26, 0  ;;  %v2487_v56 = vrot.slane %v2365_v20, 6 }
 0x2fd   : > { %v3349_v37 = vsel %vm3303_vm8, %v3285_v30, %v3348_v36  ;;  %v2298_v1 = vadd.f32 %v2260_v50, %v2140_v43  ;;  %v3883_v28 = vrot.slane %v2365_v20, 9  ;;  %v3884_v48 = vrot.slane %v2485_v63, 9 }
 0x2fe   : > { %v3350_v18 = vsel %vm3305_vm9, %v3286_v39, %v3349_v37  ;;  %v3885_v61 = vrot.slane %v2486_v0, 9  ;;  %v3886_v29 = vrot.slane %v2487_v56, 9 }
 0x2ff   : > { %v3351_v59 = vsel %vm3307_vm10, %v3287_v53, %v3350_v18  ;;  %v2334_v55 = vadd.f32 %v5666_v41, %v2298_v1  ;;  %v2841_v22 = vmax.f32 %v2365_v20, %v3883_v28  ;;  %v2266_v44 = vpop.f32.mrf.mxu0  ;;  %v2842_v34 = vmax.f32 %v2485_v63, %v3884_v48 }
 0x300   : > { %v3352_v7 = vsel %vm3309_vm11, %v3288_v45, %v3351_v59  ;;  %v1946_v24 = vpop.f32.mrf.mxu2  ;;  %v2843_v38 = vmax.f32 %v2486_v0, %v3885_v61  ;;  %v2844_v14 = vmax.f32 %v2487_v56, %v3886_v29 }
 0x301   : > { %3374 = vst [vmem:[%s5486_s15 + $0x30] sm:$0xff] %v3352_v7  ;;  %v1982_v21 = vadd.f32 %v1946_v24, %v1827_v32  ;;  %v2366_v19 = vmax.f32 %v2334_v55, 0.0 }
 0x302   : > { %v2105_v2 = vpop.f32.mrf.mxu3 }
 0x303   : > { %v2141_v31 = vadd.f32 %v2105_v2, %v1982_v21  ;;  %v2488_v50 = vrot.slane %v2366_v19, 2  ;;  %v2489_v25 = vrot.slane %v2366_v19, 4  ;;  %v2490_v60 = vrot.slane %v2366_v19, 6 }
 0x304   : > { %v3887_v26 = vrot.slane %v2366_v19, 9 }
 0x305   : > { %v2299_v58 = vadd.f32 %v2263_v10, %v2141_v31  ;;  %v3888_v30 = vrot.slane %v2488_v50, 9  ;;  %v3889_v39 = vrot.slane %v2489_v25, 9  ;;  %v3890_v4 = vrot.slane %v2490_v60, 9 }
 0x306   : > { %v2845_v20 = vmax.f32 %v2366_v19, %v3887_v26 }
 0x307   : > { %v2335_v52 = vadd.f32 %v5666_v41, %v2299_v58  ;;  %v2846_v31 = vmax.f32 %v2488_v50, %v3888_v30  ;;  %v2847_v63 = vmax.f32 %v2489_v25, %v3889_v39  ;;  %v2848_v16 = vmax.f32 %v2490_v60, %v3890_v4 }
 0x308   : > { %v1949_v33 = vpop.f32.mrf.mxu2 }
 0x309   : > { %v2367_v9 = vmax.f32 %v2335_v52, 0.0  ;;  %v1983_v51 = vadd.f32 %v1949_v33, %v1828_v57 }
 0x30a   : > { %v2108_v17 = vpop.f32.mrf.mxu3 }
 0x30b   : > { %v2491_v12 = vrot.slane %v2367_v9, 2  ;;  %v2492_v46 = vrot.slane %v2367_v9, 4  ;;  %v2493_v47 = vrot.slane %v2367_v9, 6  ;;  %v3947_v54 = vrot.slane %v2367_v9, 9 }
 0x30c   : > { %v2142_v15 = vadd.f32 %v2108_v17, %v1983_v51 }
 0x30d   : > { %v3948_v23 = vrot.slane %v2491_v12, 9  ;;  %v3949_v36 = vrot.slane %v2492_v46, 9  ;;  %v3950_v62 = vrot.slane %v2493_v47, 9  ;;  %v3097_v3 = vmax.f32 %v2367_v9, %v3947_v54 }
 0x30e   : > { %v2300_v5 = vadd.f32 %v2266_v44, %v2142_v15 }
 0x30f   : > { %v3098_v27 = vmax.f32 %v2491_v12, %v3948_v23  ;;  %v3099_v11 = vmax.f32 %v2492_v46, %v3949_v36  ;;  %v3100_v13 = vmax.f32 %v2493_v47, %v3950_v62  ;;  %v3161_v35 = vmax.f32 %v2841_v22, %v3097_v3 }
 0x310   : > { %v2336_v40 = vadd.f32 %v5666_v41, %v2300_v5 }
 0x311   : > { %v3162_v6 = vmax.f32 %v2842_v34, %v3098_v27  ;;  %v3163_v42 = vmax.f32 %v2843_v38, %v3099_v11  ;;  %v3164_v8 = vmax.f32 %v2844_v14, %v3100_v13  ;;  %v3289_v37 = vperm.slane %v3161_v35, 0 }
 0x312   : > { %v2368_v53 = vmax.f32 %v2336_v40, 0.0 }
 0x313   : > { %v3290_v45 = vperm.slane %v3162_v6, 0  ;;  %v3291_v18 = vperm.slane %v3163_v42, 0  ;;  %v3292_v24 = vperm.slane %v3164_v8, 0 }
 0x314   : > { %v2494_v43 = vrot.slane %v2368_v53, 2  ;;  %v2495_v59 = vrot.slane %v2368_v53, 4  ;;  %v2496_v32 = vrot.slane %v2368_v53, 6  ;;  %v3951_v7 = vrot.slane %v2368_v53, 9 }
 0x315   : > { %v3353_v41 = vsel %vm3297_vm5, %v3290_v45, %v3289_v37 }
 0x316   : > { %v3354_v21 = vsel %vm3299_vm6, %v3291_v18, %v3353_v41  ;;  %v3952_v10 = vrot.slane %v2494_v43, 9  ;;  %v3953_v1 = vrot.slane %v2495_v59, 9  ;;  %v3954_v2 = vrot.slane %v2496_v32, 9 }
 0x317   : > { %v3355_v0 = vsel %vm3301_vm7, %v3292_v24, %v3354_v21  ;;  %v3101_v56 = vmax.f32 %v2368_v53, %v3951_v7 }
 0x318   : > { %v3102_v58 = vmax.f32 %v2494_v43, %v3952_v10  ;;  %v3103_v28 = vmax.f32 %v2495_v59, %v3953_v1  ;;  %v3104_v55 = vmax.f32 %v2496_v32, %v3954_v2 }
 0x319   : > { %v3165_v49 = vmax.f32 %v2845_v20, %v3101_v56 }
 0x31a   : > { %v3166_v57 = vmax.f32 %v2846_v31, %v3102_v58  ;;  %v3167_v52 = vmax.f32 %v2847_v63, %v3103_v28  ;;  %v3168_v48 = vmax.f32 %v2848_v16, %v3104_v55 }
 0x31b   : > { %v3293_v61 = vperm.slane %v3165_v49, 0 }
 0x31c   : > { %v3294_v29 = vperm.slane %v3166_v57, 0  ;;  %v3295_v33 = vperm.slane %v3167_v52, 0  ;;  %v3296_v51 = vperm.slane %v3168_v48, 0 }
 0x31d   : > { %v3356_v9 = vsel %vm3303_vm8, %v3293_v61, %v3355_v0 }
 0x31e   : > { %v3357_v22 = vsel %vm3305_vm9, %v3294_v29, %v3356_v9 }
 0x31f   : > { %v3358_v19 = vsel %vm3307_vm10, %v3295_v33, %v3357_v22 }
 0x320   : > { %v3359_v17 = vsel %vm3309_vm11, %v3296_v51, %v3358_v19 }
 0x321   : > { %3375 = vst [vmem:[%s5486_s15 + $0x38] sm:$0xff] %v3359_v17 }
 0x322   : > { %4082 = shalt.err (!%p4079_p5)
}
 0x323   : > { %s4136_s13 = smov 128   ;;  %s4137_s15 = smov 8  }
 0x324   : > { %3968 = dma.vmem_to_hbm [thread:$0]  (%p4208_p4), %s3392_s1, 1024, %s3394_s30, %s3377_s6, %s4136_s13, %s4136_s13, %s4137_s15  }
 0x325 PF: > { %p3974_p6 = scmp.ge.s32.totalorder %s4133_s21, 2  ;;  %s3408_s16 = sand.u32 1, %s4113_s18  }
 0x326   : > { %s3409_s17 = scalar_lea.sflag [#allocation4], %s3408_s16 }
 0x327   : > { %p3971_p7 = pnand %p3974_p6, %p4215_p8 }
 0x329   : > { %p3972_p9 = pneg %p3971_p7 }
 0x32b   : > { %4108 = dma.done.wait (%p3972_p9), %s3409_s17, 1024  }
 0x32c   : > { %4110 = vsyncadd (%p3972_p9), %s3409_s17, 4294966272  ;;  %s18_s21 = sadd.s32 1, %s4133_s21   ;;  %s6026_s18 = smov %s4117_s19 }
 0x32d   : > { %p15_p10 = scmp.ge.s32.totalorder %s18_s21, 4   ;;  %s6027_s19 = smov %s4121_s20 }
 0x32e   : > { %s6028_s20 = smov %s4221_s29  ;;  %s6029_s1 = smov %s4129_s2 }
 0x32f   : > { %s6030_s2 = smov %s6032_s24  ;;  %17 = sbr.rel (!%p15_p10) target bundleno = 4 (0x4), region = 100 }
 0x334   :  { %3415 = vsyncpa [#allocation4], 1 }
 0x335   :  { %3417 = vsyncpa [#allocation4 + $0x1], 1 }

</bundles_post_ra>
